<compile_context>
chip_gen: v6e
topology: v6e:2x2x1
jax: 0.10.0
libtpu: 0.0.40
codegen_flags: <defaults>
</compile_context>

<pallas_src>
import jax
import jax.numpy as jnp
from jax import lax
from jax.experimental import pallas as pl
from jax.experimental.pallas import tpu as pltpu

INV_SQRT2 = 0.7071067811865476
_DECONV_TARGET_ROWS = 1024      # matmul rows per deconv grid step
_CONV_TARGET_ROWS = 1024        # matmul rows per conv grid step
_VMEM_LIMIT = 64 * 1024 * 1024  # safe on v5e/v6e (128 MiB) and v7x (64 MiB)


def _gelu_exact(y):
    # exact (erf-based) GELU, matching torch.nn.GELU() default
    return 0.5 * y * (1.0 + lax.erf(y * INV_SQRT2))


def _pick_tile(total, limit):
    """Largest divisor of `total` that is <= limit (>= 1)."""
    limit = max(1, min(total, limit))
    for d in range(limit, 0, -1):
        if total % d == 0:
            return d
    return 1


# ----------------------------- Pallas kernels -----------------------------

def _deconv_kernel(x_ref, s_ref, wx_ref, ws_ref, b_ref, o_ref):
    # x_ref: (TR*W, Cx) bf16, s_ref: (TR*W, Cs) bf16  (x / skip channels kept separate,
    #   so the torch.cat over channels is never materialized).
    # wx_ref: (2, Cx, 2*Cout) bf16, ws_ref: (2, Cs, 2*Cout) bf16, b_ref: (1, 2*Cout) f32.
    # o_ref: (TR, 2, W, 2*Cout); lane ordering of the last dim is (kw, cout) so that the
    #   full (N*H, 2, W, 2*Cout) output reshapes to (N, 2H, 2W, Cout) for free.
    TR, _, W, C2 = o_ref.shape
    x2 = x_ref[...]
    s2 = s_ref[...]
    for a in range(2):  # a = kh = output-row offset of the 2x2 transposed kernel
        y = (jnp.dot(x2, wx_ref[a], preferred_element_type=jnp.float32)
             + jnp.dot(s2, ws_ref[a], preferred_element_type=jnp.float32)
             + b_ref[...])
        o_ref[:, a, :, :] = y.reshape(TR, W, C2).astype(o_ref.dtype)


def _conv_bn_gelu_kernel(x_ref, w_ref, scale_ref, shift_ref, o_ref):
    # x_ref: (1, TH+2, W+2, Cin) bf16 halo tile; w_ref: (9, Cin, Cout) bf16;
    # scale/shift: (1, Cout) f32 (conv bias + BatchNorm folded); o_ref: (TH*W, Cout).
    # im2col is fused: 9 shifted matmuls accumulated in f32, then BN + GELU, one store.
    _, thp2, twp2, cin = x_ref.shape
    th, tw = thp2 - 2, twp2 - 2
    cout = o_ref.shape[-1]
    xb = x_ref[0]                                        # (TH+2, W+2, Cin)
    acc = jnp.zeros((th * tw, cout), jnp.float32)
    for kh in range(3):
        for kw in range(3):
            patch = xb[kh:kh + th, kw:kw + tw, :]        # (TH, W, Cin)
            acc = acc + jnp.dot(patch.reshape(th * tw, cin),
                                w_ref[kh * 3 + kw],
                                preferred_element_type=jnp.float32)
    y = acc * scale_ref[...] + shift_ref[...]            # fused (folded) BatchNorm
    o_ref[...] = _gelu_exact(y).astype(o_ref.dtype)      # fused GELU


# ----------------------------- wrappers (glue) -----------------------------

def conv_transpose_2x2(x_nhwc, skip_nhwc, w_pt, bias, out_dtype=jnp.bfloat16):
    """PyTorch ConvTranspose2d(kernel=2, stride=2) applied to cat([x, skip], channel).

    w_pt: (Cin, Cout, 2, 2).  The concat is done implicitly by splitting the weight
    along Cin; the kernel output layout makes the (N, 2H, 2W, Cout) reshape free.
    """
    N, H, W, Cx = x_nhwc.shape
    Cs = skip_nhwc.shape[-1]
    Cin, Cout = w_pt.shape[0], w_pt.shape[1]
    assert Cin == Cx + Cs

    # (Cin, Cout, kh, kw) -> (kh, Cin, kw, Cout) -> (2, Cin, 2*Cout); lanes = (kw, cout)
    w_abc = jnp.transpose(w_pt, (2, 0, 3, 1)).reshape(2, Cin, 2 * Cout)
    wx = w_abc[:, :Cx, :].astype(jnp.bfloat16)
    ws = w_abc[:, Cx:, :].astype(jnp.bfloat16)
    b2 = jnp.tile(bias, 2)[None, :].astype(jnp.float32)   # lane (kw, c) -> bias[c]

    NH = N * H
    x2d = x_nhwc.reshape(NH * W, Cx)                       # free reshape (contiguous)
    s2d = skip_nhwc.reshape(NH * W, Cs)

    limit = max(1, _DECONV_TARGET_ROWS // max(W, 1))
    if NH > 1:
        limit = min(limit, NH // 2)   # >= 2 grid steps: pipelining + megacore sharding
    TR = _pick_tile(NH, limit)

    out = pl.pallas_call(
        _deconv_kernel,
        out_shape=jax.ShapeDtypeStruct((NH, 2, W, 2 * Cout), out_dtype),
        grid=(NH // TR,),
        in_specs=[
            pl.BlockSpec((TR * W, Cx), lambda i: (i, 0)),
            pl.BlockSpec((TR * W, Cs), lambda i: (i, 0)),
            pl.BlockSpec((2, Cx, 2 * Cout), lambda i: (0, 0, 0)),
            pl.BlockSpec((2, Cs, 2 * Cout), lambda i: (0, 0, 0)),
            pl.BlockSpec((1, 2 * Cout), lambda i: (0, 0)),
        ],
        out_specs=pl.BlockSpec((TR, 2, W, 2 * Cout), lambda i: (i, 0, 0, 0)),
        compiler_params=pltpu.CompilerParams(
            dimension_semantics=("parallel",),
            vmem_limit_bytes=_VMEM_LIMIT),
    )(x2d, s2d, wx, ws, b2)

    # (NH, 2, W, 2, Cout) is already contiguous as (N, 2H, 2W, Cout): free reshape,
    # no XLA transpose / pixel-shuffle HBM round trip.
    return out.reshape(N, 2 * H, 2 * W, Cout)


def conv3x3_bn_gelu(x_nhwc, p, out_dtype=jnp.bfloat16, eps=1e-5):
    """Conv2d(3,1,1) + BatchNorm2d(eval) + GELU fused in one Pallas kernel (no im2col)."""
    N, H, W, Cin = x_nhwc.shape
    Cout = p["w"].shape[0]

    # PyTorch conv weight (Cout, Cin, 3, 3) -> (kh, kw, Cin, Cout) -> (9, Cin, Cout)
    w9 = jnp.transpose(p["w"], (2, 3, 1, 0)).reshape(9, Cin, Cout).astype(jnp.bfloat16)
    # fold conv bias + BN running stats into scale/shift (eval-mode BatchNorm)
    scale = (p["gamma"] / jnp.sqrt(p["var"] + eps)).astype(jnp.float32)
    shift = (p["beta"] + scale * (p["b"] - p["mean"])).astype(jnp.float32)

    TH = _pick_tile(H, max(1, _CONV_TARGET_ROWS // max(W, 1)))
    n_t = H // TH

    # Halo row-tiles built once in HBM: ~(TH+2)/TH x the activation, vs 9x for im2col.
    xp = jnp.pad(x_nhwc, ((0, 0), (1, 1), (1, 1), (0, 0)))
    tiles = [xp[:, t * TH:t * TH + TH + 2] for t in range(n_t)]
    x_tiled = jnp.stack(tiles, axis=1).reshape(N * n_t, TH + 2, W + 2, Cin)

    NT = N * n_t
    out = pl.pallas_call(
        _conv_bn_gelu_kernel,
        out_shape=jax.ShapeDtypeStruct((NT * TH * W, Cout), out_dtype),
        grid=(NT,),
        in_specs=[
            pl.BlockSpec((1, TH + 2, W + 2, Cin), lambda i: (i, 0, 0, 0)),
            pl.BlockSpec((9, Cin, Cout), lambda i: (0, 0, 0)),
            pl.BlockSpec((1, Cout), lambda i: (0, 0)),
            pl.BlockSpec((1, Cout), lambda i: (0, 0)),
        ],
        out_specs=pl.BlockSpec((TH * W, Cout), lambda i: (i, 0)),
        compiler_params=pltpu.CompilerParams(
            dimension_semantics=("parallel",),
            vmem_limit_bytes=_VMEM_LIMIT),
    )(x_tiled, w9, scale[None, :], shift[None, :])

    # rows are ordered (n, tile, row-in-tile, w) == (n, h, w): free reshape
    return out.reshape(N, H, W, Cout)


def unet_up_forward(params, x_nchw, skip_nchw):
    # forward: cat(channel) -> ConvTranspose2d(2,2) -> 2x ResidualConvBlock (is_res=False,
    # i.e. conv3x3->BN->GELU four times). NHWC + bf16 inside; NCHW f32 at the edges.
    x = jnp.transpose(x_nchw, (0, 2, 3, 1)).astype(jnp.bfloat16)
    skip = jnp.transpose(skip_nchw, (0, 2, 3, 1)).astype(jnp.bfloat16)
    h = conv_transpose_2x2(x, skip, params["deconv_w"], params["deconv_b"])
    convs = [cb for block in params["blocks"] for cb in block]
    for li, p in enumerate(convs):
        last = li == len(convs) - 1
        h = conv3x3_bn_gelu(h, p, out_dtype=jnp.float32 if last else jnp.bfloat16)
    return jnp.transpose(h, (0, 3, 1, 2))                 # back to NCHW


# ----------------------------- deterministic params -----------------------------

def init_unet_up_params(key, in_channels, out_channels):
    keys = iter(jax.random.split(key, 64))

    def rnd(shape, scl=0.1):
        return scl * jax.random.normal(next(keys), shape, jnp.float32)

    def conv_bn():
        return {
            "w": rnd((out_channels, out_channels, 3, 3)),
            "b": rnd((out_channels,)),
            "gamma": 1.0 + rnd((out_channels,)),
            "beta": rnd((out_channels,)),
            "mean": rnd((out_channels,)),
            "var": 1.0 + 0.5 * jax.random.uniform(next(keys), (out_channels,), jnp.float32),
        }

    params = {
        "deconv_w": rnd((in_channels, out_channels, 2, 2)),   # PyTorch ConvTranspose2d layout
        "deconv_b": rnd((out_channels,)),
        "blocks": [[conv_bn(), conv_bn()], [conv_bn(), conv_bn()]],
    }
    return params


# ----------------------------- main -----------------------------

if __name__ == "__main__":
    key = jax.random.PRNGKey(0)
    kx, ks, kp = jax.random.split(key, 3)

    N, Cx, Cskip, H, W = 2, 4, 4, 8, 8
    in_channels = Cx + Cskip      # channels after torch.cat((x, skip), 1)
    out_channels = 8

    x = jax.random.normal(kx, (N, Cx, H, W), jnp.float32)
    skip = jax.random.normal(ks, (N, Cskip, H, W), jnp.float32)
    params = init_unet_up_params(kp, in_channels, out_channels)

    out = jax.jit(unet_up_forward)(params, x, skip)
    out = jax.block_until_ready(out)
    assert out.shape == (N, out_channels, 2 * H, 2 * W), out.shape
    assert bool(jnp.all(jnp.isfinite(out)))
    print("KERNEL_OK")
</pallas_src>

<mosaic_0001>
module attributes {stable_mosaic.version = 11 : i64} {
  func.func @_deconv_kernel(%arg0: i32, %arg1: memref<64x4xbf16, #tpu.memory_space<vmem>>, %arg2: memref<64x4xbf16, #tpu.memory_space<vmem>>, %arg3: memref<2x4x16xbf16, #tpu.memory_space<vmem>>, %arg4: memref<2x4x16xbf16, #tpu.memory_space<vmem>>, %arg5: memref<1x16xf32, #tpu.memory_space<vmem>>, %arg6: memref<8x2x8x16xbf16, #tpu.memory_space<vmem>>) attributes {dimension_semantics = [#tpu.dimension_semantics<parallel>], iteration_bounds = array<i64: 2>, scalar_prefetch = 0 : i64, scratch_operands = 0 : i64, tpu.core_type = #tpu.core_type<tc>, window_params = [{transform_indices = @transform_0, window_bounds = array<i64: 64, 4>}, {transform_indices = @transform_1, window_bounds = array<i64: 64, 4>}, {pipeline_mode = #tpu.pipeline_mode<synchronous>, transform_indices = @transform_2, window_bounds = array<i64: 2, 4, 16>}, {pipeline_mode = #tpu.pipeline_mode<synchronous>, transform_indices = @transform_3, window_bounds = array<i64: 2, 4, 16>}, {pipeline_mode = #tpu.pipeline_mode<synchronous>, transform_indices = @transform_4, window_bounds = array<i64: 1, 16>}, {transform_indices = @transform_5, window_bounds = array<i64: 8, 2, 8, 16>}]} {
    %c0 = arith.constant 0 : index
    %c0_0 = arith.constant 0 : index
    %0 = vector.load %arg1[%c0, %c0_0] : memref<64x4xbf16, #tpu.memory_space<vmem>>, vector<64x4xbf16>
    %c0_1 = arith.constant 0 : index
    %c0_2 = arith.constant 0 : index
    %1 = vector.load %arg2[%c0_1, %c0_2] : memref<64x4xbf16, #tpu.memory_space<vmem>>, vector<64x4xbf16>
    %c0_3 = arith.constant 0 : index
    %c0_4 = arith.constant 0 : index
    %c0_5 = arith.constant 0 : index
    %2 = vector.load %arg3[%c0_3, %c0_4, %c0_5] : memref<2x4x16xbf16, #tpu.memory_space<vmem>>, vector<1x4x16xbf16>
    %3 = vector.shape_cast %2 : vector<1x4x16xbf16> to vector<4x16xbf16>
    %cst = arith.constant dense<0.000000e+00> : vector<64x16xf32>
    %4 = tpu.matmul %0, %3, %cst {dimension_numbers = #tpu.dot_dimension_numbers<[1], [0], [0], [1], [0, 0, 1, 1], [], []>} : vector<64x4xbf16>, vector<4x16xbf16>, vector<64x16xf32> -> vector<64x16xf32>
    %c0_6 = arith.constant 0 : index
    %c0_7 = arith.constant 0 : index
    %c0_8 = arith.constant 0 : index
    %5 = vector.load %arg4[%c0_6, %c0_7, %c0_8] : memref<2x4x16xbf16, #tpu.memory_space<vmem>>, vector<1x4x16xbf16>
    %6 = vector.shape_cast %5 : vector<1x4x16xbf16> to vector<4x16xbf16>
    %cst_9 = arith.constant dense<0.000000e+00> : vector<64x16xf32>
    %7 = tpu.matmul %1, %6, %cst_9 {dimension_numbers = #tpu.dot_dimension_numbers<[1], [0], [0], [1], [0, 0, 1, 1], [], []>} : vector<64x4xbf16>, vector<4x16xbf16>, vector<64x16xf32> -> vector<64x16xf32>
    %8 = arith.addf %4, %7 : vector<64x16xf32>
    %c0_10 = arith.constant 0 : index
    %c0_11 = arith.constant 0 : index
    %9 = vector.load %arg5[%c0_10, %c0_11] : memref<1x16xf32, #tpu.memory_space<vmem>>, vector<1x16xf32>
    %10 = vector.broadcast %9 : vector<1x16xf32> to vector<64x16xf32>
    %11 = arith.addf %8, %10 : vector<64x16xf32>
    %12 = vector.shape_cast %11 : vector<64x16xf32> to vector<8x8x16xf32>
    %13 = arith.truncf %12 : vector<8x8x16xf32> to vector<8x8x16xbf16>
    %c0_12 = arith.constant 0 : index
    %c0_13 = arith.constant 0 : index
    %c0_14 = arith.constant 0 : index
    %c0_15 = arith.constant 0 : index
    %14 = vector.load %arg6[%c0_12, %c0_13, %c0_14, %c0_15] : memref<8x2x8x16xbf16, #tpu.memory_space<vmem>>, vector<8x1x8x16xbf16>
    %15 = vector.shape_cast %14 : vector<8x1x8x16xbf16> to vector<8x8x16xbf16>
    %16 = vector.shape_cast %13 : vector<8x8x16xbf16> to vector<8x1x8x16xbf16>
    tpu.vector_store %arg6[%c0_12, %c0_13, %c0_14, %c0_15], %16 {strides = array<i32>} : memref<8x2x8x16xbf16, #tpu.memory_space<vmem>>, vector<8x1x8x16xbf16>,
    %c1 = arith.constant 1 : index
    %c0_16 = arith.constant 0 : index
    %c0_17 = arith.constant 0 : index
    %17 = vector.load %arg3[%c1, %c0_16, %c0_17] : memref<2x4x16xbf16, #tpu.memory_space<vmem>>, vector<1x4x16xbf16>
    %18 = vector.shape_cast %17 : vector<1x4x16xbf16> to vector<4x16xbf16>
    %cst_18 = arith.constant dense<0.000000e+00> : vector<64x16xf32>
    %19 = tpu.matmul %0, %18, %cst_18 {dimension_numbers = #tpu.dot_dimension_numbers<[1], [0], [0], [1], [0, 0, 1, 1], [], []>} : vector<64x4xbf16>, vector<4x16xbf16>, vector<64x16xf32> -> vector<64x16xf32>
    %c1_19 = arith.constant 1 : index
    %c0_20 = arith.constant 0 : index
    %c0_21 = arith.constant 0 : index
    %20 = vector.load %arg4[%c1_19, %c0_20, %c0_21] : memref<2x4x16xbf16, #tpu.memory_space<vmem>>, vector<1x4x16xbf16>
    %21 = vector.shape_cast %20 : vector<1x4x16xbf16> to vector<4x16xbf16>
    %cst_22 = arith.constant dense<0.000000e+00> : vector<64x16xf32>
    %22 = tpu.matmul %1, %21, %cst_22 {dimension_numbers = #tpu.dot_dimension_numbers<[1], [0], [0], [1], [0, 0, 1, 1], [], []>} : vector<64x4xbf16>, vector<4x16xbf16>, vector<64x16xf32> -> vector<64x16xf32>
    %23 = arith.addf %19, %22 : vector<64x16xf32>
    %c0_23 = arith.constant 0 : index
    %c0_24 = arith.constant 0 : index
    %24 = vector.load %arg5[%c0_23, %c0_24] : memref<1x16xf32, #tpu.memory_space<vmem>>, vector<1x16xf32>
    %25 = vector.broadcast %24 : vector<1x16xf32> to vector<64x16xf32>
    %26 = arith.addf %23, %25 : vector<64x16xf32>
    %27 = vector.shape_cast %26 : vector<64x16xf32> to vector<8x8x16xf32>
    %28 = arith.truncf %27 : vector<8x8x16xf32> to vector<8x8x16xbf16>
    %c0_25 = arith.constant 0 : index
    %c1_26 = arith.constant 1 : index
    %c0_27 = arith.constant 0 : index
    %c0_28 = arith.constant 0 : index
    %29 = vector.load %arg6[%c0_25, %c1_26, %c0_27, %c0_28] : memref<8x2x8x16xbf16, #tpu.memory_space<vmem>>, vector<8x1x8x16xbf16>
    %30 = vector.shape_cast %29 : vector<8x1x8x16xbf16> to vector<8x8x16xbf16>
    %31 = vector.shape_cast %28 : vector<8x8x16xbf16> to vector<8x1x8x16xbf16>
    tpu.vector_store %arg6[%c0_25, %c1_26, %c0_27, %c0_28], %31 {strides = array<i32>} : memref<8x2x8x16xbf16, #tpu.memory_space<vmem>>, vector<8x1x8x16xbf16>,
    return
  }
  func.func @transform_0(%arg0: i32) -> (i32, i32) {
    %c0_i32 = arith.constant 0 : i32
    %c0_i32_0 = arith.constant 0 : i32
    return %arg0, %c0_i32 : i32, i32
  }
  func.func @transform_1(%arg0: i32) -> (i32, i32) {
    %c0_i32 = arith.constant 0 : i32
    %c0_i32_0 = arith.constant 0 : i32
    return %arg0, %c0_i32 : i32, i32
  }
  func.func @transform_2(%arg0: i32) -> (i32, i32, i32) {
    %c0_i32 = arith.constant 0 : i32
    %c0_i32_0 = arith.constant 0 : i32
    %c0_i32_1 = arith.constant 0 : i32
    %c0_i32_2 = arith.constant 0 : i32
    return %c0_i32, %c0_i32_0, %c0_i32_1 : i32, i32, i32
  }
  func.func @transform_3(%arg0: i32) -> (i32, i32, i32) {
    %c0_i32 = arith.constant 0 : i32
    %c0_i32_0 = arith.constant 0 : i32
    %c0_i32_1 = arith.constant 0 : i32
    %c0_i32_2 = arith.constant 0 : i32
    return %c0_i32, %c0_i32_0, %c0_i32_1 : i32, i32, i32
  }
  func.func @transform_4(%arg0: i32) -> (i32, i32) {
    %c0_i32 = arith.constant 0 : i32
    %c0_i32_0 = arith.constant 0 : i32
    %c0_i32_1 = arith.constant 0 : i32
    return %c0_i32, %c0_i32_0 : i32, i32
  }
  func.func @transform_5(%arg0: i32) -> (i32, i32, i32, i32) {
    %c0_i32 = arith.constant 0 : i32
    %c0_i32_0 = arith.constant 0 : i32
    %c0_i32_1 = arith.constant 0 : i32
    %c0_i32_2 = arith.constant 0 : i32
    return %arg0, %c0_i32, %c0_i32_0, %c0_i32_1 : i32, i32, i32, i32
  }
}

module attributes {stable_mosaic.version = 11 : i64} {
  func.func @_conv_bn_gelu_kernel(%arg0: i32, %arg1: memref<1x18x18x8xbf16, #tpu.memory_space<vmem>>, %arg2: memref<9x8x8xbf16, #tpu.memory_space<vmem>>, %arg3: memref<1x8xf32, #tpu.memory_space<vmem>>, %arg4: memref<1x8xf32, #tpu.memory_space<vmem>>, %arg5: memref<256x8xbf16, #tpu.memory_space<vmem>>) attributes {dimension_semantics = [#tpu.dimension_semantics<parallel>], iteration_bounds = array<i64: 2>, scalar_prefetch = 0 : i64, scratch_operands = 0 : i64, tpu.core_type = #tpu.core_type<tc>, window_params = [{transform_indices = @transform_0, window_bounds = array<i64: 1, 18, 18, 8>}, {pipeline_mode = #tpu.pipeline_mode<synchronous>, transform_indices = @transform_1, window_bounds = array<i64: 9, 8, 8>}, {pipeline_mode = #tpu.pipeline_mode<synchronous>, transform_indices = @transform_2, window_bounds = array<i64: 1, 8>}, {pipeline_mode = #tpu.pipeline_mode<synchronous>, transform_indices = @transform_3, window_bounds = array<i64: 1, 8>}, {transform_indices = @transform_4, window_bounds = array<i64: 256, 8>}]} {
    %c0 = arith.constant 0 : index
    %c0_0 = arith.constant 0 : index
    %c0_1 = arith.constant 0 : index
    %c0_2 = arith.constant 0 : index
    %0 = vector.load %arg1[%c0, %c0_0, %c0_1, %c0_2] : memref<1x18x18x8xbf16, #tpu.memory_space<vmem>>, vector<1x18x18x8xbf16>
    %1 = vector.shape_cast %0 : vector<1x18x18x8xbf16> to vector<18x18x8xbf16>
    %cst = arith.constant 0.000000e+00 : f32
    %2 = vector.broadcast %cst : f32 to vector<256x8xf32>
    %3 = vector.extract_strided_slice %1 {offsets = [0, 0, 0], sizes = [16, 16, 8], strides = [1, 1, 1]} : vector<18x18x8xbf16> to vector<16x16x8xbf16>
    %4 = vector.shape_cast %3 : vector<16x16x8xbf16> to vector<256x8xbf16>
    %c0_3 = arith.constant 0 : index
    %c0_4 = arith.constant 0 : index
    %c0_5 = arith.constant 0 : index
    %5 = vector.load %arg2[%c0_3, %c0_4, %c0_5] : memref<9x8x8xbf16, #tpu.memory_space<vmem>>, vector<1x8x8xbf16>
    %6 = vector.shape_cast %5 : vector<1x8x8xbf16> to vector<8x8xbf16>
    %cst_6 = arith.constant dense<0.000000e+00> : vector<256x8xf32>
    %7 = tpu.matmul %4, %6, %cst_6 {dimension_numbers = #tpu.dot_dimension_numbers<[1], [0], [0], [1], [0, 0, 1, 1], [], []>} : vector<256x8xbf16>, vector<8x8xbf16>, vector<256x8xf32> -> vector<256x8xf32>
    %8 = arith.addf %2, %7 : vector<256x8xf32>
    %9 = vector.extract_strided_slice %1 {offsets = [0, 1, 0], sizes = [16, 16, 8], strides = [1, 1, 1]} : vector<18x18x8xbf16> to vector<16x16x8xbf16>
    %10 = vector.shape_cast %9 : vector<16x16x8xbf16> to vector<256x8xbf16>
    %c1 = arith.constant 1 : index
    %c0_7 = arith.constant 0 : index
    %c0_8 = arith.constant 0 : index
    %11 = vector.load %arg2[%c1, %c0_7, %c0_8] : memref<9x8x8xbf16, #tpu.memory_space<vmem>>, vector<1x8x8xbf16>
    %12 = vector.shape_cast %11 : vector<1x8x8xbf16> to vector<8x8xbf16>
    %cst_9 = arith.constant dense<0.000000e+00> : vector<256x8xf32>
    %13 = tpu.matmul %10, %12, %cst_9 {dimension_numbers = #tpu.dot_dimension_numbers<[1], [0], [0], [1], [0, 0, 1, 1], [], []>} : vector<256x8xbf16>, vector<8x8xbf16>, vector<256x8xf32> -> vector<256x8xf32>
    %14 = arith.addf %8, %13 : vector<256x8xf32>
    %15 = vector.extract_strided_slice %1 {offsets = [0, 2, 0], sizes = [16, 16, 8], strides = [1, 1, 1]} : vector<18x18x8xbf16> to vector<16x16x8xbf16>
    %16 = vector.shape_cast %15 : vector<16x16x8xbf16> to vector<256x8xbf16>
    %c2 = arith.constant 2 : index
    %c0_10 = arith.constant 0 : index
    %c0_11 = arith.constant 0 : index
    %17 = vector.load %arg2[%c2, %c0_10, %c0_11] : memref<9x8x8xbf16, #tpu.memory_space<vmem>>, vector<1x8x8xbf16>
    %18 = vector.shape_cast %17 : vector<1x8x8xbf16> to vector<8x8xbf16>
    %cst_12 = arith.constant dense<0.000000e+00> : vector<256x8xf32>
    %19 = tpu.matmul %16, %18, %cst_12 {dimension_numbers = #tpu.dot_dimension_numbers<[1], [0], [0], [1], [0, 0, 1, 1], [], []>} : vector<256x8xbf16>, vector<8x8xbf16>, vector<256x8xf32> -> vector<256x8xf32>
    %20 = arith.addf %14, %19 : vector<256x8xf32>
    %21 = vector.extract_strided_slice %1 {offsets = [1, 0, 0], sizes = [16, 16, 8], strides = [1, 1, 1]} : vector<18x18x8xbf16> to vector<16x16x8xbf16>
    %22 = vector.shape_cast %21 : vector<16x16x8xbf16> to vector<256x8xbf16>
    %c3 = arith.constant 3 : index
    %c0_13 = arith.constant 0 : index
    %c0_14 = arith.constant 0 : index
    %23 = vector.load %arg2[%c3, %c0_13, %c0_14] : memref<9x8x8xbf16, #tpu.memory_space<vmem>>, vector<1x8x8xbf16>
    %24 = vector.shape_cast %23 : vector<1x8x8xbf16> to vector<8x8xbf16>
    %cst_15 = arith.constant dense<0.000000e+00> : vector<256x8xf32>
    %25 = tpu.matmul %22, %24, %cst_15 {dimension_numbers = #tpu.dot_dimension_numbers<[1], [0], [0], [1], [0, 0, 1, 1], [], []>} : vector<256x8xbf16>, vector<8x8xbf16>, vector<256x8xf32> -> vector<256x8xf32>
    %26 = arith.addf %20, %25 : vector<256x8xf32>
    %27 = vector.extract_strided_slice %1 {offsets = [1, 1, 0], sizes = [16, 16, 8], strides = [1, 1, 1]} : vector<18x18x8xbf16> to vector<16x16x8xbf16>
    %28 = vector.shape_cast %27 : vector<16x16x8xbf16> to vector<256x8xbf16>
    %c4 = arith.constant 4 : index
    %c0_16 = arith.constant 0 : index
    %c0_17 = arith.constant 0 : index
    %29 = vector.load %arg2[%c4, %c0_16, %c0_17] : memref<9x8x8xbf16, #tpu.memory_space<vmem>>, vector<1x8x8xbf16>
    %30 = vector.shape_cast %29 : vector<1x8x8xbf16> to vector<8x8xbf16>
    %cst_18 = arith.constant dense<0.000000e+00> : vector<256x8xf32>
    %31 = tpu.matmul %28, %30, %cst_18 {dimension_numbers = #tpu.dot_dimension_numbers<[1], [0], [0], [1], [0, 0, 1, 1], [], []>} : vector<256x8xbf16>, vector<8x8xbf16>, vector<256x8xf32> -> vector<256x8xf32>
    %32 = arith.addf %26, %31 : vector<256x8xf32>
    %33 = vector.extract_strided_slice %1 {offsets = [1, 2, 0], sizes = [16, 16, 8], strides = [1, 1, 1]} : vector<18x18x8xbf16> to vector<16x16x8xbf16>
    %34 = vector.shape_cast %33 : vector<16x16x8xbf16> to vector<256x8xbf16>
    %c5 = arith.constant 5 : index
    %c0_19 = arith.constant 0 : index
    %c0_20 = arith.constant 0 : index
    %35 = vector.load %arg2[%c5, %c0_19, %c0_20] : memref<9x8x8xbf16, #tpu.memory_space<vmem>>, vector<1x8x8xbf16>
    %36 = vector.shape_cast %35 : vector<1x8x8xbf16> to vector<8x8xbf16>
    %cst_21 = arith.constant dense<0.000000e+00> : vector<256x8xf32>
    %37 = tpu.matmul %34, %36, %cst_21 {dimension_numbers = #tpu.dot_dimension_numbers<[1], [0], [0], [1], [0, 0, 1, 1], [], []>} : vector<256x8xbf16>, vector<8x8xbf16>, vector<256x8xf32> -> vector<256x8xf32>
    %38 = arith.addf %32, %37 : vector<256x8xf32>
    %39 = vector.extract_strided_slice %1 {offsets = [2, 0, 0], sizes = [16, 16, 8], strides = [1, 1, 1]} : vector<18x18x8xbf16> to vector<16x16x8xbf16>
    %40 = vector.shape_cast %39 : vector<16x16x8xbf16> to vector<256x8xbf16>
    %c6 = arith.constant 6 : index
    %c0_22 = arith.constant 0 : index
    %c0_23 = arith.constant 0 : index
    %41 = vector.load %arg2[%c6, %c0_22, %c0_23] : memref<9x8x8xbf16, #tpu.memory_space<vmem>>, vector<1x8x8xbf16>
    %42 = vector.shape_cast %41 : vector<1x8x8xbf16> to vector<8x8xbf16>
    %cst_24 = arith.constant dense<0.000000e+00> : vector<256x8xf32>
    %43 = tpu.matmul %40, %42, %cst_24 {dimension_numbers = #tpu.dot_dimension_numbers<[1], [0], [0], [1], [0, 0, 1, 1], [], []>} : vector<256x8xbf16>, vector<8x8xbf16>, vector<256x8xf32> -> vector<256x8xf32>
    %44 = arith.addf %38, %43 : vector<256x8xf32>
    %45 = vector.extract_strided_slice %1 {offsets = [2, 1, 0], sizes = [16, 16, 8], strides = [1, 1, 1]} : vector<18x18x8xbf16> to vector<16x16x8xbf16>
    %46 = vector.shape_cast %45 : vector<16x16x8xbf16> to vector<256x8xbf16>
    %c7 = arith.constant 7 : index
    %c0_25 = arith.constant 0 : index
    %c0_26 = arith.constant 0 : index
    %47 = vector.load %arg2[%c7, %c0_25, %c0_26] : memref<9x8x8xbf16, #tpu.memory_space<vmem>>, vector<1x8x8xbf16>
    %48 = vector.shape_cast %47 : vector<1x8x8xbf16> to vector<8x8xbf16>
    %cst_27 = arith.constant dense<0.000000e+00> : vector<256x8xf32>
    %49 = tpu.matmul %46, %48, %cst_27 {dimension_numbers = #tpu.dot_dimension_numbers<[1], [0], [0], [1], [0, 0, 1, 1], [], []>} : vector<256x8xbf16>, vector<8x8xbf16>, vector<256x8xf32> -> vector<256x8xf32>
    %50 = arith.addf %44, %49 : vector<256x8xf32>
    %51 = vector.extract_strided_slice %1 {offsets = [2, 2, 0], sizes = [16, 16, 8], strides = [1, 1, 1]} : vector<18x18x8xbf16> to vector<16x16x8xbf16>
    %52 = vector.shape_cast %51 : vector<16x16x8xbf16> to vector<256x8xbf16>
    %c8 = arith.constant 8 : index
    %c0_28 = arith.constant 0 : index
    %c0_29 = arith.constant 0 : index
    %53 = vector.load %arg2[%c8, %c0_28, %c0_29] : memref<9x8x8xbf16, #tpu.memory_space<vmem>>, vector<1x8x8xbf16>
    %54 = vector.shape_cast %53 : vector<1x8x8xbf16> to vector<8x8xbf16>
    %cst_30 = arith.constant dense<0.000000e+00> : vector<256x8xf32>
    %55 = tpu.matmul %52, %54, %cst_30 {dimension_numbers = #tpu.dot_dimension_numbers<[1], [0], [0], [1], [0, 0, 1, 1], [], []>} : vector<256x8xbf16>, vector<8x8xbf16>, vector<256x8xf32> -> vector<256x8xf32>
    %56 = arith.addf %50, %55 : vector<256x8xf32>
    %c0_31 = arith.constant 0 : index
    %c0_32 = arith.constant 0 : index
    %57 = vector.load %arg3[%c0_31, %c0_32] : memref<1x8xf32, #tpu.memory_space<vmem>>, vector<1x8xf32>
    %58 = vector.broadcast %57 : vector<1x8xf32> to vector<256x8xf32>
    %59 = arith.mulf %56, %58 : vector<256x8xf32>
    %c0_33 = arith.constant 0 : index
    %c0_34 = arith.constant 0 : index
    %60 = vector.load %arg4[%c0_33, %c0_34] : memref<1x8xf32, #tpu.memory_space<vmem>>, vector<1x8xf32>
    %61 = vector.broadcast %60 : vector<1x8xf32> to vector<256x8xf32>
    %62 = arith.addf %59, %61 : vector<256x8xf32>
    %cst_35 = arith.constant 5.000000e-01 : f32
    %63 = vector.broadcast %cst_35 : f32 to vector<256x8xf32>
    %64 = arith.mulf %63, %62 : vector<256x8xf32>
    %cst_36 = arith.constant 0.707106769 : f32
    %65 = vector.broadcast %cst_36 : f32 to vector<256x8xf32>
    %66 = arith.mulf %62, %65 : vector<256x8xf32>
    %67 = math.erf %66 : vector<256x8xf32>
    %cst_37 = arith.constant 1.000000e+00 : f32
    %68 = vector.broadcast %cst_37 : f32 to vector<256x8xf32>
    %69 = arith.addf %68, %67 : vector<256x8xf32>
    %70 = arith.mulf %64, %69 : vector<256x8xf32>
    %71 = arith.truncf %70 : vector<256x8xf32> to vector<256x8xbf16>
    %c0_38 = arith.constant 0 : index
    %c0_39 = arith.constant 0 : index
    %72 = vector.load %arg5[%c0_38, %c0_39] : memref<256x8xbf16, #tpu.memory_space<vmem>>, vector<256x8xbf16>
    tpu.vector_store %arg5[%c0_38, %c0_39], %71 {strides = array<i32>} : memref<256x8xbf16, #tpu.memory_space<vmem>>, vector<256x8xbf16>,
    return
  }
  func.func @transform_0(%arg0: i32) -> (i32, i32, i32, i32) {
    %c0_i32 = arith.constant 0 : i32
    %c0_i32_0 = arith.constant 0 : i32
    %c0_i32_1 = arith.constant 0 : i32
    %c0_i32_2 = arith.constant 0 : i32
    return %arg0, %c0_i32, %c0_i32_0, %c0_i32_1 : i32, i32, i32, i32
  }
  func.func @transform_1(%arg0: i32) -> (i32, i32, i32) {
    %c0_i32 = arith.constant 0 : i32
    %c0_i32_0 = arith.constant 0 : i32
    %c0_i32_1 = arith.constant 0 : i32
    %c0_i32_2 = arith.constant 0 : i32
    return %c0_i32, %c0_i32_0, %c0_i32_1 : i32, i32, i32
  }
  func.func @transform_2(%arg0: i32) -> (i32, i32) {
    %c0_i32 = arith.constant 0 : i32
    %c0_i32_0 = arith.constant 0 : i32
    %c0_i32_1 = arith.constant 0 : i32
    return %c0_i32, %c0_i32_0 : i32, i32
  }
  func.func @transform_3(%arg0: i32) -> (i32, i32) {
    %c0_i32 = arith.constant 0 : i32
    %c0_i32_0 = arith.constant 0 : i32
    %c0_i32_1 = arith.constant 0 : i32
    return %c0_i32, %c0_i32_0 : i32, i32
  }
  func.func @transform_4(%arg0: i32) -> (i32, i32) {
    %c0_i32 = arith.constant 0 : i32
    %c0_i32_0 = arith.constant 0 : i32
    return %arg0, %c0_i32 : i32, i32
  }
}

module attributes {stable_mosaic.version = 11 : i64} {
  func.func @_conv_bn_gelu_kernel(%arg0: i32, %arg1: memref<1x18x18x8xbf16, #tpu.memory_space<vmem>>, %arg2: memref<9x8x8xbf16, #tpu.memory_space<vmem>>, %arg3: memref<1x8xf32, #tpu.memory_space<vmem>>, %arg4: memref<1x8xf32, #tpu.memory_space<vmem>>, %arg5: memref<256x8xf32, #tpu.memory_space<vmem>>) attributes {dimension_semantics = [#tpu.dimension_semantics<parallel>], iteration_bounds = array<i64: 2>, scalar_prefetch = 0 : i64, scratch_operands = 0 : i64, tpu.core_type = #tpu.core_type<tc>, window_params = [{transform_indices = @transform_0, window_bounds = array<i64: 1, 18, 18, 8>}, {pipeline_mode = #tpu.pipeline_mode<synchronous>, transform_indices = @transform_1, window_bounds = array<i64: 9, 8, 8>}, {pipeline_mode = #tpu.pipeline_mode<synchronous>, transform_indices = @transform_2, window_bounds = array<i64: 1, 8>}, {pipeline_mode = #tpu.pipeline_mode<synchronous>, transform_indices = @transform_3, window_bounds = array<i64: 1, 8>}, {transform_indices = @transform_4, window_bounds = array<i64: 256, 8>}]} {
    %c0 = arith.constant 0 : index
    %c0_0 = arith.constant 0 : index
    %c0_1 = arith.constant 0 : index
    %c0_2 = arith.constant 0 : index
    %0 = vector.load %arg1[%c0, %c0_0, %c0_1, %c0_2] : memref<1x18x18x8xbf16, #tpu.memory_space<vmem>>, vector<1x18x18x8xbf16>
    %1 = vector.shape_cast %0 : vector<1x18x18x8xbf16> to vector<18x18x8xbf16>
    %cst = arith.constant 0.000000e+00 : f32
    %2 = vector.broadcast %cst : f32 to vector<256x8xf32>
    %3 = vector.extract_strided_slice %1 {offsets = [0, 0, 0], sizes = [16, 16, 8], strides = [1, 1, 1]} : vector<18x18x8xbf16> to vector<16x16x8xbf16>
    %4 = vector.shape_cast %3 : vector<16x16x8xbf16> to vector<256x8xbf16>
    %c0_3 = arith.constant 0 : index
    %c0_4 = arith.constant 0 : index
    %c0_5 = arith.constant 0 : index
    %5 = vector.load %arg2[%c0_3, %c0_4, %c0_5] : memref<9x8x8xbf16, #tpu.memory_space<vmem>>, vector<1x8x8xbf16>
    %6 = vector.shape_cast %5 : vector<1x8x8xbf16> to vector<8x8xbf16>
    %cst_6 = arith.constant dense<0.000000e+00> : vector<256x8xf32>
    %7 = tpu.matmul %4, %6, %cst_6 {dimension_numbers = #tpu.dot_dimension_numbers<[1], [0], [0], [1], [0, 0, 1, 1], [], []>} : vector<256x8xbf16>, vector<8x8xbf16>, vector<256x8xf32> -> vector<256x8xf32>
    %8 = arith.addf %2, %7 : vector<256x8xf32>
    %9 = vector.extract_strided_slice %1 {offsets = [0, 1, 0], sizes = [16, 16, 8], strides = [1, 1, 1]} : vector<18x18x8xbf16> to vector<16x16x8xbf16>
    %10 = vector.shape_cast %9 : vector<16x16x8xbf16> to vector<256x8xbf16>
    %c1 = arith.constant 1 : index
    %c0_7 = arith.constant 0 : index
    %c0_8 = arith.constant 0 : index
    %11 = vector.load %arg2[%c1, %c0_7, %c0_8] : memref<9x8x8xbf16, #tpu.memory_space<vmem>>, vector<1x8x8xbf16>
    %12 = vector.shape_cast %11 : vector<1x8x8xbf16> to vector<8x8xbf16>
    %cst_9 = arith.constant dense<0.000000e+00> : vector<256x8xf32>
    %13 = tpu.matmul %10, %12, %cst_9 {dimension_numbers = #tpu.dot_dimension_numbers<[1], [0], [0], [1], [0, 0, 1, 1], [], []>} : vector<256x8xbf16>, vector<8x8xbf16>, vector<256x8xf32> -> vector<256x8xf32>
    %14 = arith.addf %8, %13 : vector<256x8xf32>
    %15 = vector.extract_strided_slice %1 {offsets = [0, 2, 0], sizes = [16, 16, 8], strides = [1, 1, 1]} : vector<18x18x8xbf16> to vector<16x16x8xbf16>
    %16 = vector.shape_cast %15 : vector<16x16x8xbf16> to vector<256x8xbf16>
    %c2 = arith.constant 2 : index
    %c0_10 = arith.constant 0 : index
    %c0_11 = arith.constant 0 : index
    %17 = vector.load %arg2[%c2, %c0_10, %c0_11] : memref<9x8x8xbf16, #tpu.memory_space<vmem>>, vector<1x8x8xbf16>
    %18 = vector.shape_cast %17 : vector<1x8x8xbf16> to vector<8x8xbf16>
    %cst_12 = arith.constant dense<0.000000e+00> : vector<256x8xf32>
    %19 = tpu.matmul %16, %18, %cst_12 {dimension_numbers = #tpu.dot_dimension_numbers<[1], [0], [0], [1], [0, 0, 1, 1], [], []>} : vector<256x8xbf16>, vector<8x8xbf16>, vector<256x8xf32> -> vector<256x8xf32>
    %20 = arith.addf %14, %19 : vector<256x8xf32>
    %21 = vector.extract_strided_slice %1 {offsets = [1, 0, 0], sizes = [16, 16, 8], strides = [1, 1, 1]} : vector<18x18x8xbf16> to vector<16x16x8xbf16>
    %22 = vector.shape_cast %21 : vector<16x16x8xbf16> to vector<256x8xbf16>
    %c3 = arith.constant 3 : index
    %c0_13 = arith.constant 0 : index
    %c0_14 = arith.constant 0 : index
    %23 = vector.load %arg2[%c3, %c0_13, %c0_14] : memref<9x8x8xbf16, #tpu.memory_space<vmem>>, vector<1x8x8xbf16>
    %24 = vector.shape_cast %23 : vector<1x8x8xbf16> to vector<8x8xbf16>
    %cst_15 = arith.constant dense<0.000000e+00> : vector<256x8xf32>
    %25 = tpu.matmul %22, %24, %cst_15 {dimension_numbers = #tpu.dot_dimension_numbers<[1], [0], [0], [1], [0, 0, 1, 1], [], []>} : vector<256x8xbf16>, vector<8x8xbf16>, vector<256x8xf32> -> vector<256x8xf32>
    %26 = arith.addf %20, %25 : vector<256x8xf32>
    %27 = vector.extract_strided_slice %1 {offsets = [1, 1, 0], sizes = [16, 16, 8], strides = [1, 1, 1]} : vector<18x18x8xbf16> to vector<16x16x8xbf16>
    %28 = vector.shape_cast %27 : vector<16x16x8xbf16> to vector<256x8xbf16>
    %c4 = arith.constant 4 : index
    %c0_16 = arith.constant 0 : index
    %c0_17 = arith.constant 0 : index
    %29 = vector.load %arg2[%c4, %c0_16, %c0_17] : memref<9x8x8xbf16, #tpu.memory_space<vmem>>, vector<1x8x8xbf16>
    %30 = vector.shape_cast %29 : vector<1x8x8xbf16> to vector<8x8xbf16>
    %cst_18 = arith.constant dense<0.000000e+00> : vector<256x8xf32>
    %31 = tpu.matmul %28, %30, %cst_18 {dimension_numbers = #tpu.dot_dimension_numbers<[1], [0], [0], [1], [0, 0, 1, 1], [], []>} : vector<256x8xbf16>, vector<8x8xbf16>, vector<256x8xf32> -> vector<256x8xf32>
    %32 = arith.addf %26, %31 : vector<256x8xf32>
    %33 = vector.extract_strided_slice %1 {offsets = [1, 2, 0], sizes = [16, 16, 8], strides = [1, 1, 1]} : vector<18x18x8xbf16> to vector<16x16x8xbf16>
    %34 = vector.shape_cast %33 : vector<16x16x8xbf16> to vector<256x8xbf16>
    %c5 = arith.constant 5 : index
    %c0_19 = arith.constant 0 : index
    %c0_20 = arith.constant 0 : index
    %35 = vector.load %arg2[%c5, %c0_19, %c0_20] : memref<9x8x8xbf16, #tpu.memory_space<vmem>>, vector<1x8x8xbf16>
    %36 = vector.shape_cast %35 : vector<1x8x8xbf16> to vector<8x8xbf16>
    %cst_21 = arith.constant dense<0.000000e+00> : vector<256x8xf32>
    %37 = tpu.matmul %34, %36, %cst_21 {dimension_numbers = #tpu.dot_dimension_numbers<[1], [0], [0], [1], [0, 0, 1, 1], [], []>} : vector<256x8xbf16>, vector<8x8xbf16>, vector<256x8xf32> -> vector<256x8xf32>
    %38 = arith.addf %32, %37 : vector<256x8xf32>
    %39 = vector.extract_strided_slice %1 {offsets = [2, 0, 0], sizes = [16, 16, 8], strides = [1, 1, 1]} : vector<18x18x8xbf16> to vector<16x16x8xbf16>
    %40 = vector.shape_cast %39 : vector<16x16x8xbf16> to vector<256x8xbf16>
    %c6 = arith.constant 6 : index
    %c0_22 = arith.constant 0 : index
    %c0_23 = arith.constant 0 : index
    %41 = vector.load %arg2[%c6, %c0_22, %c0_23] : memref<9x8x8xbf16, #tpu.memory_space<vmem>>, vector<1x8x8xbf16>
    %42 = vector.shape_cast %41 : vector<1x8x8xbf16> to vector<8x8xbf16>
    %cst_24 = arith.constant dense<0.000000e+00> : vector<256x8xf32>
    %43 = tpu.matmul %40, %42, %cst_24 {dimension_numbers = #tpu.dot_dimension_numbers<[1], [0], [0], [1], [0, 0, 1, 1], [], []>} : vector<256x8xbf16>, vector<8x8xbf16>, vector<256x8xf32> -> vector<256x8xf32>
    %44 = arith.addf %38, %43 : vector<256x8xf32>
    %45 = vector.extract_strided_slice %1 {offsets = [2, 1, 0], sizes = [16, 16, 8], strides = [1, 1, 1]} : vector<18x18x8xbf16> to vector<16x16x8xbf16>
    %46 = vector.shape_cast %45 : vector<16x16x8xbf16> to vector<256x8xbf16>
    %c7 = arith.constant 7 : index
    %c0_25 = arith.constant 0 : index
    %c0_26 = arith.constant 0 : index
    %47 = vector.load %arg2[%c7, %c0_25, %c0_26] : memref<9x8x8xbf16, #tpu.memory_space<vmem>>, vector<1x8x8xbf16>
    %48 = vector.shape_cast %47 : vector<1x8x8xbf16> to vector<8x8xbf16>
    %cst_27 = arith.constant dense<0.000000e+00> : vector<256x8xf32>
    %49 = tpu.matmul %46, %48, %cst_27 {dimension_numbers = #tpu.dot_dimension_numbers<[1], [0], [0], [1], [0, 0, 1, 1], [], []>} : vector<256x8xbf16>, vector<8x8xbf16>, vector<256x8xf32> -> vector<256x8xf32>
    %50 = arith.addf %44, %49 : vector<256x8xf32>
    %51 = vector.extract_strided_slice %1 {offsets = [2, 2, 0], sizes = [16, 16, 8], strides = [1, 1, 1]} : vector<18x18x8xbf16> to vector<16x16x8xbf16>
    %52 = vector.shape_cast %51 : vector<16x16x8xbf16> to vector<256x8xbf16>
    %c8 = arith.constant 8 : index
    %c0_28 = arith.constant 0 : index
    %c0_29 = arith.constant 0 : index
    %53 = vector.load %arg2[%c8, %c0_28, %c0_29] : memref<9x8x8xbf16, #tpu.memory_space<vmem>>, vector<1x8x8xbf16>
    %54 = vector.shape_cast %53 : vector<1x8x8xbf16> to vector<8x8xbf16>
    %cst_30 = arith.constant dense<0.000000e+00> : vector<256x8xf32>
    %55 = tpu.matmul %52, %54, %cst_30 {dimension_numbers = #tpu.dot_dimension_numbers<[1], [0], [0], [1], [0, 0, 1, 1], [], []>} : vector<256x8xbf16>, vector<8x8xbf16>, vector<256x8xf32> -> vector<256x8xf32>
    %56 = arith.addf %50, %55 : vector<256x8xf32>
    %c0_31 = arith.constant 0 : index
    %c0_32 = arith.constant 0 : index
    %57 = vector.load %arg3[%c0_31, %c0_32] : memref<1x8xf32, #tpu.memory_space<vmem>>, vector<1x8xf32>
    %58 = vector.broadcast %57 : vector<1x8xf32> to vector<256x8xf32>
    %59 = arith.mulf %56, %58 : vector<256x8xf32>
    %c0_33 = arith.constant 0 : index
    %c0_34 = arith.constant 0 : index
    %60 = vector.load %arg4[%c0_33, %c0_34] : memref<1x8xf32, #tpu.memory_space<vmem>>, vector<1x8xf32>
    %61 = vector.broadcast %60 : vector<1x8xf32> to vector<256x8xf32>
    %62 = arith.addf %59, %61 : vector<256x8xf32>
    %cst_35 = arith.constant 5.000000e-01 : f32
    %63 = vector.broadcast %cst_35 : f32 to vector<256x8xf32>
    %64 = arith.mulf %63, %62 : vector<256x8xf32>
    %cst_36 = arith.constant 0.707106769 : f32
    %65 = vector.broadcast %cst_36 : f32 to vector<256x8xf32>
    %66 = arith.mulf %62, %65 : vector<256x8xf32>
    %67 = math.erf %66 : vector<256x8xf32>
    %cst_37 = arith.constant 1.000000e+00 : f32
    %68 = vector.broadcast %cst_37 : f32 to vector<256x8xf32>
    %69 = arith.addf %68, %67 : vector<256x8xf32>
    %70 = arith.mulf %64, %69 : vector<256x8xf32>
    %c0_38 = arith.constant 0 : index
    %c0_39 = arith.constant 0 : index
    %71 = vector.load %arg5[%c0_38, %c0_39] : memref<256x8xf32, #tpu.memory_space<vmem>>, vector<256x8xf32>
    tpu.vector_store %arg5[%c0_38, %c0_39], %70 {strides = array<i32>} : memref<256x8xf32, #tpu.memory_space<vmem>>, vector<256x8xf32>,
    return
  }
  func.func @transform_0(%arg0: i32) -> (i32, i32, i32, i32) {
    %c0_i32 = arith.constant 0 : i32
    %c0_i32_0 = arith.constant 0 : i32
    %c0_i32_1 = arith.constant 0 : i32
    %c0_i32_2 = arith.constant 0 : i32
    return %arg0, %c0_i32, %c0_i32_0, %c0_i32_1 : i32, i32, i32, i32
  }
  func.func @transform_1(%arg0: i32) -> (i32, i32, i32) {
    %c0_i32 = arith.constant 0 : i32
    %c0_i32_0 = arith.constant 0 : i32
    %c0_i32_1 = arith.constant 0 : i32
    %c0_i32_2 = arith.constant 0 : i32
    return %c0_i32, %c0_i32_0, %c0_i32_1 : i32, i32, i32
  }
  func.func @transform_2(%arg0: i32) -> (i32, i32) {
    %c0_i32 = arith.constant 0 : i32
    %c0_i32_0 = arith.constant 0 : i32
    %c0_i32_1 = arith.constant 0 : i32
    return %c0_i32, %c0_i32_0 : i32, i32
  }
  func.func @transform_3(%arg0: i32) -> (i32, i32) {
    %c0_i32 = arith.constant 0 : i32
    %c0_i32_0 = arith.constant 0 : i32
    %c0_i32_1 = arith.constant 0 : i32
    return %c0_i32, %c0_i32_0 : i32, i32
  }
  func.func @transform_4(%arg0: i32) -> (i32, i32) {
    %c0_i32 = arith.constant 0 : i32
    %c0_i32_0 = arith.constant 0 : i32
    return %arg0, %c0_i32 : i32, i32
  }
}

</mosaic_0001>

<bundles_post_ra>
// kernel: tile.9
= control target key start
LH: loop header
LB: loop body
LE: loop exit
PB: predicated region body
PF: predicated region fallthrough
CT: control target
= control target key end

     0   :  { %vm8_vm0 = vcmask 64512   ;;  %vm14_vm1 = vcmask 130112   ;;  %s42_s0 = inlined_call_operand.vmem [shape: f32[2,8], index: 0, kind: input, shape index: {}]   ;;  %s43_s1 = inlined_call_operand.vmem [shape: f32[1,16], index: 1, kind: output, shape index: {}]  }
   0x1   :  { %v5_v0 = vld [vmem:[%s42_s0] sm:$0x3]  ;;  %s25_s0 = smov 8  }
   0x2   :  { %6 = vst [vmem:[#allocation1] sm:$0x3] %v5_v0 }
   0x9   :  { %v11_v1 = vld [vmem:[#allocation1 + $0x1] sm:$0x1]   ;;  %v7_v2 = vld [vmem:[#allocation1] sm:$0x1]  }
   0xa   :  { %12 = vrot.lane.b32.xlu0 %v11_v1, %s25_s0  ;;  %9 = vst.msk [vmem:[#allocation0] sm:$0x1] %vm8_vm0, %v7_v2  }
  0x7c   :  { %v13_v3 = vpop.permute.xlu0 %12  }
  0x7d   :  { %15 = vst.msk [vmem:[#allocation0] sm:$0x1] %vm14_vm1, %v13_v3  }
  0x84   :  { %v20_v4 = vld [vmem:[#allocation0] sm:$0x1] }
  0x85   :  { %23 = vst [vmem:[%s43_s1] sm:$0x1] %v20_v4 }

// kernel: tile.8
= control target key start
LH: loop header
LB: loop body
LE: loop exit
PB: predicated region body
PF: predicated region fallthrough
CT: control target
= control target key end

     0   :  { %s22_s0 = inlined_call_operand.vmem [shape: f32[8], index: 0, kind: input, shape index: {}]   ;;  %s23_s1 = inlined_call_operand.vmem [shape: f32[2,8], index: 1, kind: output, shape index: {}]  }
   0x1   :  { %v4_v0 = vld [vmem:[%s22_s0] ss:$0 sm:$0xff] }
   0x2   :  { %5 = vst [vmem:[%s23_s1] sm:$0x3] %v4_v0 }

// kernel: unet_up_forward.5
= control target key start
LH: loop header
LB: loop body
LE: loop exit
PB: predicated region body
PF: predicated region fallthrough
CT: control target
= control target key end

     0   :  { %s916_s18 = smov 0   ;;  %s1031_s0 = inlined_call_operand.vmem [shape: bf16[128,4], index: 0, kind: input, shape index: {}]   ;;  %s1032_s1 = inlined_call_operand.vmem [shape: bf16[128,4], index: 1, kind: input, shape index: {}]   ;;  %s1033_s2 = inlined_call_operand.vmem [shape: bf16[2,4,16], index: 2, kind: input, shape index: {}]   ;;  %s1034_s3 = inlined_call_operand.vmem [shape: bf16[2,4,16], index: 3, kind: input, shape index: {}]   ;;  %s1035_s4 = inlined_call_operand.vmem [shape: f32[1,16], index: 4, kind: input, shape index: {}]   ;;  %s1036_s5 = inlined_call_operand.vmem [shape: bf16[16,2,8,16], index: 5, kind: output, shape index: {}]  }
   0x1 LB: > { %s747_s19 = sadd.s32 4294967295, %s884_s18   ;;  %p751_p0 = scmp.ge.s32.totalorder %s884_s18, 1  ;;  %s884_s18 = sphi %s916_s18, %s15_s18  }
   0x2   : > { %p199_p1 = scmp.lt.s32.totalorder %s884_s18, 3 }
   0x4   : > { %p200_p2 = pnand %p751_p0, %p199_p1 }
   0x5   : > { %s752_s24 = sshll.u32 (!%p200_p2), %s747_s19, 3 }
   0x6   : > { %203 = sbr.rel (%p200_p2) target bundleno = 247 (0xf7), region = 40  ;;  %p234_p3 = scmp.lt.s32.totalorder (!%p200_p2), %s752_s24, 15 }
   0xb   : > { %v270_v0 = vld [vmem:[%s1034_s3] sm:$0x3]  ;;  %vm304_vm0 = vcmask 1041408   ;;  %v777_v4 = vld [vmem:[%s1034_s3 + $0x2] sm:$0x3]  ;;  %s1038_s24 = smov (!%p234_p3, %s752_s24), 15 }
   0xc   : > { %v269_v1 = vld [vmem:[%s1033_s2] sm:$0x3]  ;;  %858 = vmatprep.subr.msk.bf16.mxu0 %vm304_vm0, %v270_v0  ;;  %v306_v2 = vsel %vm304_vm0, %v270_v0, 0  ;;  %v776_v5 = vld [vmem:[%s1033_s2 + $0x2] sm:$0x3]  ;;  %s753_s29 = sshll.u32 %s1038_s24, 2 }
   0xd   : > { %859 = vmatprep.subr.msk.bf16.mxu1 %vm304_vm0, %v269_v1  ;;  %v406_v3 = vsel %vm304_vm0, %v269_v1, 0  ;;  %819 = vmatpush3.bf16.msra.mxu0 %v306_v2  ;;  %s243_s7 = scalar_lea.vmem %s1032_s1, %s753_s29  ;;  %vm291_vm1 = vcmask 31744   ;;  %s237_s10 = scalar_lea.vmem %s1031_s0, %s753_s29  ;;  %v510_v9 = vsel %vm304_vm0, %v777_v4, 0  ;;  %v578_v11 = vsel %vm304_vm0, %v776_v5, 0  ;;  %v972_v18 = vld [vmem:[%s1035_s4] ss:$0 sm:$0xff] }
   0xe   : > { %829 = vmatpush3.bf16.msra.mxu1 %v406_v3  ;;  %860 = vmatprep.subr.msk.bf16.mxu0 %vm304_vm0, %v777_v4  ;;  %v870_v6 = vld [vmem:[%s243_s7] sm:$0xff]   ;;  %v872_v8 = vld [vmem:[%s243_s7 + $0x8] sm:$0xff]   ;;  %v874_v12 = vld [vmem:[%s243_s7 + $0x10] sm:$0xff]   ;;  %s797_s13 = sshll.u32 %s1038_s24, 3  ;;  %vm496_vm2 = vcmask 125952  }
   0xf   : > { %861 = vmatprep.subr.msk.bf16.mxu1 %vm304_vm0, %v776_v5  ;;  %v871_v7 = vld [vmem:[%s237_s10] sm:$0xff]   ;;  %820 = vmatprep.mubr.msk.bf16.mxu0 %vm291_vm1, %v870_v6  ;;  %v873_v10 = vld [vmem:[%s237_s10 + $0x8] sm:$0xff]   ;;  %v875_v13 = vld [vmem:[%s237_s10 + $0x10] sm:$0xff]   ;;  %s979_s16 = scalar_lea.vmem %s1036_s5, %s797_s13 }
  0x10   : > { %830 = vmatprep.mubr.msk.bf16.mxu1 %vm291_vm1, %v871_v7  ;;  %821 = vmatmul.mubr.msk.bf16.vlgmr.msra.gmra.mxu0 %vm291_vm1, %v872_v8  ;;  %v876_v14 = vld [vmem:[%s243_s7 + $0x18] sm:$0xff]  }
  0x11   : > { %831 = vmatmul.mubr.msk.bf16.vlgmr.msra.gmra.mxu1 %vm291_vm1, %v873_v10  ;;  %839 = vmatpush3.bf16.msra.mxu0 %v510_v9  ;;  %v877_v15 = vld [vmem:[%s237_s10 + $0x18] sm:$0xff]  }
  0x12   : > { %849 = vmatpush3.bf16.msra.mxu1 %v578_v11  ;;  %824 = vmatprep.mubr.msk.bf16.mxu0 %vm291_vm1, %v874_v12 }
  0x13   : > { %834 = vmatprep.mubr.msk.bf16.mxu1 %vm291_vm1, %v875_v13 }
  0x18   : > { %825 = vmatmul.mubr.msk.bf16.gmra.mxu0 %vm291_vm1, %v876_v14 }
  0x19   : > { %835 = vmatmul.mubr.msk.bf16.gmra.mxu1 %vm291_vm1, %v877_v15  ;;  %840 = vmatprep.mubr.msk.bf16.mxu0 %vm291_vm1, %v870_v6 }
  0x1a   : > { %850 = vmatprep.mubr.msk.bf16.mxu1 %vm291_vm1, %v871_v7 }
  0x20   : > { %841 = vmatmul.mubr.msk.bf16.vlgmr.msra.gmra.mxu0 %vm291_vm1, %v872_v8 }
  0x21   : > { %851 = vmatmul.mubr.msk.bf16.vlgmr.msra.gmra.mxu1 %vm291_vm1, %v873_v10  ;;  %844 = vmatprep.mubr.msk.bf16.mxu0 %vm291_vm1, %v874_v12 }
  0x22   : > { %854 = vmatprep.mubr.msk.bf16.mxu1 %vm291_vm1, %v875_v13 }
  0x28   : > { %845 = vmatmul.mubr.msk.bf16.gmra.mxu0 %vm291_vm1, %v876_v14 }
  0x29   : > { %855 = vmatmul.mubr.msk.bf16.gmra.mxu1 %vm291_vm1, %v877_v15 }
  0xd0   : > { %v822_v16 = vpop.f32.mrf.mxu0 }
  0xd1   : > { %v832_v17 = vpop.f32.mrf.mxu1 }
  0xd2   : > { %v451_v19 = vadd.f32 %v832_v17, %v822_v16  ;;  %v342_v20 = vpop.f32.mrf.mxu0 }
  0xd3   : > { %v442_v21 = vpop.f32.mrf.mxu1 }
  0xd4   : > { %v482_v22 = vadd.f32 %v972_v18, %v451_v19  ;;  %v443_v23 = vadd.f32 %v442_v21, %v342_v20  ;;  %v823_v24 = vpop.f32.mrf.mxu0 }
  0xd5   : > { %v833_v25 = vpop.f32.mrf.mxu1 }
  0xd6   : > { %v490_v26 = vpack.c.bf16 %v482_v22, %v482_v22  ;;  %v480_v27 = vadd.f32 %v972_v18, %v443_v23  ;;  %v454_v28 = vadd.f32 %v833_v25, %v823_v24  ;;  %v345_v29 = vpop.f32.mrf.mxu0 }
  0xd7   : > { %v445_v30 = vpop.f32.mrf.mxu1 }
  0xd8   : > { %499 = vst.msk [vmem:[%s979_s16 + $0x10] sm:$0xf] %vm496_vm2, %v490_v26  ;;  %v488_v31 = vpack.c.bf16 %v480_v27, %v480_v27  ;;  %v483_v32 = vadd.f32 %v972_v18, %v454_v28  ;;  %v446_v33 = vadd.f32 %v445_v30, %v345_v29  ;;  %v826_v34 = vpop.f32.mrf.mxu0 }
  0xd9   : > { %v836_v35 = vpop.f32.mrf.mxu1 }
  0xda   : > { %497 = vst.msk [vmem:[%s979_s16] sm:$0xf] %vm496_vm2, %v488_v31  ;;  %v491_v36 = vpack.c.bf16 %v483_v32, %v483_v32  ;;  %v481_v37 = vadd.f32 %v972_v18, %v446_v33  ;;  %v467_v38 = vadd.f32 %v836_v35, %v826_v34  ;;  %v358_v39 = vpop.f32.mrf.mxu0 }
  0xdb   : > { %v458_v40 = vpop.f32.mrf.mxu1 }
  0xdc   : > { %500 = vst.msk [vmem:[%s979_s16 + $0x18] sm:$0xf] %vm496_vm2, %v491_v36  ;;  %v489_v41 = vpack.c.bf16 %v481_v37, %v481_v37  ;;  %v486_v42 = vadd.f32 %v972_v18, %v467_v38  ;;  %v459_v43 = vadd.f32 %v458_v40, %v358_v39  ;;  %v827_v44 = vpop.f32.mrf.mxu0 }
  0xdd   : > { %v837_v45 = vpop.f32.mrf.mxu1 }
  0xde   : > { %498 = vst.msk [vmem:[%s979_s16 + $0x8] sm:$0xf] %vm496_vm2, %v489_v41  ;;  %v494_v46 = vpack.c.bf16 %v486_v42, %v486_v42  ;;  %v484_v47 = vadd.f32 %v972_v18, %v459_v43  ;;  %v470_v48 = vadd.f32 %v837_v45, %v827_v44  ;;  %v361_v49 = vpop.f32.mrf.mxu0 }
  0xdf   : > { %v461_v50 = vpop.f32.mrf.mxu1 }
  0xe0   : > { %503 = vst.msk [vmem:[%s979_s16 + $0x30] sm:$0xf] %vm496_vm2, %v494_v46  ;;  %v492_v51 = vpack.c.bf16 %v484_v47, %v484_v47  ;;  %v487_v52 = vadd.f32 %v972_v18, %v470_v48  ;;  %v462_v53 = vadd.f32 %v461_v50, %v361_v49  ;;  %v842_v54 = vpop.f32.mrf.mxu0 }
  0xe1   : > { %v852_v55 = vpop.f32.mrf.mxu1 }
  0xe2   : > { %501 = vst.msk [vmem:[%s979_s16 + $0x20] sm:$0xf] %vm496_vm2, %v492_v51  ;;  %v495_v56 = vpack.c.bf16 %v487_v52, %v487_v52  ;;  %v485_v57 = vadd.f32 %v972_v18, %v462_v53  ;;  %v623_v58 = vadd.f32 %v852_v55, %v842_v54  ;;  %v546_v59 = vpop.f32.mrf.mxu0 }
  0xe3   : > { %v614_v60 = vpop.f32.mrf.mxu1 }
  0xe4   : > { %504 = vst.msk [vmem:[%s979_s16 + $0x38] sm:$0xf] %vm496_vm2, %v495_v56  ;;  %v493_v61 = vpack.c.bf16 %v485_v57, %v485_v57  ;;  %v654_v62 = vadd.f32 %v972_v18, %v623_v58  ;;  %v615_v63 = vadd.f32 %v614_v60, %v546_v59  ;;  %v843_v0 = vpop.f32.mrf.mxu0 }
  0xe5   : > { %v853_v1 = vpop.f32.mrf.mxu1 }
  0xe6   : > { %502 = vst.msk [vmem:[%s979_s16 + $0x28] sm:$0xf] %vm496_vm2, %v493_v61  ;;  %v662_v2 = vpack.c.bf16 %v654_v62, %v654_v62  ;;  %v652_v3 = vadd.f32 %v972_v18, %v615_v63  ;;  %v626_v4 = vadd.f32 %v853_v1, %v843_v0  ;;  %v549_v5 = vpop.f32.mrf.mxu0 }
  0xe7   : > { %v617_v6 = vpop.f32.mrf.mxu1 }
  0xe8   : > { %789 = vst.msk [vmem:[%s979_s16 + $0x14] sm:$0xf] %vm496_vm2, %v662_v2  ;;  %v660_v7 = vpack.c.bf16 %v652_v3, %v652_v3  ;;  %v655_v8 = vadd.f32 %v972_v18, %v626_v4  ;;  %v618_v9 = vadd.f32 %v617_v6, %v549_v5  ;;  %v846_v10 = vpop.f32.mrf.mxu0 }
  0xe9   : > { %v856_v11 = vpop.f32.mrf.mxu1 }
  0xea   : > { %787 = vst.msk [vmem:[%s979_s16 + $0x4] sm:$0xf] %vm496_vm2, %v660_v7  ;;  %v663_v12 = vpack.c.bf16 %v655_v8, %v655_v8  ;;  %v653_v13 = vadd.f32 %v972_v18, %v618_v9  ;;  %v639_v14 = vadd.f32 %v856_v11, %v846_v10  ;;  %v562_v15 = vpop.f32.mrf.mxu0 }
  0xeb   : > { %v630_v16 = vpop.f32.mrf.mxu1 }
  0xec   : > { %790 = vst.msk [vmem:[%s979_s16 + $0x1c] sm:$0xf] %vm496_vm2, %v663_v12  ;;  %v661_v17 = vpack.c.bf16 %v653_v13, %v653_v13  ;;  %v658_v19 = vadd.f32 %v972_v18, %v639_v14  ;;  %v631_v20 = vadd.f32 %v630_v16, %v562_v15  ;;  %v847_v21 = vpop.f32.mrf.mxu0 }
  0xed   : > { %v857_v22 = vpop.f32.mrf.mxu1 }
  0xee   : > { %788 = vst.msk [vmem:[%s979_s16 + $0xc] sm:$0xf] %vm496_vm2, %v661_v17  ;;  %v666_v23 = vpack.c.bf16 %v658_v19, %v658_v19  ;;  %v656_v24 = vadd.f32 %v972_v18, %v631_v20  ;;  %v642_v25 = vadd.f32 %v857_v22, %v847_v21  ;;  %v565_v26 = vpop.f32.mrf.mxu0 }
  0xef   : > { %v633_v27 = vpop.f32.mrf.mxu1 }
  0xf0   : > { %793 = vst.msk [vmem:[%s979_s16 + $0x34] sm:$0xf] %vm496_vm2, %v666_v23  ;;  %v664_v28 = vpack.c.bf16 %v656_v24, %v656_v24  ;;  %v659_v29 = vadd.f32 %v972_v18, %v642_v25  ;;  %v634_v30 = vadd.f32 %v633_v27, %v565_v26 }
  0xf2   : > { %791 = vst.msk [vmem:[%s979_s16 + $0x24] sm:$0xf] %vm496_vm2, %v664_v28  ;;  %v667_v31 = vpack.c.bf16 %v659_v29, %v659_v29  ;;  %v657_v32 = vadd.f32 %v972_v18, %v634_v30 }
  0xf4   : > { %794 = vst.msk [vmem:[%s979_s16 + $0x3c] sm:$0xf] %vm496_vm2, %v667_v31  ;;  %v665_v33 = vpack.c.bf16 %v657_v32, %v657_v32 }
  0xf6   : > { %792 = vst.msk [vmem:[%s979_s16 + $0x2c] sm:$0xf] %vm496_vm2, %v665_v33 }
  0xf7 PF: > { %s15_s18 = sadd.s32 1, %s884_s18  }
  0xf8   : > { %p12_p4 = scmp.ge.s32.totalorder %s15_s18, 4  }
  0xfa   :  { %14 = sbr.rel (!%p12_p4) target bundleno = 1 (0x1), region = 76 }

// kernel: unet_up_forward.6
= control target key start
LH: loop header
LB: loop body
LE: loop exit
PB: predicated region body
PF: predicated region fallthrough
CT: control target
= control target key end

     0   :  { %s4265_s15 = smov 0   ;;  %s5949_s0 = inlined_call_operand.vmem [shape: bf16[2,18,18,8], index: 0, kind: input, shape index: {}]   ;;  %s5950_s1 = inlined_call_operand.vmem [shape: bf16[9,8,8], index: 1, kind: input, shape index: {}]   ;;  %s5951_s2 = inlined_call_operand.vmem [shape: f32[1,8], index: 2, kind: input, shape index: {}]   ;;  %s5952_s3 = inlined_call_operand.vmem [shape: f32[1,8], index: 3, kind: input, shape index: {}]   ;;  %s5953_s4 = inlined_call_operand.vmem [shape: bf16[512,8], index: 4, kind: output, shape index: {}]  }
   0x1 LB: > { %s4271_s16 = sadd.s32 4294967295, %s4238_s15   ;;  %p3374_p0 = scmp.ge.s32.totalorder %s4238_s15, 1  ;;  %s4238_s15 = sphi %s4265_s15, %s14_s15  }
   0x2   : > { %p162_p1 = scmp.lt.s32.totalorder %s4238_s15, 3 }
   0x4   : > { %p163_p2 = pnand %p3374_p0, %p162_p1 }
   0x6   : > { %166 = sbr.rel (%p163_p2) target bundleno = 589 (0x24d), region = 36 }
   0xb   : > { %v3378_v0 = vld [vmem:[%s5950_s1 + $0x4] sm:$0xf]  ;;  %vm741_vm0 = vcmask 1043456   ;;  %p188_p3 = scmp.lt.s32.totalorder %s4271_s16, 1  ;;  %v254_v2 = vld [vmem:[%s5950_s1] sm:$0xf] }
   0xc   : > { %4132 = vmatprep.subr.msk.bf16.mxu1 %vm741_vm0, %v3378_v0  ;;  %4131 = vmatprep.subr.msk.bf16.mxu0 %vm741_vm0, %v3378_v0  ;;  %v743_v1 = vsel %vm741_vm0, %v3378_v0, 0  ;;  %v3459_v3 = vld [vmem:[%s5950_s1 + $0x8] sm:$0xf]  ;;  %vm255_vm1 = vsmask.f32 3328  ;;  %v4297_v4 = vsel %vm741_vm0, %v254_v2, 0 }
   0xd   : > { %4130 = vmatpush3.bf16.msra.mxu1 %v743_v1  ;;  %3824 = vmatpush3.bf16.msra.mxu0 %v743_v1  ;;  %s189_s21 = scalar_select %p188_p3, %s4271_s16, 1  ;;  %vm256_vm2 = vsmask.f32 7440  ;;  %v4300_v5 = vsel %vm741_vm0, %v3459_v3, 0  ;;  %vm692_vm3 = vcmask 64512   ;;  %v5997_v32 = vmov 0 }
   0xe   : > { %4133 = vmatprep.subr.msk.bf16.mxu1 %vm741_vm0, %v254_v2  ;;  %4134 = vmatprep.subr.msk.bf16.mxu0 %vm741_vm0, %v3459_v3  ;;  %vm4339_vm4 = vmor %vm255_vm1, %vm256_vm2  ;;  %vm1214_vm5 = vcmask 1042432   ;;  %vm1215_vm6 = vcmask 1046532   ;;  %s3376_s20 = sshll.u32 %s4271_s16, 5  ;;  %vm3281_vm8 = vcmask 60416  }
   0xf   : > { %s4141_s24 = smul.u32 216, %s189_s21  ;;  %v5998_v32 = vsel %vm4339_vm4, 4294967295, %v5997_v32  ;;  %vm4662_vm7 = vmor %vm1214_vm5, %vm1215_vm6  ;;  %p5664_p4 = scmp.lt.s32.totalorder %s3376_s20, 63 }
  0x10   : > { %5999 = vst [vmem:[#allocation2_spill] sm:$0xff] %v5998_v32 }
  0x11   : > { %s4294_s27 = scalar_lea.vmem %s5949_s0, %s4141_s24  ;;  %s6100_s20 = smov (!%p5664_p4, %s3376_s20), 63 }
  0x12   : > { %v4303_v6 = vld [vmem:[%s4294_s27] sm:$0xf]  ;;  %v4306_v7 = vld [vmem:[%s4294_s27 + $0x4] sm:$0xf]  ;;  %v4309_v8 = vld [vmem:[%s4294_s27 + $0x8] sm:$0x1] }
  0x13   : > { %v259_v9 = vshrl.u32 %v4303_v6, 16  ;;  %v262_v10 = vshll.u32 %v4303_v6, 16  ;;  %v268_v11 = vshll.u32 %v4306_v7, 16  ;;  %v272_v12 = vshrl.u32 %v4306_v7, 16  ;;  %v4316_v13 = vld [vmem:[%s4294_s27 + $0x60] sm:$0xf] }
  0x14   : > { %v278_v14 = vshll.u32 %v4309_v8, 16  ;;  %v4321_v16 = vld [vmem:[%s4294_s27 + $0x64] sm:$0xf]  ;;  %v4324_v17 = vld [vmem:[%s4294_s27 + $0x68] sm:$0x1]  ;;  %v451_v23 = vshrl.u32 %v4316_v13, 16 }
  0x15   : > { %v261_v18 = vrot.slane %v259_v9, 4  ;;  %v264_v19 = vrot.slane %v262_v10, 5  ;;  %v270_v20 = vrot.slane %v268_v11, 5  ;;  %v274_v21 = vrot.slane %v272_v12, 4  ;;  %v4332_v30 = vld [vmem:[%s4294_s27 + $0xc] sm:$0xf] }
  0x16   : > { %v280_v22 = vrot.slane %v278_v14, 5  ;;  %v454_v24 = vshll.u32 %v4316_v13, 16  ;;  %v460_v25 = vshll.u32 %v4321_v16, 16  ;;  %v464_v28 = vshrl.u32 %v4321_v16, 16  ;;  %v4335_v31 = vld [vmem:[%s4294_s27 + $0x10] sm:$0xf] }
  0x17   : > { %v265_v26 = vor.u32 %v264_v19, %v261_v18  ;;  %v275_v27 = vor.u32 %v274_v21, %v270_v20  ;;  %v470_v29 = vshll.u32 %v4324_v17, 16  ;;  %v453_v33 = vrot.slane %v451_v23, 4  ;;  %v4346_v42 = vld [vmem:[%s4294_s27 + $0x14] sm:$0x1]  ;;  %v4357_v54 = vld [vmem:[%s4294_s27 + $0x6c] sm:$0xf] }
  0x18   : > { %v456_v34 = vrot.slane %v454_v24, 5  ;;  %v462_v35 = vrot.slane %v460_v25, 5  ;;  %v466_v39 = vrot.slane %v464_v28, 4  ;;  %v283_v43 = vshrl.u32 %v4332_v30, 16  ;;  %6000 = vst [vmem:[#allocation3_spill] sm:$0xff] %v4357_v54  ;;  %s3377_s16 = sshll.u32 %s6100_s20, 2 }
  0x19   : > { %v266_v37 = vrot.slane %v265_v26, 4  ;;  %v276_v38 = vrot.slane %v275_v27, 4  ;;  %v472_v40 = vrot.slane %v470_v29, 5  ;;  %v286_v44 = vshll.u32 %v4332_v30, 16  ;;  %v4361_v59 = vld [vmem:[%s4294_s27 + $0x70] sm:$0xf]  ;;  %s5710_s24 = scalar_lea.vmem %s5953_s4, %s3377_s16 }
  0x1a   : > { %v457_v41 = vor.u32 %v456_v34, %v453_v33  ;;  %v292_v45 = vshll.u32 %v4335_v31, 16  ;;  %v467_v48 = vor.u32 %v466_v39, %v462_v35  ;;  %v296_v49 = vshrl.u32 %v4335_v31, 16  ;;  %v4369_v0 = vld [vmem:[%s4294_s27 + $0x74] sm:$0x1]  ;;  %v4375_v10 = vld [vmem:[%s4294_s27 + $0x18] sm:$0xf] }
  0x1b   : > { %v271_v46 = vsel %vm4339_vm4, %v266_v37, %v270_v20  ;;  %v281_v47 = vsel %vm4339_vm4, %v276_v38, %v280_v22  ;;  %v285_v52 = vrot.slane %v283_v43, 4  ;;  %v288_v53 = vrot.slane %v286_v44, 5  ;;  %6001 = vst [vmem:[#allocation4_spill] sm:$0xff] %v4369_v0  ;;  %v4384_v23 = vld [vmem:[%s4294_s27 + $0x1c] sm:$0xf] }
  0x1c   : > { %v3379_v50 = vcombine.low %v271_v46, %v281_v47  ;;  %v458_v51 = vrot.slane %v457_v41, 4  ;;  %v468_v55 = vrot.slane %v467_v48, 4  ;;  %v294_v56 = vrot.slane %v292_v45, 5  ;;  %v4391_v27 = vld [vmem:[%s4294_s27 + $0x20] sm:$0x1] }
  0x1d   : > { %v298_v57 = vrot.slane %v296_v49, 4  ;;  %v302_v58 = vshll.u32 %v4346_v42, 16  ;;  %v289_v61 = vor.u32 %v288_v53, %v285_v52  ;;  %v475_v9 = vshrl.u32 %v4357_v54, 16  ;;  %v4398_v37 = vld [vmem:[%s4294_s27 + $0x78] sm:$0xf] }
  0x1e   : > { %3825 = vmatprep.mubr.msk.bf16.mxu0 %vm692_vm3, %v3379_v50  ;;  %v463_v60 = vsel %vm4339_vm4, %v458_v51, %v462_v35  ;;  %v473_v1 = vsel %vm4339_vm4, %v468_v55, %v472_v40  ;;  %v478_v14 = vshll.u32 %v4357_v54, 16  ;;  %v484_v18 = vshll.u32 %v4361_v59, 16  ;;  %6003 = vst [vmem:[#allocation6_spill] sm:$0xff] %v4398_v37  ;;  %v4406_v43 = vld [vmem:[%s5950_s1 + $0x10] sm:$0xf] }
  0x1f   : > { %v299_v2 = vor.u32 %v298_v57, %v294_v56  ;;  %v304_v3 = vrot.slane %v302_v58, 5  ;;  %v4377_v11 = vcombine.low %v463_v60, %v473_v1  ;;  %v290_v12 = vrot.slane %v289_v61, 4  ;;  %v4411_v48 = vld [vmem:[%s4294_s27 + $0x7c] sm:$0xf]  ;;  %v4419_v58 = vld [vmem:[%s4294_s27 + $0x80] sm:$0x1] }
  0x20   : > { %v477_v20 = vrot.slane %v475_v9, 4  ;;  %v488_v21 = vshrl.u32 %v4361_v59, 16  ;;  %v494_v22 = vshll.u32 %v4369_v0, 16  ;;  %v480_v25 = vrot.slane %v478_v14, 5  ;;  %6005 = vst [vmem:[#allocation8_spill] sm:$0xff] %v4411_v48  ;;  %6006 = vst [vmem:[#allocation9_spill] sm:$0xff] %v4419_v58 }
  0x21   : > { %6002 = vst [vmem:[#allocation5_spill] sm:$0xff] %v4377_v11  ;;  %v300_v19 = vrot.slane %v299_v2, 4  ;;  %3841 = vmatprep.mubr.msk.bf16.mxu1 %vm692_vm3, %v4377_v11  ;;  %v295_v24 = vsel %vm4339_vm4, %v290_v12, %v294_v56  ;;  %v486_v26 = vrot.slane %v484_v18, 5  ;;  %v307_v28 = vshrl.u32 %v4375_v10, 16  ;;  %v4433_v18 = vld [vmem:[%s4294_s27 + $0x28] sm:$0xf] }
  0x22   : > { %v490_v33 = vrot.slane %v488_v21, 4  ;;  %v496_v34 = vrot.slane %v494_v22, 5  ;;  %v310_v35 = vshll.u32 %v4375_v10, 16  ;;  %v481_v39 = vor.u32 %v480_v25, %v477_v20 }
  0x23   : > { %v305_v29 = vsel %vm4339_vm4, %v300_v19, %v304_v3  ;;  %v309_v40 = vrot.slane %v307_v28, 4  ;;  %v316_v41 = vshll.u32 %v4384_v23, 16  ;;  %v320_v46 = vshrl.u32 %v4384_v23, 16  ;;  %v4425_v3 = vld [vmem:[%s4294_s27 + $0x24] sm:$0xf] }
  0x24   : > { %v4400_v38 = vcombine.low %v295_v24, %v305_v29  ;;  %v491_v44 = vor.u32 %v490_v33, %v486_v26  ;;  %v312_v45 = vrot.slane %v310_v35, 5  ;;  %v326_v47 = vshll.u32 %v4391_v27, 16  ;;  %v4441_v24 = vld [vmem:[%s5950_s1 + $0xc] sm:$0xf] }
  0x25   : > { %v482_v49 = vrot.slane %v481_v39, 4  ;;  %v318_v50 = vrot.slane %v316_v41, 5  ;;  %v499_v51 = vshrl.u32 %v4398_v37, 16  ;;  %v502_v52 = vshll.u32 %v4398_v37, 16  ;;  %v4446_v29 = vld [vmem:[%s4294_s27 + $0x2c] sm:$0x1] }
  0x26   : > { %6004 = vst [vmem:[#allocation7_spill] sm:$0xff] %v4400_v38  ;;  %3826 = vmatmul.mubr.msk.bf16.vlgmr.msra.gmra.mxu0 %vm692_vm3, %v4400_v38  ;;  %v492_v53 = vrot.slane %v491_v44, 4  ;;  %v313_v55 = vor.u32 %v312_v45, %v309_v40  ;;  %v322_v56 = vrot.slane %v320_v46, 4  ;;  %v328_v57 = vrot.slane %v326_v47, 5  ;;  %v4454_v41 = vld [vmem:[%s4294_s27 + $0x84] sm:$0xf] }
  0x27   : > { %3892 = vmatpush3.bf16.msra.mxu0 %v4300_v5  ;;  %v487_v60 = vsel %vm4339_vm4, %v482_v49, %v486_v26  ;;  %v501_v61 = vrot.slane %v499_v51, 4  ;;  %v504_v1 = vrot.slane %v502_v52, 5  ;;  %v508_v2 = vshll.u32 %v4411_v48, 16  ;;  %v4461_v49 = vld [vmem:[%s4294_s27 + $0x88] sm:$0xf] }
  0x28   : > { %4136 = vmatprep.subr.msk.bf16.mxu0 %vm741_vm0, %v4406_v43  ;;  %v497_v5 = vsel %vm4339_vm4, %v492_v53, %v496_v34  ;;  %v314_v9 = vrot.slane %v313_v55, 4  ;;  %v323_v12 = vor.u32 %v322_v56, %v318_v50  ;;  %v512_v14 = vshrl.u32 %v4411_v48, 16  ;;  %v4601_v38 = vld [vmem:[%s4294_s27 + $0xb0] sm:$0x1]  ;;  %v4623_v48 = vld [vmem:[%s4294_s27 + $0x5c] sm:$0x1] }
  0x29   : > { %v4435_v19 = vcombine.low %v487_v60, %v497_v5  ;;  %v505_v20 = vor.u32 %v504_v1, %v501_v61  ;;  %v510_v21 = vrot.slane %v508_v2, 5  ;;  %v518_v22 = vshll.u32 %v4419_v58, 16  ;;  %6018 = vst [vmem:[#allocation21_spill] sm:$0xff] %v4601_v38 }
  0x2a   : > { %v319_v25 = vsel %vm4339_vm4, %v314_v9, %v318_v50  ;;  %v324_v26 = vrot.slane %v323_v12, 4  ;;  %v514_v28 = vrot.slane %v512_v14, 4  ;;  %v331_v33 = vshrl.u32 %v4425_v3, 16  ;;  %v4480_v9 = vld [vmem:[%s4294_s27 + $0x30] sm:$0xf] }
  0x2b   : > { %6007 = vst [vmem:[#allocation10_spill] sm:$0xff] %v4435_v19  ;;  %3842 = vmatmul.mubr.msk.bf16.vlgmr.msra.gmra.mxu1 %vm692_vm3, %v4435_v19  ;;  %v506_v34 = vrot.slane %v505_v20, 4  ;;  %v520_v35 = vrot.slane %v518_v22, 5  ;;  %v334_v39 = vshll.u32 %v4425_v3, 16  ;;  %v340_v40 = vshll.u32 %v4433_v18, 16 }
  0x2c   : > { %3858 = vmatpush3.bf16.msra.mxu1 %v4297_v4  ;;  %v329_v44 = vsel %vm4339_vm4, %v324_v26, %v328_v57  ;;  %v515_v45 = vor.u32 %v514_v28, %v510_v21  ;;  %v333_v46 = vrot.slane %v331_v33, 4  ;;  %v344_v47 = vshrl.u32 %v4433_v18, 16  ;;  %v4471_v57 = vld [vmem:[%s4294_s27 + $0x8c] sm:$0x1]  ;;  %v4485_v22 = vld [vmem:[%s4294_s27 + $0x34] sm:$0xf] }
  0x2d   : > { %v4463_v50 = vcombine.low %v319_v25, %v329_v44  ;;  %v511_v51 = vsel %vm4339_vm4, %v506_v34, %v510_v21  ;;  %v336_v52 = vrot.slane %v334_v39, 5  ;;  %v342_v53 = vrot.slane %v340_v40, 5  ;;  %4135 = vmatprep.subr.msk.bf16.mxu1 %vm741_vm0, %v4441_v24 }
  0x2e   : > { %v516_v4 = vrot.slane %v515_v45, 4  ;;  %v346_v55 = vrot.slane %v344_v47, 4  ;;  %v350_v56 = vshll.u32 %v4446_v29, 16  ;;  %v523_v60 = vshrl.u32 %v4454_v41, 16 }
  0x2f   : > { %6008 = vst [vmem:[#allocation11_spill] sm:$0xff] %v4463_v50  ;;  %3829 = vmatprep.mubr.msk.bf16.mxu0 %vm692_vm3, %v4463_v50  ;;  %v337_v61 = vor.u32 %v336_v52, %v333_v46  ;;  %v526_v1 = vshll.u32 %v4454_v41, 16  ;;  %v532_v2 = vshll.u32 %v4461_v49, 16  ;;  %v536_v5 = vshrl.u32 %v4461_v49, 16  ;;  %v4496_v46 = vld [vmem:[%s4294_s27 + $0x38] sm:$0x1] }
  0x30   : > { %v521_v12 = vsel %vm4339_vm4, %v516_v4, %v520_v35  ;;  %v347_v14 = vor.u32 %v346_v55, %v342_v53  ;;  %v352_v20 = vrot.slane %v350_v56, 5  ;;  %v525_v21 = vrot.slane %v523_v60, 4  ;;  %v4501_v52 = vld [vmem:[%s4294_s27 + $0x90] sm:$0xf] }
  0x31   : > { %v4487_v25 = vcombine.low %v511_v51, %v521_v12  ;;  %v338_v26 = vrot.slane %v337_v61, 4  ;;  %v528_v28 = vrot.slane %v526_v1, 5  ;;  %v534_v33 = vrot.slane %v532_v2, 5  ;;  %v4506_v61 = vld [vmem:[%s4294_s27 + $0x94] sm:$0xf] }
  0x32   : > { %v348_v34 = vrot.slane %v347_v14, 4  ;;  %v538_v39 = vrot.slane %v536_v5, 4  ;;  %v542_v40 = vshll.u32 %v4471_v57, 16  ;;  %v355_v44 = vshrl.u32 %v4480_v9, 16 }
  0x33   : > { %6009 = vst [vmem:[#allocation12_spill] sm:$0xff] %v4487_v25  ;;  %3845 = vmatprep.mubr.msk.bf16.mxu1 %vm692_vm3, %v4487_v25  ;;  %v343_v35 = vsel %vm4339_vm4, %v338_v26, %v342_v53  ;;  %v529_v45 = vor.u32 %v528_v28, %v525_v21  ;;  %v358_v47 = vshll.u32 %v4480_v9, 16  ;;  %v364_v51 = vshll.u32 %v4485_v22, 16  ;;  %v4552_v25 = vld [vmem:[%s4294_s27 + $0xa0] sm:$0xf] }
  0x34   : > { %v353_v4 = vsel %vm4339_vm4, %v348_v34, %v352_v20  ;;  %v539_v55 = vor.u32 %v538_v39, %v534_v33  ;;  %v544_v56 = vrot.slane %v542_v40, 5  ;;  %v357_v60 = vrot.slane %v355_v44, 4  ;;  %v4518_v34 = vld [vmem:[%s4294_s27 + $0x98] sm:$0x1]  ;;  %v4523_v44 = vld [vmem:[%s4294_s27 + $0x3c] sm:$0xf] }
  0x35   : > { %v4508_v53 = vcombine.low %v343_v35, %v353_v4  ;;  %v530_v1 = vrot.slane %v529_v45, 4  ;;  %v360_v2 = vrot.slane %v358_v47, 5  ;;  %v366_v5 = vrot.slane %v364_v51, 5  ;;  %v4528_v4 = vld [vmem:[%s4294_s27 + $0x40] sm:$0xf] }
  0x36   : > { %v540_v12 = vrot.slane %v539_v55, 4  ;;  %v368_v14 = vshrl.u32 %v4485_v22, 16  ;;  %v374_v21 = vshll.u32 %v4496_v46, 16  ;;  %v547_v20 = vshrl.u32 %v4501_v52, 16 }
  0x37   : > { %6010 = vst [vmem:[#allocation13_spill] sm:$0xff] %v4508_v53  ;;  %3830 = vmatmul.mubr.msk.bf16.gmra.mxu0 %vm692_vm3, %v4508_v53  ;;  %v535_v26 = vsel %vm4339_vm4, %v530_v1, %v534_v33  ;;  %v361_v28 = vor.u32 %v360_v2, %v357_v60  ;;  %v550_v39 = vshll.u32 %v4501_v52, 16  ;;  %v556_v40 = vshll.u32 %v4506_v61, 16 }
  0x38   : > { %v545_v35 = vsel %vm4339_vm4, %v540_v12, %v544_v56  ;;  %v370_v45 = vrot.slane %v368_v14, 4  ;;  %v376_v47 = vrot.slane %v374_v21, 5  ;;  %v549_v51 = vrot.slane %v547_v20, 4  ;;  %v4540_v14 = vld [vmem:[%s4294_s27 + $0x44] sm:$0x1] }
  0x39   : > { %v4530_v33 = vcombine.low %v535_v26, %v545_v35  ;;  %v362_v55 = vrot.slane %v361_v28, 4  ;;  %v552_v60 = vrot.slane %v550_v39, 5  ;;  %v558_v1 = vrot.slane %v556_v40, 5  ;;  %v4545_v26 = vld [vmem:[%s4294_s27 + $0x9c] sm:$0xf] }
  0x3a   : > { %v371_v2 = vor.u32 %v370_v45, %v366_v5  ;;  %v560_v36 = vshrl.u32 %v4506_v61, 16  ;;  %v566_v63 = vshll.u32 %v4518_v34, 16  ;;  %v379_v15 = vshrl.u32 %v4523_v44, 16 }
  0x3b   : > { %6011 = vst [vmem:[#allocation14_spill] sm:$0xff] %v4530_v33  ;;  %3846 = vmatmul.mubr.msk.bf16.gmra.mxu1 %vm692_vm3, %v4530_v33  ;;  %v367_v56 = vsel %vm4339_vm4, %v362_v55, %v366_v5  ;;  %v553_v12 = vor.u32 %v552_v60, %v549_v51  ;;  %v382_v21 = vshll.u32 %v4523_v44, 16  ;;  %v388_v20 = vshll.u32 %v4528_v4, 16 }
  0x3c   : > { %v372_v28 = vrot.slane %v371_v2, 4  ;;  %v562_v39 = vrot.slane %v560_v36, 4  ;;  %v568_v40 = vrot.slane %v566_v63, 5  ;;  %v381_v35 = vrot.slane %v379_v15, 4 }
  0x3d   : > { %v554_v45 = vrot.slane %v553_v12, 4  ;;  %v384_v62 = vrot.slane %v382_v21, 5  ;;  %v390_v33 = vrot.slane %v388_v20, 5  ;;  %v392_v5 = vshrl.u32 %v4528_v4, 16  ;;  %v4560_v21 = vld [vmem:[%s4294_s27 + $0xa4] sm:$0x1] }
  0x3e   : > { %v377_v51 = vsel %vm4339_vm4, %v372_v28, %v376_v47  ;;  %v563_v55 = vor.u32 %v562_v39, %v558_v1  ;;  %v398_v60 = vshll.u32 %v4540_v14, 16  ;;  %v571_v2 = vshrl.u32 %v4545_v26, 16  ;;  %6013 = vst [vmem:[#allocation16_spill] sm:$0xff] %v4560_v21  ;;  %v4563_v20 = vld [vmem:[%s4294_s27 + $0x48] sm:$0xf] }
  0x3f   : > { %v4555_v36 = vcombine.low %v367_v56, %v377_v51  ;;  %v559_v15 = vsel %vm4339_vm4, %v554_v45, %v558_v1  ;;  %v385_v63 = vor.u32 %v384_v62, %v381_v35  ;;  %v394_v12 = vrot.slane %v392_v5, 4 }
  0x40   : > { %v564_v47 = vrot.slane %v563_v55, 4  ;;  %v400_v28 = vrot.slane %v398_v60, 5  ;;  %v573_v39 = vrot.slane %v571_v2, 4  ;;  %v574_v19 = vshll.u32 %v4545_v26, 16  ;;  %v4574_v55 = vld [vmem:[%s4294_s27 + $0x4c] sm:$0xf] }
  0x41   : > { %6012 = vst [vmem:[#allocation15_spill] sm:$0xff] %v4555_v36  ;;  %3833 = vmatprep.mubr.msk.bf16.mxu0 %vm692_vm3, %v4555_v36  ;;  %v386_v56 = vrot.slane %v385_v63, 4  ;;  %v395_v51 = vor.u32 %v394_v12, %v390_v33  ;;  %v580_v1 = vshll.u32 %v4552_v25, 16  ;;  %v584_v62 = vshrl.u32 %v4552_v25, 16  ;;  %v4582_v36 = vld [vmem:[%s4294_s27 + $0x50] sm:$0x1] }
  0x42   : > { %v569_v35 = vsel %vm4339_vm4, %v564_v47, %v568_v40  ;;  %v576_v45 = vrot.slane %v574_v19, 5  ;;  %v590_v5 = vshll.u32 %v4560_v21, 16  ;;  %v403_v60 = vshrl.u32 %v4563_v20, 16  ;;  %v4585_v47 = vld [vmem:[%s4294_s27 + $0xa8] sm:$0xf] }
  0x43   : > { %v4577_v2 = vcombine.low %v559_v15, %v569_v35  ;;  %v391_v63 = vsel %vm4339_vm4, %v386_v56, %v390_v33  ;;  %v396_v12 = vrot.slane %v395_v51, 4  ;;  %v582_v11 = vrot.slane %v580_v1, 5  ;;  %6015 = vst [vmem:[#allocation18_spill] sm:$0xff] %v4585_v47 }
  0x44   : > { %v577_v53 = vor.u32 %v576_v45, %v573_v39  ;;  %v586_v50 = vrot.slane %v584_v62, 4  ;;  %v592_v40 = vrot.slane %v590_v5, 5  ;;  %v405_v19 = vrot.slane %v403_v60, 4  ;;  %v4598_v45 = vld [vmem:[%s4294_s27 + $0xac] sm:$0xf] }
  0x45   : > { %6014 = vst [vmem:[#allocation17_spill] sm:$0xff] %v4577_v2  ;;  %3849 = vmatprep.mubr.msk.bf16.mxu1 %vm692_vm3, %v4577_v2  ;;  %v401_v15 = vsel %vm4339_vm4, %v396_v12, %v400_v28  ;;  %v406_v33 = vshll.u32 %v4563_v20, 16  ;;  %v412_v56 = vshll.u32 %v4574_v55, 16  ;;  %v416_v51 = vshrl.u32 %v4574_v55, 16  ;;  %6017 = vst [vmem:[#allocation20_spill] sm:$0xff] %v4598_v45 }
  0x46   : > { %v4594_v1 = vcombine.low %v391_v63, %v401_v15  ;;  %v578_v39 = vrot.slane %v577_v53, 4  ;;  %v587_v62 = vor.u32 %v586_v50, %v582_v11  ;;  %v422_v35 = vshll.u32 %v4582_v36, 16 }
  0x47   : > { %v408_v5 = vrot.slane %v406_v33, 5  ;;  %v414_v60 = vrot.slane %v412_v56, 5  ;;  %v418_v2 = vrot.slane %v416_v51, 4  ;;  %v595_v28 = vshrl.u32 %v4585_v47, 16  ;;  %v4611_v51 = vld [vmem:[%s4294_s27 + $0x54] sm:$0xf] }
  0x48   : > { %6016 = vst [vmem:[#allocation19_spill] sm:$0xff] %v4594_v1  ;;  %3834 = vmatmul.mubr.msk.bf16.gmra.mxu0 %vm692_vm3, %v4594_v1  ;;  %v583_v53 = vsel %vm4339_vm4, %v578_v39, %v582_v11  ;;  %v588_v50 = vrot.slane %v587_v62, 4  ;;  %v424_v63 = vrot.slane %v422_v35, 5  ;;  %v598_v12 = vshll.u32 %v4585_v47, 16  ;;  %v4618_v62 = vld [vmem:[%s4294_s27 + $0x58] sm:$0xf] }
  0x49   : > { %v409_v15 = vor.u32 %v408_v5, %v405_v19  ;;  %v419_v58 = vor.u32 %v418_v2, %v414_v60  ;;  %v597_v33 = vrot.slane %v595_v28, 4  ;;  %v604_v56 = vshll.u32 %v4598_v45, 16 }
  0x4a   : > { %v593_v1 = vsel %vm4339_vm4, %v588_v50, %v592_v40  ;;  %v600_v37 = vrot.slane %v598_v12, 5  ;;  %v608_v11 = vshrl.u32 %v4598_v45, 16  ;;  %v614_v39 = vshll.u32 %v4601_v38, 16 }
  0x4b   : > { %v4620_v2 = vcombine.low %v583_v53, %v593_v1  ;;  %v410_v19 = vrot.slane %v409_v15, 4  ;;  %v420_v35 = vrot.slane %v419_v58, 4  ;;  %v606_v5 = vrot.slane %v604_v56, 5 }
  0x4c   : > { %v601_v28 = vor.u32 %v600_v37, %v597_v33  ;;  %v610_v0 = vrot.slane %v608_v11, 4  ;;  %v616_v54 = vrot.slane %v614_v39, 5  ;;  %v427_v40 = vshrl.u32 %v4611_v51, 16  ;;  %v4635_v37 = vld [vmem:[%s4294_s27 + $0xb4] sm:$0xf] }
  0x4d   : > { %6019 = vst [vmem:[#allocation22_spill] sm:$0xff] %v4620_v2  ;;  %3850 = vmatmul.mubr.msk.bf16.gmra.mxu1 %vm692_vm3, %v4620_v2  ;;  %v415_v50 = vsel %vm4339_vm4, %v410_v19, %v414_v60  ;;  %v425_v1 = vsel %vm4339_vm4, %v420_v35, %v424_v63  ;;  %v430_v58 = vshll.u32 %v4611_v51, 16  ;;  %v436_v53 = vshll.u32 %v4618_v62, 16  ;;  %6020 = vst [vmem:[#allocation23_spill] sm:$0xff] %v4635_v37  ;;  %v4640_v11 = vld [vmem:[%s4294_s27 + $0xb8] sm:$0xf] }
  0x4e   : > { %v4637_v12 = vcombine.low %v415_v50, %v425_v1  ;;  %v602_v15 = vrot.slane %v601_v28, 4  ;;  %v611_v33 = vor.u32 %v610_v0, %v606_v5  ;;  %v429_v56 = vrot.slane %v427_v40, 4 }
  0x4f   : > { %v432_v39 = vrot.slane %v430_v58, 5  ;;  %v438_v2 = vrot.slane %v436_v53, 5  ;;  %v440_v60 = vshrl.u32 %v4618_v62, 16  ;;  %v446_v63 = vshll.u32 %v4623_v48, 16  ;;  %v4651_v58 = vld [vmem:[%s4294_s27 + $0xbc] sm:$0x1] }
  0x50   : > { %6021 = vst [vmem:[#allocation24_spill] sm:$0xff] %v4637_v12  ;;  %3837 = vmatprep.mubr.msk.bf16.mxu0 %vm692_vm3, %v4637_v12  ;;  %v607_v19 = vsel %vm4339_vm4, %v602_v15, %v606_v5  ;;  %v612_v35 = vrot.slane %v611_v33, 4  ;;  %v619_v28 = vshrl.u32 %v4635_v37, 16  ;;  %v622_v0 = vshll.u32 %v4635_v37, 16 }
  0x51   : > { %v433_v40 = vor.u32 %v432_v39, %v429_v56  ;;  %v442_v50 = vrot.slane %v440_v60, 4  ;;  %v448_v1 = vrot.slane %v446_v63, 5  ;;  %v628_v53 = vshll.u32 %v4640_v11, 16 }
  0x52   : > { %v617_v38 = vsel %vm4339_vm4, %v612_v35, %v616_v54  ;;  %v621_v47 = vrot.slane %v619_v28, 4  ;;  %v624_v12 = vrot.slane %v622_v0, 5  ;;  %v632_v45 = vshrl.u32 %v4640_v11, 16 }
  0x53   : > { %v4657_v5 = vcombine.low %v607_v19, %v617_v38  ;;  %v434_v15 = vrot.slane %v433_v40, 4  ;;  %v443_v33 = vor.u32 %v442_v50, %v438_v2  ;;  %v630_v21 = vrot.slane %v628_v53, 5 }
  0x54   : > { %v625_v37 = vor.u32 %v624_v12, %v621_v47  ;;  %v634_v56 = vrot.slane %v632_v45, 4  ;;  %v638_v39 = vshll.u32 %v4651_v58, 16  ;;  %v3443_v54 = vrot.slane %v4303_v6, 9 }
  0x55   : > { %3853 = vmatprep.mubr.msk.bf16.mxu1 %vm692_vm3, %v4657_v5  ;;  %v439_v38 = vsel %vm4339_vm4, %v434_v15, %v438_v2  ;;  %v444_v63 = vrot.slane %v443_v33, 4  ;;  %v1219_v47 = vrot.slane %v4306_v7, 5  ;;  %v4674_v45 = vcombine.low %v4332_v30, %v4335_v31 }
  0x56   : > { %v626_v12 = vrot.slane %v625_v37, 4  ;;  %v635_v19 = vor.u32 %v634_v56, %v630_v21  ;;  %v640_v35 = vrot.slane %v638_v39, 5  ;;  %v3444_v28 = vrot.slane %v4332_v30, 9 }
  0x57   : > { %v449_v0 = vsel %vm4339_vm4, %v444_v63, %v448_v1  ;;  %v1220_v40 = vsel %vm4662_vm7, %v3443_v54, %v1219_v47  ;;  %v1221_v50 = vrot.slane %v1219_v47, 4  ;;  %v6024_v2 = vrot.slane %v4335_v31, 5 }
  0x58   : > { %v4683_v15 = vcombine.low %v439_v38, %v449_v0  ;;  %v631_v33 = vsel %vm4339_vm4, %v626_v12, %v630_v21  ;;  %v636_v37 = vrot.slane %v635_v19, 4  ;;  %v6026_v1 = vrot.slane %v4309_v8, 5 }
  0x59   : > { %v1228_v53 = vrot.slane %v6024_v2, 4  ;;  %v6025_v56 = vmov %v6024_v2  ;;  %v6027_v54 = vrot.slane %v4346_v42, 5  ;;  %v4701_v63 = vcombine.low %v4375_v10, %v4384_v23 }
  0x5a   : > { %v1227_v30 = vsel %vm4662_vm7, %v3444_v28, %v6025_v56  ;;  %v1223_v39 = vsel %vm4662_vm7, %v1221_v50, %v6026_v1  ;;  %v3445_v21 = vrot.slane %v4375_v10, 9  ;;  %3838 = vmatmul.mubr.msk.bf16.gmra.mxu0 %vm692_vm3, %v4683_v15  ;;  %v641_v8 = vsel %vm4339_vm4, %v636_v37, %v640_v35 }
  0x5b   : > { %v1230_v38 = vsel %vm4662_vm7, %v1228_v53, %v6027_v54  ;;  %v3460_v31 = vcombine.low %v1220_v40, %v1223_v39  ;;  %v1233_v42 = vrot.slane %v4384_v23, 5  ;;  %v4711_v12 = vcombine.low %v631_v33, %v641_v8 }
  0x5c   : > { %v4708_v47 = vcombine.low %v1227_v30, %v1230_v38  ;;  %v1236_v19 = vrot.slane %v4391_v27, 5  ;;  %v1240_v0 = vrot.slane %v4433_v18, 5  ;;  %v3446_v35 = vrot.slane %v4425_v3, 9 }
  0x5d   : > { %6028 = vst [vmem:[#allocation25_spill] sm:$0xff] %v4711_v12  ;;  %3893 = vmatprep.mubr.msk.bf16.mxu0 %vm692_vm3, %v3460_v31  ;;  %v1234_v10 = vsel %vm4662_vm7, %v3445_v21, %v1233_v42  ;;  %v1235_v28 = vrot.slane %v1233_v42, 4  ;;  %3854 = vmatmul.mubr.msk.bf16.gmra.mxu1 %vm692_vm3, %v4711_v12  ;;  %v3447_v40 = vrot.slane %v4480_v9, 9  ;;  %v1247_v23 = vrot.slane %v4485_v22, 5 }
  0x5e   : > { %v6029_v27 = vcombine.low %v4303_v6, %v4306_v7  ;;  %v1242_v2 = vrot.slane %v1240_v0, 4  ;;  %v1243_v53 = vrot.slane %v4446_v29, 5  ;;  %v1250_v33 = vrot.slane %v4496_v46, 5  ;;  %v4746_v46 = vld [vmem:[%s5950_s1 + $0x18] sm:$0xf] }
  0x5f   : > { %v1237_v50 = vsel %vm4662_vm7, %v1235_v28, %v1236_v19  ;;  %v1249_v56 = vrot.slane %v1247_v23, 4  ;;  %v1862_v30 = vsel %vm741_vm0, %v4406_v43, 0  ;;  %v1254_v1 = vrot.slane %v4528_v4, 5  ;;  %v4763_v19 = vld [vmem:[%s5950_s1 + $0x14] sm:$0xf] }
  0x60   : > { %3859 = vmatprep.mubr.msk.bf16.mxu1 %vm692_vm3, %v6029_v27  ;;  %v4731_v37 = vcombine.low %v1234_v10, %v1237_v50  ;;  %v1634_v6 = vsel %vm741_vm0, %v4441_v24, 0  ;;  %v1241_v7 = vsel %vm4662_vm7, %v3446_v35, %v1240_v0  ;;  %v1248_v39 = vsel %vm4662_vm7, %v3447_v40, %v1247_v23 }
  0x61   : > { %v1261_v29 = vrot.slane %v4574_v55, 5  ;;  %v1244_v43 = vsel %vm4662_vm7, %v1242_v2, %v1243_v53  ;;  %v1251_v24 = vsel %vm4662_vm7, %v1249_v56, %v1250_v33  ;;  %v3448_v54 = vrot.slane %v4523_v44, 9 }
  0x62   : > { %3894 = vmatmul.mubr.msk.bf16.vlgmr.msra.gmra.mxu0 %vm692_vm3, %v4708_v47  ;;  %v1257_v38 = vrot.slane %v4540_v14, 5  ;;  %v1256_v21 = vrot.slane %v1254_v1, 4  ;;  %v3449_v8 = vrot.slane %v4563_v20, 9  ;;  %v1264_v42 = vrot.slane %v4582_v36, 5 }
  0x63   : > { %3960 = vmatpush3.bf16.msra.mxu0 %v1862_v30  ;;  %3897 = vmatprep.mubr.msk.bf16.mxu0 %vm692_vm3, %v4731_v37  ;;  %v1263_v31 = vrot.slane %v1261_v29, 4  ;;  %v4771_v14 = vcombine.low %v1241_v7, %v1244_v43  ;;  %v4773_v10 = vcombine.low %v1248_v39, %v1251_v24  ;;  %v1255_v36 = vsel %vm4662_vm7, %v3448_v54, %v1254_v1 }
  0x64   : > { %4138 = vmatprep.subr.msk.bf16.mxu0 %vm741_vm0, %v4746_v46  ;;  %v1258_v28 = vsel %vm4662_vm7, %v1256_v21, %v1257_v38  ;;  %v1262_v0 = vsel %vm4662_vm7, %v3449_v8, %v1261_v29  ;;  %v1268_v40 = vrot.slane %v4618_v62, 5  ;;  %v1278_v23 = vrot.slane %v4324_v17, 5  ;;  %v6030_v8 = vld [vmem:[#allocation16_spill] sm:$0xff] }
  0x65   : > { %3860 = vmatmul.mubr.msk.bf16.vlgmr.msra.gmra.mxu1 %vm692_vm3, %v4674_v45  ;;  %v1265_v35 = vsel %vm4662_vm7, %v1263_v31, %v1264_v42  ;;  %v3450_v27 = vrot.slane %v4611_v51, 9  ;;  %v3451_v50 = vrot.slane %v4316_v13, 9  ;;  %v1275_v2 = vrot.slane %v4321_v16, 5  ;;  %v6031_v42 = vld [vmem:[#allocation20_spill] sm:$0xff] }
  0x66   : > { %3926 = vmatpush3.bf16.msra.mxu1 %v1634_v6  ;;  %3863 = vmatprep.mubr.msk.bf16.mxu1 %vm692_vm3, %v4701_v63  ;;  %v4792_v53 = vcombine.low %v4425_v3, %v4433_v18  ;;  %v4796_v33 = vcombine.low %v4480_v9, %v4485_v22  ;;  %v4800_v56 = vcombine.low %v4523_v44, %v4528_v4  ;;  %v1271_v3 = vrot.slane %v4623_v48, 5 }
  0x67   : > { %4137 = vmatprep.subr.msk.bf16.mxu1 %vm741_vm0, %v4763_v19  ;;  %v4804_v17 = vcombine.low %v4563_v20, %v4574_v55  ;;  %v4808_v30 = vcombine.low %v1255_v36, %v1258_v28  ;;  %v4810_v1 = vcombine.low %v1262_v0, %v1265_v35  ;;  %v4815_v18 = vcombine.low %v4454_v41, %v4461_v49  ;;  %v6032_v36 = vld [vmem:[#allocation18_spill] sm:$0xff] }
  0x68   : > { %v1270_v9 = vrot.slane %v1268_v40, 4  ;;  %v3454_v22 = vrot.slane %v4454_v41, 9  ;;  %v1296_v44 = vrot.slane %v4461_v49, 5  ;;  %v1299_v4 = vrot.slane %v4471_v57, 5 }
  0x69   : > { %v1269_v20 = vsel %vm4662_vm7, %v3450_v27, %v1268_v40  ;;  %v1276_v48 = vsel %vm4662_vm7, %v3451_v50, %v1275_v2  ;;  %v1277_v55 = vrot.slane %v1275_v2, 4  ;;  %v4828_v6 = vcombine.low %v4501_v52, %v4506_v61  ;;  %v6033_v40 = vld [vmem:[#allocation21_spill] sm:$0xff] }
  0x6a   : > { %3898 = vmatmul.mubr.msk.bf16.gmra.mxu0 %vm692_vm3, %v4771_v14  ;;  %v1297_v41 = vsel %vm4662_vm7, %v3454_v22, %v1296_v44  ;;  %v1298_v49 = vrot.slane %v1296_v44, 4  ;;  %v3455_v57 = vrot.slane %v4501_v52, 9  ;;  %v1303_v7 = vrot.slane %v4506_v61, 5 }
  0x6b   : > { %3901 = vmatprep.mubr.msk.bf16.mxu0 %vm692_vm3, %v4773_v10  ;;  %v1282_v39 = vrot.slane %v4361_v59, 5  ;;  %v1306_v29 = vrot.slane %v4518_v34, 5  ;;  %v4842_v43 = vcombine.low %v4545_v26, %v4552_v25  ;;  %v3456_v24 = vrot.slane %v4545_v26, 9 }
  0x6c   : > { %v1272_v54 = vsel %vm4662_vm7, %v1270_v9, %v1271_v3  ;;  %v1300_v52 = vsel %vm4662_vm7, %v1298_v49, %v1299_v4  ;;  %v1304_v61 = vsel %vm4662_vm7, %v3455_v57, %v1303_v7  ;;  %v1305_v38 = vrot.slane %v1303_v7, 4  ;;  %v6034_v3 = vld [vmem:[#allocation23_spill] sm:$0xff]  ;;  %v6035_v57 = vld [vmem:[#allocation8_spill] sm:$0xff] }
  0x6d   : > { %3864 = vmatmul.mubr.msk.bf16.gmra.mxu1 %vm692_vm3, %v4792_v53  ;;  %v4851_v21 = vcombine.low %v1297_v41, %v1300_v52  ;;  %v1310_v34 = vrot.slane %v4552_v25, 5  ;;  %v1313_v31 = vrot.slane %v6030_v8, 5  ;;  %v4857_v28 = vcombine.low %v6032_v36, %v6031_v42 }
  0x6e   : > { %3867 = vmatprep.mubr.msk.bf16.mxu1 %vm692_vm3, %v4796_v33  ;;  %v1307_v26 = vsel %vm4662_vm7, %v1305_v38, %v1306_v29  ;;  %v3457_v0 = vrot.slane %v6032_v36, 9  ;;  %v1317_v35 = vrot.slane %v6031_v42, 5  ;;  %v1320_v27 = vrot.slane %v6033_v40, 5  ;;  %v6037_v42 = vld [vmem:[#allocation4_spill] sm:$0xff] }
  0x6f   : > { %v4866_v50 = vcombine.low %v1304_v61, %v1307_v26  ;;  %v1311_v25 = vsel %vm4662_vm7, %v3456_v24, %v1310_v34  ;;  %v1312_v2 = vrot.slane %v1310_v34, 4  ;;  %v4872_v9 = vcombine.low %v6034_v3, %v4640_v11 }
  0x70   : > { %v1318_v22 = vsel %vm4662_vm7, %v3457_v0, %v1317_v35  ;;  %v1319_v44 = vrot.slane %v1317_v35, 4  ;;  %v3458_v4 = vrot.slane %v6034_v3, 9  ;;  %v1324_v41 = vrot.slane %v4640_v11, 5  ;;  %v6038_v0 = vld [vmem:[#allocation6_spill] sm:$0xff] }
  0x71   : > { %v1279_v49 = vsel %vm4662_vm7, %v1277_v55, %v1278_v23  ;;  %v1289_v7 = vrot.slane %v6035_v57, 5  ;;  %v1314_v29 = vsel %vm4662_vm7, %v1312_v2, %v1313_v31  ;;  %v1327_v24 = vrot.slane %v4651_v58, 5  ;;  %v6036_v55 = vld [vmem:[#allocation3_spill] sm:$0xff] }
  0x72   : > { %3902 = vmatmul.mubr.msk.bf16.gmra.mxu0 %vm692_vm3, %v4808_v30  ;;  %v4888_v52 = vcombine.low %v1311_v25, %v1314_v29  ;;  %v1321_v61 = vsel %vm4662_vm7, %v1319_v44, %v1320_v27  ;;  %v1325_v11 = vsel %vm4662_vm7, %v3458_v4, %v1324_v41  ;;  %v1326_v38 = vrot.slane %v1324_v41, 4  ;;  %v6039_v27 = vld [vmem:[#allocation9_spill] sm:$0xff]  ;;  %v4975_v4 = vld [vmem:[%s4294_s27 + $0xc0] sm:$0xf]  ;;  %v250_v41 = vld [vmem:[%s4294_s27 + $0xc8] sm:$0x1] }
  0x73   : > { %3905 = vmatprep.mubr.msk.bf16.mxu0 %vm692_vm3, %v4810_v1  ;;  %v4896_v23 = vcombine.low %v1269_v20, %v1272_v54  ;;  %v3452_v34 = vrot.slane %v6036_v55, 9  ;;  %v4899_v58 = vcombine.low %v1318_v22, %v1321_v61  ;;  %v4901_v8 = vcombine.low %v1276_v48, %v1279_v49  ;;  %v6040_v61 = vld [vmem:[#allocation7_spill] sm:$0xff] }
  0x74   : > { %v1284_v31 = vrot.slane %v1282_v39, 4  ;;  %v1285_v36 = vrot.slane %v6037_v42, 5  ;;  %v1328_v26 = vsel %vm4662_vm7, %v1326_v38, %v1327_v24  ;;  %v3453_v35 = vrot.slane %v6038_v0, 9  ;;  %v6042_v42 = vld [vmem:[#allocation13_spill] sm:$0xff] }
  0x75   : > { %3868 = vmatmul.mubr.msk.bf16.gmra.mxu1 %vm692_vm3, %v4800_v56  ;;  %v1291_v40 = vrot.slane %v1289_v7, 4  ;;  %v1292_v25 = vrot.slane %v6039_v27, 5  ;;  %v4908_v2 = vcombine.low %v1325_v11, %v1328_v26  ;;  %v4912_v20 = vcombine.low %v4611_v51, %v4618_v62  ;;  %v6046_v26 = vld [vmem:[#allocation5_spill] sm:$0xff] }
  0x76   : > { %3871 = vmatprep.mubr.msk.bf16.mxu1 %vm692_vm3, %v4804_v17  ;;  %v4918_v48 = vcombine.low %v4316_v13, %v4321_v16  ;;  %v1283_v54 = vsel %vm4662_vm7, %v3452_v34, %v1282_v39  ;;  %v1286_v3 = vsel %vm4662_vm7, %v1284_v31, %v1285_v36  ;;  %v1290_v51 = vsel %vm4662_vm7, %v3453_v35, %v1289_v7  ;;  %v6041_v34 = vld [vmem:[#allocation11_spill] sm:$0xff]  ;;  %v6045_v36 = vld [vmem:[#allocation24_spill] sm:$0xff] }
  0x77   : > { %v1293_v62 = vsel %vm4662_vm7, %v1291_v40, %v1292_v25  ;;  %v4934_v13 = vcombine.low %v1283_v54, %v1286_v3  ;;  %v4940_v39 = vcombine.low %v6036_v55, %v4361_v59  ;;  %v4946_v22 = vcombine.low %v6038_v0, %v6035_v57  ;;  %v4969_v59 = vld [vmem:[%s4294_s27 + $0xc4] sm:$0xf]  ;;  %v3584_v55 = vld [vmem:[%s5950_s1 + $0x20] sm:$0xf]  ;;  %v6048_v35 = vld [vmem:[#allocation12_spill] sm:$0xff] }
  0x78   : > { %v4936_v16 = vcombine.low %v1290_v51, %v1293_v62  ;;  %v2060_v44 = vrot.slane %v4969_v59, 5  ;;  %v3528_v49 = vrot.slane %v4975_v4, 9  ;;  %v2063_v7 = vrot.slane %v250_v41, 5  ;;  %v6047_v0 = vld [vmem:[#allocation10_spill] sm:$0xff] }
  0x79   : > { %v2280_v38 = vsel %vm741_vm0, %v4746_v46, 0  ;;  %v2074_v31 = vsel %vm741_vm0, %v4763_v19, 0  ;;  %v6043_v46 = vld [vmem:[#allocation15_spill] sm:$0xff]  ;;  %v6049_v40 = vld [vmem:[#allocation14_spill] sm:$0xff]  ;;  %v1830_v27 = vshrl.u32 %v4975_v4, 16  ;;  %v1833_v25 = vshll.u32 %v4975_v4, 16 }
  0x7a   : > { %3906 = vmatmul.mubr.msk.bf16.gmra.mxu0 %vm692_vm3, %v4896_v23  ;;  %v2062_v57 = vrot.slane %v2060_v44, 4  ;;  %v2061_v29 = vsel %vm4662_vm7, %v3528_v49, %v2060_v44  ;;  %v6044_v19 = vld [vmem:[#allocation19_spill] sm:$0xff]  ;;  %v1843_v54 = vshrl.u32 %v4969_v59, 16  ;;  %v1839_v3 = vshll.u32 %v4969_v59, 16 }
  0x7b   : > { %3909 = vmatprep.mubr.msk.bf16.mxu0 %vm692_vm3, %v4901_v8  ;;  %v1832_v51 = vrot.slane %v1830_v27, 4  ;;  %v1835_v62 = vrot.slane %v1833_v25, 5 }
  0x7c   : > { %v2064_v24 = vsel %vm4662_vm7, %v2062_v57, %v2063_v7  ;;  %v1841_v44 = vrot.slane %v1839_v3, 5  ;;  %v1845_v49 = vrot.slane %v1843_v54, 4  ;;  %v6050_v57 = vld [vmem:[#allocation17_spill] sm:$0xff]  ;;  %v6051_v7 = vld [vmem:[#allocation22_spill] sm:$0xff]  ;;  %v3493_v3 = vcombine.low %v4975_v4, %v4969_v59 }
  0x7d   : > { %3872 = vmatmul.mubr.msk.bf16.gmra.mxu1 %vm692_vm3, %v4912_v20  ;;  %v4987_v11 = vcombine.low %v2061_v29, %v2064_v24  ;;  %v1836_v29 = vor.u32 %v1835_v62, %v1832_v51  ;;  %v2720_v51 = vsel %vm741_vm0, %v3584_v55, 0 }
  0x7e   : > { %3875 = vmatprep.mubr.msk.bf16.mxu1 %vm692_vm3, %v4918_v48  ;;  %v1846_v24 = vor.u32 %v1845_v49, %v1841_v44 }
  0x82   : > { %3910 = vmatmul.mubr.msk.bf16.gmra.mxu0 %vm692_vm3, %v4934_v13 }
  0x83   : > { %3913 = vmatprep.mubr.msk.bf16.mxu0 %vm692_vm3, %v4936_v16 }
  0x85   : > { %3876 = vmatmul.mubr.msk.bf16.gmra.mxu1 %vm692_vm3, %v4940_v39 }
  0x86   : > { %3879 = vmatprep.mubr.msk.bf16.mxu1 %vm692_vm3, %v4946_v22 }
  0x8a   : > { %3914 = vmatmul.mubr.msk.bf16.gmra.mxu0 %vm692_vm3, %v4851_v21 }
  0x8b   : > { %3917 = vmatprep.mubr.msk.bf16.mxu0 %vm692_vm3, %v4866_v50 }
  0x8d   : > { %3880 = vmatmul.mubr.msk.bf16.gmra.mxu1 %vm692_vm3, %v4815_v18 }
  0x8e   : > { %3883 = vmatprep.mubr.msk.bf16.mxu1 %vm692_vm3, %v4828_v6 }
  0x92   : > { %3918 = vmatmul.mubr.msk.bf16.gmra.mxu0 %vm692_vm3, %v4888_v52 }
  0x93   : > { %3921 = vmatprep.mubr.msk.bf16.mxu0 %vm692_vm3, %v4899_v58 }
  0x95   : > { %3884 = vmatmul.mubr.msk.bf16.gmra.mxu1 %vm692_vm3, %v4842_v43 }
  0x96   : > { %3887 = vmatprep.mubr.msk.bf16.mxu1 %vm692_vm3, %v4857_v28 }
  0x9a   : > { %3922 = vmatmul.mubr.msk.bf16.gmra.mxu0 %vm692_vm3, %v4908_v2 }
  0x9b   : > { %3961 = vmatprep.mubr.msk.bf16.mxu0 %vm692_vm3, %v6040_v61  ;;  %v1849_v61 = vshll.u32 %v250_v41, 16 }
  0x9d   : > { %3888 = vmatmul.mubr.msk.bf16.gmra.mxu1 %vm692_vm3, %v4872_v9  ;;  %v1851_v27 = vrot.slane %v1849_v61, 5  ;;  %v5179_v61 = vld [vmem:[%s4294_s27 + $0xd0] sm:$0xf] }
  0x9e   : > { %3927 = vmatprep.mubr.msk.bf16.mxu1 %vm692_vm3, %v4674_v45  ;;  %v3565_v45 = vld [vmem:[%s5950_s1 + $0x1c] sm:$0xf] }
  0x9f   : > { %v2508_v62 = vsel %vm741_vm0, %v3565_v45, 0 }
  0xa2   : > { %3962 = vmatmul.mubr.msk.bf16.vlgmr.msra.gmra.mxu0 %vm692_vm3, %v6041_v34 }
  0xa3   : > { %4028 = vmatpush3.bf16.msra.mxu0 %v2280_v38  ;;  %3965 = vmatprep.mubr.msk.bf16.mxu0 %vm692_vm3, %v6042_v42  ;;  %v1837_v38 = vrot.slane %v1836_v29, 4 }
  0xa4   : > { %4140 = vmatprep.subr.msk.bf16.mxu0 %vm741_vm0, %v3584_v55 }
  0xa5   : > { %3928 = vmatmul.mubr.msk.bf16.vlgmr.msra.gmra.mxu1 %vm692_vm3, %v4701_v63  ;;  %v1842_v25 = vsel %vm4339_vm4, %v1837_v38, %v1841_v44 }
  0xa6   : > { %3994 = vmatpush3.bf16.msra.mxu1 %v2074_v31  ;;  %3931 = vmatprep.mubr.msk.bf16.mxu1 %vm692_vm3, %v4792_v53  ;;  %v1847_v31 = vrot.slane %v1846_v24, 4 }
  0xa7   : > { %4139 = vmatprep.subr.msk.bf16.mxu1 %vm741_vm0, %v3565_v45 }
  0xa8   : > { %v1852_v41 = vsel %vm4339_vm4, %v1847_v31, %v1851_v27 }
  0xa9   : > { %v5069_v54 = vcombine.low %v1842_v25, %v1852_v41 }
  0xaa   : > { %3966 = vmatmul.mubr.msk.bf16.gmra.mxu0 %vm692_vm3, %v6043_v46 }
  0xab   : > { %3969 = vmatprep.mubr.msk.bf16.mxu0 %vm692_vm3, %v6044_v19  ;;  %6052 = vst [vmem:[#allocation16_spill] sm:$0xff] %v5069_v54 }
  0xad   : > { %3932 = vmatmul.mubr.msk.bf16.gmra.mxu1 %vm692_vm3, %v4796_v33 }
  0xae   : > { %3935 = vmatprep.mubr.msk.bf16.mxu1 %vm692_vm3, %v4800_v56 }
  0xb2   : > { %3970 = vmatmul.mubr.msk.bf16.gmra.mxu0 %vm692_vm3, %v6045_v36 }
  0xb3   : > { %3973 = vmatprep.mubr.msk.bf16.mxu0 %vm692_vm3, %v4683_v15 }
  0xb5   : > { %3936 = vmatmul.mubr.msk.bf16.gmra.mxu1 %vm692_vm3, %v4804_v17 }
  0xb6   : > { %3939 = vmatprep.mubr.msk.bf16.mxu1 %vm692_vm3, %v4912_v20 }
  0xba   : > { %3974 = vmatmul.mubr.msk.bf16.gmra.mxu0 %vm692_vm3, %v6046_v26 }
  0xbb   : > { %3977 = vmatprep.mubr.msk.bf16.mxu0 %vm692_vm3, %v6047_v0 }
  0xbd   : > { %3940 = vmatmul.mubr.msk.bf16.gmra.mxu1 %vm692_vm3, %v4918_v48 }
  0xbe   : > { %3943 = vmatprep.mubr.msk.bf16.mxu1 %vm692_vm3, %v4940_v39 }
  0xc2   : > { %3978 = vmatmul.mubr.msk.bf16.gmra.mxu0 %vm692_vm3, %v6048_v35 }
  0xc3   : > { %3981 = vmatprep.mubr.msk.bf16.mxu0 %vm692_vm3, %v6049_v40 }
  0xc5   : > { %3944 = vmatmul.mubr.msk.bf16.gmra.mxu1 %vm692_vm3, %v4946_v22 }
  0xc6   : > { %3947 = vmatprep.mubr.msk.bf16.mxu1 %vm692_vm3, %v4815_v18 }
  0xca   : > { %3982 = vmatmul.mubr.msk.bf16.gmra.mxu0 %vm692_vm3, %v6050_v57 }
  0xcb   : > { %3985 = vmatprep.mubr.msk.bf16.mxu0 %vm692_vm3, %v6051_v7 }
  0xcd   : > { %3948 = vmatmul.mubr.msk.bf16.gmra.mxu1 %vm692_vm3, %v4828_v6 }
  0xce   : > { %3951 = vmatprep.mubr.msk.bf16.mxu1 %vm692_vm3, %v4842_v43 }
  0xd2   : > { %3986 = vmatmul.mubr.msk.bf16.gmra.mxu0 %vm692_vm3, %v4657_v5 }
  0xd3   : > { %3989 = vmatprep.mubr.msk.bf16.mxu0 %vm692_vm3, %v4711_v12 }
  0xd5   : > { %3952 = vmatmul.mubr.msk.bf16.gmra.mxu1 %vm692_vm3, %v4857_v28 }
  0xd6   : > { %3955 = vmatprep.mubr.msk.bf16.mxu1 %vm692_vm3, %v4872_v9 }
  0xda   : > { %3990 = vmatmul.mubr.msk.bf16.gmra.mxu0 %vm692_vm3, %v5069_v54 }
  0xdb   : > { %4029 = vmatprep.mubr.msk.bf16.mxu0 %vm692_vm3, %v4701_v63 }
  0xdd   : > { %3956 = vmatmul.mubr.msk.bf16.gmra.mxu1 %vm692_vm3, %v3493_v3 }
  0xde   : > { %3995 = vmatprep.mubr.msk.bf16.mxu1 %vm692_vm3, %v4708_v47 }
  0xe2   : > { %4030 = vmatmul.mubr.msk.bf16.vlgmr.msra.gmra.mxu0 %vm692_vm3, %v4792_v53 }
  0xe3   : > { %4096 = vmatpush3.bf16.msra.mxu0 %v2720_v51  ;;  %4033 = vmatprep.mubr.msk.bf16.mxu0 %vm692_vm3, %v4796_v33 }
  0xe5   : > { %3996 = vmatmul.mubr.msk.bf16.vlgmr.msra.gmra.mxu1 %vm692_vm3, %v4731_v37 }
  0xe6   : > { %4062 = vmatpush3.bf16.msra.mxu1 %v2508_v62  ;;  %3999 = vmatprep.mubr.msk.bf16.mxu1 %vm692_vm3, %v4771_v14  ;;  %v5092_v63 = vpop.f32.mrf.mxu0 }
  0xe8   : > { %v5102_v53 = vpop.f32.mrf.mxu0 }
  0xea   : > { %4034 = vmatmul.mubr.msk.bf16.gmra.mxu0 %vm692_vm3, %v4800_v56  ;;  %v5108_v56 = vpop.f32.mrf.mxu0 }
  0xeb   : > { %4037 = vmatprep.mubr.msk.bf16.mxu0 %vm692_vm3, %v4804_v17  ;;  %v5098_v47 = vpop.f32.mrf.mxu1 }
  0xec   : > { %v5118_v59 = vpop.f32.mrf.mxu0 }
  0xed   : > { %4000 = vmatmul.mubr.msk.bf16.gmra.mxu1 %vm692_vm3, %v4773_v10  ;;  %v5104_v33 = vpop.f32.mrf.mxu1 }
  0xee   : > { %4003 = vmatprep.mubr.msk.bf16.mxu1 %vm692_vm3, %v4808_v30 }
  0xef   : > { %v5114_v17 = vpop.f32.mrf.mxu1 }
  0xf1   : > { %v5120_v4 = vpop.f32.mrf.mxu1 }
  0xf2   : > { %4038 = vmatmul.mubr.msk.bf16.gmra.mxu0 %vm692_vm3, %v4912_v20 }
  0xf3   : > { %4041 = vmatprep.mubr.msk.bf16.mxu0 %vm692_vm3, %v4918_v48 }
  0xf5   : > { %4004 = vmatmul.mubr.msk.bf16.gmra.mxu1 %vm692_vm3, %v4810_v1 }
  0xf6   : > { %4007 = vmatprep.mubr.msk.bf16.mxu1 %vm692_vm3, %v4896_v23 }
  0xf7   : > { %v5124_v20 = vpop.f32.mrf.mxu0 }
  0xf9   : > { %v5134_v55 = vpop.f32.mrf.mxu0 }
  0xfa   : > { %4042 = vmatmul.mubr.msk.bf16.gmra.mxu0 %vm692_vm3, %v4940_v39 }
  0xfb   : > { %4045 = vmatprep.mubr.msk.bf16.mxu0 %vm692_vm3, %v4946_v22  ;;  %v5130_v48 = vpop.f32.mrf.mxu1  ;;  %v5140_v39 = vpop.f32.mrf.mxu0 }
  0xfd   : > { %4008 = vmatmul.mubr.msk.bf16.gmra.mxu1 %vm692_vm3, %v4901_v8  ;;  %v5136_v45 = vpop.f32.mrf.mxu1  ;;  %v5150_v44 = vpop.f32.mrf.mxu0 }
  0xfe   : > { %4011 = vmatprep.mubr.msk.bf16.mxu1 %vm692_vm3, %v4934_v13 }
  0xff   : > { %v5146_v22 = vpop.f32.mrf.mxu1 }
 0x101   : > { %v5152_v49 = vpop.f32.mrf.mxu1 }
 0x102   : > { %4046 = vmatmul.mubr.msk.bf16.gmra.mxu0 %vm692_vm3, %v4815_v18 }
 0x103   : > { %4049 = vmatprep.mubr.msk.bf16.mxu0 %vm692_vm3, %v4828_v6 }
 0x105   : > { %4012 = vmatmul.mubr.msk.bf16.gmra.mxu1 %vm692_vm3, %v4936_v16 }
 0x106   : > { %4015 = vmatprep.mubr.msk.bf16.mxu1 %vm692_vm3, %v4851_v21 }
 0x108   : > { %v5156_v18 = vpop.f32.mrf.mxu0 }
 0x10a   : > { %4050 = vmatmul.mubr.msk.bf16.gmra.mxu0 %vm692_vm3, %v4842_v43  ;;  %v5166_v29 = vpop.f32.mrf.mxu0 }
 0x10b   : > { %4053 = vmatprep.mubr.msk.bf16.mxu0 %vm692_vm3, %v4857_v28  ;;  %v5176_v28 = vld [vmem:[%s4294_s27 + $0xcc] sm:$0xf] }
 0x10c   : > { %v5172_v43 = vpop.f32.mrf.mxu0 }
 0x10d   : > { %4016 = vmatmul.mubr.msk.bf16.gmra.mxu1 %vm692_vm3, %v4866_v50  ;;  %v5162_v6 = vpop.f32.mrf.mxu1 }
 0x10e   : > { %6053 = vst [vmem:[#allocation20_spill] sm:$0xff] %v5162_v6  ;;  %4019 = vmatprep.mubr.msk.bf16.mxu1 %vm692_vm3, %v4888_v52  ;;  %v5185_v31 = vpop.f32.mrf.mxu0 }
 0x10f   : > { %v5168_v24 = vpop.f32.mrf.mxu1 }
 0x110   : > { %6054 = vst [vmem:[#allocation18_spill] sm:$0xff] %v5168_v24 }
 0x111   : > { %v5183_v38 = vpop.f32.mrf.mxu1 }
 0x112   : > { %4054 = vmatmul.mubr.msk.bf16.gmra.mxu0 %vm692_vm3, %v4872_v9  ;;  %6055 = vst [vmem:[#allocation21_spill] sm:$0xff] %v5183_v38  ;;  %v3548_v9 = vcombine.low %v5176_v28, %v5179_v61 }
 0x113   : > { %4057 = vmatprep.mubr.msk.bf16.mxu0 %vm692_vm3, %v3493_v3  ;;  %v5191_v27 = vpop.f32.mrf.mxu1 }
 0x114   : > { %6056 = vst [vmem:[#allocation23_spill] sm:$0xff] %v5191_v27 }
 0x115   : > { %4020 = vmatmul.mubr.msk.bf16.gmra.mxu1 %vm692_vm3, %v4899_v58 }
 0x116   : > { %4023 = vmatprep.mubr.msk.bf16.mxu1 %vm692_vm3, %v4908_v2 }
 0x11a   : > { %v5193_v25 = vpop.f32.mrf.mxu0  ;;  %4058 = vmatmul.mubr.msk.bf16.gmra.mxu0 %vm692_vm3, %v3548_v9 }
 0x11b   : > { %4097 = vmatprep.mubr.msk.bf16.mxu0 %vm692_vm3, %v4731_v37 }
 0x11c   : > { %v5198_v41 = vpop.f32.mrf.mxu0 }
 0x11d   : > { %v5200_v3 = vpop.f32.mrf.mxu1  ;;  %4024 = vmatmul.mubr.msk.bf16.gmra.mxu1 %vm692_vm3, %v4987_v11 }
 0x11e   : > { %6057 = vst [vmem:[#allocation8_spill] sm:$0xff] %v5200_v3  ;;  %v5204_v51 = vpop.f32.mrf.mxu0  ;;  %4063 = vmatprep.mubr.msk.bf16.mxu1 %vm692_vm3, %v6041_v34 }
 0x11f   : > { %v5208_v62 = vpop.f32.mrf.mxu1 }
 0x120   : > { %6058 = vst [vmem:[#allocation3_spill] sm:$0xff] %v5208_v62  ;;  %v5210_v27 = vpop.f32.mrf.mxu0 }
 0x121   : > { %v5212_v9 = vpop.f32.mrf.mxu1 }
 0x122   : > { %6059 = vst [vmem:[#allocation4_spill] sm:$0xff] %v5212_v9  ;;  %v3895_v38 = vpop.f32.mrf.mxu0  ;;  %4098 = vmatmul.mubr.msk.bf16.vlgmr.msra.gmra.mxu0 %vm692_vm3, %v4771_v14 }
 0x123   : > { %v5216_v37 = vpop.f32.mrf.mxu1  ;;  %4101 = vmatprep.mubr.msk.bf16.mxu0 %vm692_vm3, %v4773_v10 }
 0x124   : > { %6060 = vst [vmem:[#allocation6_spill] sm:$0xff] %v5216_v37  ;;  %v1464_v3 = vpop.f32.mrf.mxu0 }
 0x125   : > { %v3861_v24 = vpop.f32.mrf.mxu1  ;;  %4064 = vmatmul.mubr.msk.bf16.vlgmr.msra.gmra.mxu1 %vm692_vm3, %v6042_v42 }
 0x126   : > { %v1080_v34 = vadd.f32 %v3861_v24, %v5092_v63  ;;  %v3896_v62 = vpop.f32.mrf.mxu0  ;;  %4067 = vmatprep.mubr.msk.bf16.mxu1 %vm692_vm3, %v6043_v46 }
 0x127   : > { %v1071_v9 = vpop.f32.mrf.mxu1 }
 0x128   : > { %v5225_v54 = vadd.f32 %v3895_v38, %v1080_v34  ;;  %v1072_v14 = vadd.f32 %v1071_v9, %v5102_v53  ;;  %v1467_v37 = vpop.f32.mrf.mxu0 }
 0x129   : > { %v3862_v6 = vpop.f32.mrf.mxu1 }
 0x12a   : > { %v5228_v32 = vadd.f32 %v1464_v3, %v1072_v14  ;;  %v1083_v10 = vadd.f32 %v3862_v6, %v5108_v56  ;;  %v3899_v12 = vpop.f32.mrf.mxu0  ;;  %4102 = vmatmul.mubr.msk.bf16.gmra.mxu0 %vm692_vm3, %v4808_v30 }
 0x12b   : > { %v1074_v42 = vpop.f32.mrf.mxu1  ;;  %4105 = vmatprep.mubr.msk.bf16.mxu0 %vm692_vm3, %v4810_v1 }
 0x12c   : > { %v5235_v46 = vadd.f32 %v3896_v62, %v1083_v10  ;;  %v1075_v63 = vadd.f32 %v1074_v42, %v5118_v59  ;;  %v1480_v24 = vpop.f32.mrf.mxu0 }
 0x12d   : > { %v3865_v53 = vpop.f32.mrf.mxu1  ;;  %4068 = vmatmul.mubr.msk.bf16.gmra.mxu1 %vm692_vm3, %v6044_v19 }
 0x12e   : > { %v5240_v38 = vadd.f32 %v1467_v37, %v1075_v63  ;;  %v1096_v56 = vadd.f32 %v3865_v53, %v5124_v20  ;;  %v3900_v6 = vpop.f32.mrf.mxu0  ;;  %4071 = vmatprep.mubr.msk.bf16.mxu1 %vm692_vm3, %v6045_v36 }
 0x12f   : > { %v1087_v30 = vpop.f32.mrf.mxu1 }
 0x130   : > { %v5245_v3 = vadd.f32 %v3899_v12, %v1096_v56  ;;  %v1088_v1 = vadd.f32 %v1087_v30, %v5134_v55  ;;  %v1483_v62 = vpop.f32.mrf.mxu0 }
 0x131   : > { %v3866_v59 = vpop.f32.mrf.mxu1 }
 0x132   : > { %v5248_v9 = vadd.f32 %v1480_v24, %v1088_v1  ;;  %v1099_v34 = vadd.f32 %v3866_v59, %v5140_v39  ;;  %v3903_v19 = vpop.f32.mrf.mxu0  ;;  %4106 = vmatmul.mubr.msk.bf16.gmra.mxu0 %vm692_vm3, %v4896_v23 }
 0x133   : > { %v1090_v20 = vpop.f32.mrf.mxu1  ;;  %4109 = vmatprep.mubr.msk.bf16.mxu0 %vm692_vm3, %v4901_v8 }
 0x134   : > { %v5255_v36 = vadd.f32 %v3900_v6, %v1099_v34  ;;  %v1091_v12 = vadd.f32 %v1090_v20, %v5150_v44  ;;  %v1496_v37 = vpop.f32.mrf.mxu0 }
 0x135   : > { %v3869_v55 = vpop.f32.mrf.mxu1  ;;  %4072 = vmatmul.mubr.msk.bf16.gmra.mxu1 %vm692_vm3, %v4683_v15 }
 0x136   : > { %v5260_v14 = vadd.f32 %v1483_v62, %v1091_v12  ;;  %v1112_v39 = vadd.f32 %v3869_v55, %v5156_v18  ;;  %v3904_v10 = vpop.f32.mrf.mxu0  ;;  %4075 = vmatprep.mubr.msk.bf16.mxu1 %vm692_vm3, %v6046_v26 }
 0x137   : > { %v1103_v23 = vpop.f32.mrf.mxu1 }
 0x138   : > { %v5265_v42 = vadd.f32 %v3903_v19, %v1112_v39  ;;  %v1104_v8 = vadd.f32 %v1103_v23, %v5166_v29  ;;  %v1499_v63 = vpop.f32.mrf.mxu0 }
 0x139   : > { %v3870_v44 = vpop.f32.mrf.mxu1 }
 0x13a   : > { %v5268_v24 = vadd.f32 %v1496_v37, %v1104_v8  ;;  %v1115_v53 = vadd.f32 %v3870_v44, %v5172_v43  ;;  %v3907_v15 = vpop.f32.mrf.mxu0  ;;  %4110 = vmatmul.mubr.msk.bf16.gmra.mxu0 %vm692_vm3, %v4934_v13  ;;  %v2479_v37 = vshll.u32 %v5176_v28, 16 }
 0x13b   : > { %v1106_v18 = vpop.f32.mrf.mxu1  ;;  %4113 = vmatprep.mubr.msk.bf16.mxu0 %vm692_vm3, %v4936_v16 }
 0x13c   : > { %v5275_v26 = vadd.f32 %v3904_v10, %v1115_v53  ;;  %v1107_v56 = vadd.f32 %v1106_v18, %v5185_v31  ;;  %v1512_v6 = vpop.f32.mrf.mxu0  ;;  %v2481_v44 = vrot.slane %v2479_v37, 5 }
 0x13d   : > { %v3873_v29 = vpop.f32.mrf.mxu1  ;;  %4076 = vmatmul.mubr.msk.bf16.gmra.mxu1 %vm692_vm3, %v6047_v0 }
 0x13e   : > { %v5280_v30 = vadd.f32 %v1499_v63, %v1107_v56  ;;  %v1128_v43 = vadd.f32 %v3873_v29, %v5193_v25  ;;  %v3908_v1 = vpop.f32.mrf.mxu0  ;;  %4079 = vmatprep.mubr.msk.bf16.mxu1 %vm692_vm3, %v6048_v35 }
 0x13f   : > { %v1119_v13 = vpop.f32.mrf.mxu1 }
 0x140   : > { %v5285_v62 = vadd.f32 %v3907_v15, %v1128_v43  ;;  %v1120_v16 = vadd.f32 %v1119_v13, %v5198_v41  ;;  %v1515_v59 = vpop.f32.mrf.mxu0  ;;  %v2476_v41 = vshrl.u32 %v5176_v28, 16 }
 0x141   : > { %v3874_v31 = vpop.f32.mrf.mxu1 }
 0x142   : > { %v5288_v34 = vadd.f32 %v1512_v6, %v1120_v16  ;;  %v1131_v19 = vadd.f32 %v3874_v31, %v5204_v51  ;;  %v3911_v0 = vpop.f32.mrf.mxu0  ;;  %4114 = vmatmul.mubr.msk.bf16.gmra.mxu0 %vm692_vm3, %v4851_v21  ;;  %v2485_v51 = vshll.u32 %v5179_v61, 16  ;;  %v2489_v21 = vshrl.u32 %v5179_v61, 16 }
 0x143   : > { %v1122_v25 = vpop.f32.mrf.mxu1  ;;  %4117 = vmatprep.mubr.msk.bf16.mxu0 %vm692_vm3, %v4866_v50 }
 0x144   : > { %v5295_v35 = vadd.f32 %v3908_v1, %v1131_v19  ;;  %v1123_v20 = vadd.f32 %v1122_v25, %v5210_v27  ;;  %v1528_v12 = vpop.f32.mrf.mxu0  ;;  %v2487_v15 = vrot.slane %v2485_v51, 5  ;;  %v2491_v18 = vrot.slane %v2489_v21, 4 }
 0x145   : > { %v3877_v55 = vpop.f32.mrf.mxu1  ;;  %4080 = vmatmul.mubr.msk.bf16.gmra.mxu1 %vm692_vm3, %v6049_v40  ;;  %v2478_v40 = vrot.slane %v2476_v41, 4  ;;  %v3583_v19 = vrot.slane %v5176_v28, 9 }
 0x146   : > { %v5304_v39 = vadd.f32 %v1515_v59, %v1123_v20  ;;  %v1144_v50 = vadd.f32 %v3877_v55, %v5098_v47  ;;  %v3912_v10 = vpop.f32.mrf.mxu0  ;;  %4083 = vmatprep.mubr.msk.bf16.mxu1 %vm692_vm3, %v6050_v57  ;;  %v2706_v57 = vrot.slane %v5179_v61, 5 }
 0x147   : > { %v1135_v27 = vpop.f32.mrf.mxu1 }
 0x148   : > { %v5309_v23 = vadd.f32 %v3911_v0, %v1144_v50  ;;  %v1136_v8 = vadd.f32 %v1135_v27, %v5104_v33  ;;  %v1531_v63 = vpop.f32.mrf.mxu0  ;;  %v253_v33 = vld [vmem:[%s4294_s27 + $0xd4] sm:$0x1] }
 0x149   : > { %v3878_v53 = vpop.f32.mrf.mxu1  ;;  %v2495_v31 = vshll.u32 %v253_v33, 16  ;;  %v2709_v25 = vrot.slane %v253_v33, 5 }
 0x14a   : > { %v5312_v56 = vadd.f32 %v1528_v12, %v1136_v8  ;;  %v1147_v47 = vadd.f32 %v3878_v53, %v5114_v17  ;;  %v3915_v6 = vpop.f32.mrf.mxu0  ;;  %4118 = vmatmul.mubr.msk.bf16.gmra.mxu0 %vm692_vm3, %v4888_v52  ;;  %v2482_v17 = vor.u32 %v2481_v44, %v2478_v40 }
 0x14b   : > { %v1138_v29 = vpop.f32.mrf.mxu1  ;;  %4121 = vmatprep.mubr.msk.bf16.mxu0 %vm692_vm3, %v4899_v58  ;;  %v2492_v58 = vor.u32 %v2491_v18, %v2487_v15  ;;  %v2497_v28 = vrot.slane %v2495_v31, 5 }
 0x14c   : > { %v5321_v43 = vadd.f32 %v3912_v10, %v1147_v47  ;;  %v1139_v1 = vadd.f32 %v1138_v29, %v5120_v4  ;;  %v1544_v13 = vpop.f32.mrf.mxu0  ;;  %v2708_v4 = vrot.slane %v2706_v57, 4  ;;  %v2483_v37 = vrot.slane %v2482_v17, 4  ;;  %v6064_v47 = vld [vmem:[#allocation16_spill] sm:$0xff]  ;;  %v6065_v29 = vld [vmem:[#allocation18_spill] sm:$0xff]  ;;  %v6066_v17 = vld [vmem:[#allocation21_spill] sm:$0xff] }
 0x14d   : > { %v3881_v16 = vpop.f32.mrf.mxu1  ;;  %4084 = vmatmul.mubr.msk.bf16.gmra.mxu1 %vm692_vm3, %v6051_v7 }
 0x14e   : > { %v5326_v59 = vadd.f32 %v1531_v63, %v1139_v1  ;;  %v1160_v52 = vadd.f32 %v3881_v16, %v5130_v48  ;;  %v3916_v61 = vpop.f32.mrf.mxu0  ;;  %4087 = vmatprep.mubr.msk.bf16.mxu1 %vm692_vm3, %v4657_v5  ;;  %v2493_v5 = vrot.slane %v2492_v58, 4  ;;  %v2710_v50 = vsel %vm4662_vm7, %v2708_v4, %v2709_v25  ;;  %v6061_v63 = vld [vmem:[#allocation25_spill] sm:$0xff] }
 0x14f   : > { %v1151_v0 = vpop.f32.mrf.mxu1  ;;  %v2488_v40 = vsel %vm4339_vm4, %v2483_v37, %v2487_v15 }
 0x150   : > { %v5332_v20 = vadd.f32 %v3915_v6, %v1160_v52  ;;  %v1152_v7 = vadd.f32 %v1151_v0, %v5136_v45  ;;  %v1547_v12 = vpop.f32.mrf.mxu0  ;;  %v2707_v45 = vsel %vm4662_vm7, %v3583_v19, %v2706_v57  ;;  %v2498_v60 = vsel %vm4339_vm4, %v2493_v5, %v2497_v28  ;;  %v6067_v19 = vld [vmem:[#allocation23_spill] sm:$0xff] }
 0x151   : > { %v3882_v41 = vpop.f32.mrf.mxu1  ;;  %v3566_v15 = vcombine.low %v2488_v40, %v2498_v60  ;;  %v6069_v5 = vld [vmem:[#allocation3_spill] sm:$0xff]  ;;  %v6071_v40 = vld [vmem:[#allocation6_spill] sm:$0xff] }
 0x152   : > { %v5335_v55 = vadd.f32 %v1544_v13, %v1152_v7  ;;  %v1163_v48 = vadd.f32 %v3882_v41, %v5146_v22  ;;  %v3919_v51 = vpop.f32.mrf.mxu0  ;;  %4122 = vmatmul.mubr.msk.bf16.gmra.mxu0 %vm692_vm3, %v4908_v2 }
 0x153   : > { %v1154_v21 = vpop.f32.mrf.mxu1  ;;  %4125 = vmatprep.mubr.msk.bf16.mxu0 %vm692_vm3, %v4987_v11  ;;  %v6063_v11 = vld [vmem:[#allocation20_spill] sm:$0xff] }
 0x154   : > { %v5346_v10 = vadd.f32 %v3916_v61, %v1163_v48  ;;  %v1155_v22 = vadd.f32 %v1154_v21, %v5152_v49  ;;  %v1560_v27 = vpop.f32.mrf.mxu0  ;;  %v3585_v49 = vcombine.low %v2707_v45, %v2710_v50 }
 0x155   : > { %v3885_v8 = vpop.f32.mrf.mxu1  ;;  %4088 = vmatmul.mubr.msk.bf16.gmra.mxu1 %vm692_vm3, %v6061_v63 }
 0x156   : > { %v5353_v44 = vadd.f32 %v1547_v12, %v1155_v22  ;;  %v1176_v53 = vadd.f32 %v3885_v8, %v6063_v11  ;;  %v3920_v18 = vpop.f32.mrf.mxu0  ;;  %4091 = vmatprep.mubr.msk.bf16.mxu1 %vm692_vm3, %v6064_v47  ;;  %v6068_v12 = vld [vmem:[#allocation8_spill] sm:$0xff] }
 0x157   : > { %v1167_v6 = vpop.f32.mrf.mxu1  ;;  %v6070_v22 = vld [vmem:[#allocation4_spill] sm:$0xff] }
 0x158   : > { %v5360_v57 = vadd.f32 %v3919_v51, %v1176_v53  ;;  %v1168_v33 = vadd.f32 %v1167_v6, %v6065_v29  ;;  %v1563_v1 = vpop.f32.mrf.mxu0 }
 0x159   : > { %v3886_v13 = vpop.f32.mrf.mxu1 }
 0x15a   : > { %v5363_v16 = vadd.f32 %v1560_v27, %v1168_v33  ;;  %v1179_v52 = vadd.f32 %v3886_v13, %v6066_v17  ;;  %v3923_v61 = vpop.f32.mrf.mxu0  ;;  %4126 = vmatmul.mubr.msk.bf16.gmra.mxu0 %vm692_vm3, %v3585_v49 }
 0x15b   : > { %v1170_v58 = vpop.f32.mrf.mxu1 }
 0x15c   : > { %v5367_v31 = vadd.f32 %v3920_v18, %v1179_v52  ;;  %v1171_v0 = vadd.f32 %v1170_v58, %v6067_v19  ;;  %v1576_v4 = vpop.f32.mrf.mxu0 }
 0x15d   : > { %v3889_v25 = vpop.f32.mrf.mxu1  ;;  %4092 = vmatmul.mubr.msk.bf16.gmra.mxu1 %vm692_vm3, %v3566_v15 }
 0x15e   : > { %v5371_v7 = vadd.f32 %v1563_v1, %v1171_v0  ;;  %v1192_v41 = vadd.f32 %v3889_v25, %v6068_v12  ;;  %v3924_v37 = vpop.f32.mrf.mxu0 }
 0x15f   : > { %v1183_v48 = vpop.f32.mrf.mxu1 }
 0x160   : > { %v5374_v51 = vadd.f32 %v3923_v61, %v1192_v41  ;;  %v1184_v28 = vadd.f32 %v1183_v48, %v6069_v5  ;;  %v1579_v21 = vpop.f32.mrf.mxu0 }
 0x161   : > { %v3890_v45 = vpop.f32.mrf.mxu1 }
 0x162   : > { %v5377_v50 = vadd.f32 %v1576_v4, %v1184_v28  ;;  %v1195_v27 = vadd.f32 %v3890_v45, %v6070_v22  ;;  %v3963_v8 = vpop.f32.mrf.mxu0 }
 0x163   : > { %v1186_v63 = vpop.f32.mrf.mxu1 }
 0x164   : > { %v5380_v2 = vadd.f32 %v3924_v37, %v1195_v27  ;;  %v1187_v11 = vadd.f32 %v1186_v63, %v6071_v40  ;;  %v1898_v53 = vpop.f32.mrf.mxu0 }
 0x165   : > { %v3929_v18 = vpop.f32.mrf.mxu1 }
 0x166   : > { %v5383_v47 = vadd.f32 %v1579_v21, %v1187_v11  ;;  %v1799_v60 = vadd.f32 %v3929_v18, %v5225_v54  ;;  %v3964_v49 = vpop.f32.mrf.mxu0 }
 0x167   : > { %v1670_v6 = vpop.f32.mrf.mxu1 }
 0x168   : > { %v5386_v29 = vadd.f32 %v3963_v8, %v1799_v60  ;;  %v1797_v33 = vadd.f32 %v1670_v6, %v5228_v32  ;;  %v1901_v1 = vpop.f32.mrf.mxu0 }
 0x169   : > { %v3930_v13 = vpop.f32.mrf.mxu1 }
 0x16a   : > { %v5389_v15 = vadd.f32 %v1898_v53, %v1797_v33  ;;  %v1800_v17 = vadd.f32 %v3930_v13, %v5235_v46  ;;  %v3967_v52 = vpop.f32.mrf.mxu0 }
 0x16b   : > { %v1673_v61 = vpop.f32.mrf.mxu1 }
 0x16c   : > { %v5392_v58 = vadd.f32 %v3964_v49, %v1800_v17  ;;  %v1798_v19 = vadd.f32 %v1673_v61, %v5240_v38  ;;  %v1914_v0 = vpop.f32.mrf.mxu0 }
 0x16d   : > { %v3933_v54 = vpop.f32.mrf.mxu1 }
 0x16e   : > { %v5395_v4 = vadd.f32 %v1901_v1, %v1798_v19  ;;  %v1803_v25 = vadd.f32 %v3933_v54, %v5245_v3  ;;  %v3968_v12 = vpop.f32.mrf.mxu0 }
 0x16f   : > { %v1686_v32 = vpop.f32.mrf.mxu1 }
 0x170   : > { %v5398_v41 = vadd.f32 %v3967_v52, %v1803_v25  ;;  %v1801_v37 = vadd.f32 %v1686_v32, %v5248_v9  ;;  %v1917_v48 = vpop.f32.mrf.mxu0 }
 0x171   : > { %v3934_v46 = vpop.f32.mrf.mxu1 }
 0x172   : > { %v5401_v5 = vadd.f32 %v1914_v0, %v1801_v37  ;;  %v1804_v28 = vadd.f32 %v3934_v46, %v5255_v36  ;;  %v3971_v21 = vpop.f32.mrf.mxu0 }
 0x173   : > { %v1689_v38 = vpop.f32.mrf.mxu1 }
 0x174   : > { %v5404_v45 = vadd.f32 %v3968_v12, %v1804_v28  ;;  %v1802_v22 = vadd.f32 %v1689_v38, %v5260_v14  ;;  %v1930_v27 = vpop.f32.mrf.mxu0 }
 0x175   : > { %v3937_v3 = vpop.f32.mrf.mxu1 }
 0x176   : > { %v5407_v8 = vadd.f32 %v1917_v48, %v1802_v22  ;;  %v1807_v63 = vadd.f32 %v3937_v3, %v5265_v42  ;;  %v3972_v40 = vpop.f32.mrf.mxu0 }
 0x177   : > { %v1702_v9 = vpop.f32.mrf.mxu1 }
 0x178   : > { %v5410_v11 = vadd.f32 %v3971_v21, %v1807_v63  ;;  %v1805_v53 = vadd.f32 %v1702_v9, %v5268_v24  ;;  %v1933_v18 = vpop.f32.mrf.mxu0 }
 0x179   : > { %v3938_v36 = vpop.f32.mrf.mxu1 }
 0x17a   : > { %v5413_v60 = vadd.f32 %v1930_v27, %v1805_v53  ;;  %v1808_v49 = vadd.f32 %v3938_v36, %v5275_v26  ;;  %v3975_v6 = vpop.f32.mrf.mxu0 }
 0x17b   : > { %v1705_v14 = vpop.f32.mrf.mxu1 }
 0x17c   : > { %v5416_v33 = vadd.f32 %v3972_v40, %v1808_v49  ;;  %v1806_v1 = vadd.f32 %v1705_v14, %v5280_v30  ;;  %v1946_v13 = vpop.f32.mrf.mxu0 }
 0x17d   : > { %v3941_v42 = vpop.f32.mrf.mxu1 }
 0x17e   : > { %6072 = vst [vmem:[#allocation9_spill] sm:$0xff] %v5416_v33  ;;  %v5419_v17 = vadd.f32 %v1933_v18, %v1806_v1  ;;  %v1811_v52 = vadd.f32 %v3941_v42, %v5285_v62  ;;  %v3976_v61 = vpop.f32.mrf.mxu0 }
 0x17f   : > { %v1718_v24 = vpop.f32.mrf.mxu1 }
 0x180   : > { %6073 = vst [vmem:[#allocation7_spill] sm:$0xff] %v5419_v17  ;;  %v5422_v19 = vadd.f32 %v3975_v6, %v1811_v52  ;;  %v1809_v0 = vadd.f32 %v1718_v24, %v5288_v34  ;;  %v1949_v54 = vpop.f32.mrf.mxu0 }
 0x181   : > { %v3942_v26 = vpop.f32.mrf.mxu1 }
 0x182   : > { %6074 = vst [vmem:[#allocation11_spill] sm:$0xff] %v5422_v19  ;;  %v5425_v25 = vadd.f32 %v1946_v13, %v1809_v0  ;;  %v1812_v12 = vadd.f32 %v3942_v26, %v5295_v35  ;;  %v3979_v32 = vpop.f32.mrf.mxu0 }
 0x183   : > { %v1721_v30 = vpop.f32.mrf.mxu1 }
 0x184   : > { %6075 = vst [vmem:[#allocation13_spill] sm:$0xff] %v5425_v25  ;;  %v5428_v37 = vadd.f32 %v3976_v61, %v1812_v12  ;;  %v1810_v48 = vadd.f32 %v1721_v30, %v5304_v39  ;;  %v1962_v46 = vpop.f32.mrf.mxu0 }
 0x185   : > { %v3945_v62 = vpop.f32.mrf.mxu1 }
 0x186   : > { %v5431_v28 = vadd.f32 %v1949_v54, %v1810_v48  ;;  %v1815_v21 = vadd.f32 %v3945_v62, %v5309_v23  ;;  %v3980_v38 = vpop.f32.mrf.mxu0 }
 0x187   : > { %v1734_v34 = vpop.f32.mrf.mxu1 }
 0x188   : > { %v5434_v22 = vadd.f32 %v3979_v32, %v1815_v21  ;;  %v1813_v27 = vadd.f32 %v1734_v34, %v5312_v56  ;;  %v1965_v3 = vpop.f32.mrf.mxu0 }
 0x189   : > { %v3946_v35 = vpop.f32.mrf.mxu1 }
 0x18a   : > { %v5437_v63 = vadd.f32 %v1962_v46, %v1813_v27  ;;  %v1816_v40 = vadd.f32 %v3946_v35, %v5321_v43  ;;  %v3983_v9 = vpop.f32.mrf.mxu0 }
 0x18b   : > { %v1737_v39 = vpop.f32.mrf.mxu1 }
 0x18c   : > { %v5440_v53 = vadd.f32 %v3980_v38, %v1816_v40  ;;  %v1814_v18 = vadd.f32 %v1737_v39, %v5326_v59  ;;  %v1978_v36 = vpop.f32.mrf.mxu0 }
 0x18d   : > { %v3949_v23 = vpop.f32.mrf.mxu1 }
 0x18e   : > { %v5443_v49 = vadd.f32 %v1965_v3, %v1814_v18  ;;  %v1819_v6 = vadd.f32 %v3949_v23, %v5332_v20  ;;  %v3984_v14 = vpop.f32.mrf.mxu0 }
 0x18f   : > { %v1750_v56 = vpop.f32.mrf.mxu1 }
 0x190   : > { %v5446_v1 = vadd.f32 %v3983_v9, %v1819_v6  ;;  %v1817_v13 = vadd.f32 %v1750_v56, %v5335_v55  ;;  %v1981_v42 = vpop.f32.mrf.mxu0 }
 0x191   : > { %v3950_v43 = vpop.f32.mrf.mxu1 }
 0x192   : > { %v5449_v52 = vadd.f32 %v1978_v36, %v1817_v13  ;;  %v1820_v61 = vadd.f32 %v3950_v43, %v5346_v10  ;;  %v3987_v24 = vpop.f32.mrf.mxu0 }
 0x193   : > { %v1753_v59 = vpop.f32.mrf.mxu1 }
 0x194   : > { %v5452_v0 = vadd.f32 %v3984_v14, %v1820_v61  ;;  %v1818_v54 = vadd.f32 %v1753_v59, %v5353_v44  ;;  %v1994_v26 = vpop.f32.mrf.mxu0 }
 0x195   : > { %v3953_v20 = vpop.f32.mrf.mxu1 }
 0x196   : > { %v5455_v12 = vadd.f32 %v1981_v42, %v1818_v54  ;;  %v1823_v32 = vadd.f32 %v3953_v20, %v5360_v57  ;;  %v3988_v30 = vpop.f32.mrf.mxu0 }
 0x197   : > { %v1766_v55 = vpop.f32.mrf.mxu1 }
 0x198   : > { %v5458_v48 = vadd.f32 %v3987_v24, %v1823_v32  ;;  %v1821_v46 = vadd.f32 %v1766_v55, %v5363_v16  ;;  %v1997_v62 = vpop.f32.mrf.mxu0 }
 0x199   : > { %v3954_v10 = vpop.f32.mrf.mxu1 }
 0x19a   : > { %v5461_v21 = vadd.f32 %v1994_v26, %v1821_v46  ;;  %v1824_v38 = vadd.f32 %v3954_v10, %v5367_v31  ;;  %v3991_v34 = vpop.f32.mrf.mxu0 }
 0x19b   : > { %v1769_v44 = vpop.f32.mrf.mxu1 }
 0x19c   : > { %v5464_v27 = vadd.f32 %v3988_v30, %v1824_v38  ;;  %v1822_v3 = vadd.f32 %v1769_v44, %v5371_v7  ;;  %v2010_v35 = vpop.f32.mrf.mxu0 }
 0x19d   : > { %v3957_v57 = vpop.f32.mrf.mxu1 }
 0x19e   : > { %v5467_v40 = vadd.f32 %v1997_v62, %v1822_v3  ;;  %v1827_v9 = vadd.f32 %v3957_v57, %v5374_v51  ;;  %v3992_v39 = vpop.f32.mrf.mxu0 }
 0x19f   : > { %v1782_v16 = vpop.f32.mrf.mxu1 }
 0x1a0   : > { %v5470_v18 = vadd.f32 %v3991_v34, %v1827_v9  ;;  %v1825_v36 = vadd.f32 %v1782_v16, %v5377_v50  ;;  %v2013_v23 = vpop.f32.mrf.mxu0 }
 0x1a1   : > { %v3958_v31 = vpop.f32.mrf.mxu1 }
 0x1a2   : > { %v5473_v6 = vadd.f32 %v2010_v35, %v1825_v36  ;;  %v1828_v14 = vadd.f32 %v3958_v31, %v5380_v2  ;;  %v5476_v56 = vpop.f32.mrf.mxu0 }
 0x1a3   : > { %v1785_v7 = vpop.f32.mrf.mxu1 }
 0x1a4   : > { %v5478_v13 = vadd.f32 %v3992_v39, %v1828_v14  ;;  %v1826_v42 = vadd.f32 %v1785_v7, %v5383_v47  ;;  %v5481_v51 = vpop.f32.mrf.mxu0 }
 0x1a5   : > { %v5483_v43 = vpop.f32.mrf.mxu1 }
 0x1a6   : > { %v5485_v61 = vadd.f32 %v2013_v23, %v1826_v42  ;;  %v5487_v50 = vpop.f32.mrf.mxu0 }
 0x1a7   : > { %v5489_v24 = vpop.f32.mrf.mxu1 }
 0x1a8   : > { %v5491_v59 = vpop.f32.mrf.mxu0 }
 0x1a9   : > { %v5493_v2 = vpop.f32.mrf.mxu1 }
 0x1aa   : > { %v5495_v54 = vpop.f32.mrf.mxu0 }
 0x1ab   : > { %v5497_v26 = vpop.f32.mrf.mxu1 }
 0x1ac   : > { %v5499_v20 = vpop.f32.mrf.mxu0 }
 0x1ad   : > { %v5501_v47 = vpop.f32.mrf.mxu1 }
 0x1ae   : > { %v5503_v32 = vpop.f32.mrf.mxu0 }
 0x1af   : > { %v5505_v30 = vpop.f32.mrf.mxu1 }
 0x1b0   : > { %v5507_v55 = vpop.f32.mrf.mxu0 }
 0x1b1   : > { %v5509_v46 = vpop.f32.mrf.mxu1 }
 0x1b2   : > { %v5511_v62 = vpop.f32.mrf.mxu0 }
 0x1b3   : > { %v5513_v10 = vpop.f32.mrf.mxu1 }
 0x1b4   : > { %v5515_v38 = vpop.f32.mrf.mxu0 }
 0x1b5   : > { %6076 = vst [vmem:[#allocation15_spill] sm:$0xff] %v5515_v38  ;;  %v5517_v34 = vpop.f32.mrf.mxu1 }
 0x1b6   : > { %v5519_v44 = vpop.f32.mrf.mxu0 }
 0x1b7   : > { %6077 = vst [vmem:[#allocation19_spill] sm:$0xff] %v5519_v44  ;;  %v5521_v3 = vpop.f32.mrf.mxu1 }
 0x1b8   : > { %v5523_v35 = vpop.f32.mrf.mxu0 }
 0x1b9   : > { %6078 = vst [vmem:[#allocation24_spill] sm:$0xff] %v5523_v35  ;;  %v5525_v57 = vpop.f32.mrf.mxu1 }
 0x1ba   : > { %6079 = vst [vmem:[#allocation5_spill] sm:$0xff] %v5525_v57  ;;  %v5527_v9 = vpop.f32.mrf.mxu0 }
 0x1bb   : > { %6080 = vst [vmem:[#allocation10_spill] sm:$0xff] %v5527_v9  ;;  %v5529_v39 = vpop.f32.mrf.mxu1 }
 0x1bc   : > { %6081 = vst [vmem:[#allocation12_spill] sm:$0xff] %v5529_v39  ;;  %v5531_v16 = vpop.f32.mrf.mxu0 }
 0x1bd   : > { %6082 = vst [vmem:[#allocation14_spill] sm:$0xff] %v5531_v16  ;;  %v5533_v36 = vpop.f32.mrf.mxu1 }
 0x1be   : > { %6083 = vst [vmem:[#allocation17_spill] sm:$0xff] %v5533_v36  ;;  %v4044_v23 = vpop.f32.mrf.mxu0 }
 0x1bf   : > { %v5535_v31 = vpop.f32.mrf.mxu1 }
 0x1c0   : > { %6084 = vst [vmem:[#allocation22_spill] sm:$0xff] %v5535_v31  ;;  %v2367_v14 = vpop.f32.mrf.mxu0 }
 0x1c1   : > { %v4010_v7 = vpop.f32.mrf.mxu1 }
 0x1c2   : > { %v2252_v42 = vadd.f32 %v4010_v7, %v5428_v37  ;;  %v4047_v44 = vpop.f32.mrf.mxu0 }
 0x1c3   : > { %v2161_v25 = vpop.f32.mrf.mxu1 }
 0x1c4   : > { %v5538_v35 = vadd.f32 %v4044_v23, %v2252_v42  ;;  %v2250_v19 = vadd.f32 %v2161_v25, %v5431_v28  ;;  %v2380_v9 = vpop.f32.mrf.mxu0 }
 0x1c5   : > { %v4013_v17 = vpop.f32.mrf.mxu1 }
 0x1c6   : > { %v5541_v39 = vadd.f32 %v2367_v14, %v2250_v19  ;;  %v2255_v16 = vadd.f32 %v4013_v17, %v5434_v22  ;;  %v4048_v36 = vpop.f32.mrf.mxu0 }
 0x1c7   : > { %v2174_v57 = vpop.f32.mrf.mxu1 }
 0x1c8   : > { %v5544_v33 = vadd.f32 %v4047_v44, %v2255_v16  ;;  %v2253_v31 = vadd.f32 %v2174_v57, %v5437_v63  ;;  %v2383_v38 = vpop.f32.mrf.mxu0 }
 0x1c9   : > { %v4014_v37 = vpop.f32.mrf.mxu1 }
 0x1ca   : > { %v5547_v7 = vadd.f32 %v2380_v9, %v2253_v31  ;;  %v2256_v23 = vadd.f32 %v4014_v37, %v5440_v53  ;;  %v4051_v42 = vpop.f32.mrf.mxu0 }
 0x1cb   : > { %v2177_v25 = vpop.f32.mrf.mxu1 }
 0x1cc   : > { %v5550_v28 = vadd.f32 %v4048_v36, %v2256_v23  ;;  %v2254_v19 = vadd.f32 %v2177_v25, %v5443_v49  ;;  %v2396_v14 = vpop.f32.mrf.mxu0 }
 0x1cd   : > { %v4017_v17 = vpop.f32.mrf.mxu1 }
 0x1ce   : > { %v5553_v22 = vadd.f32 %v2383_v38, %v2254_v19  ;;  %v2259_v44 = vadd.f32 %v4017_v17, %v5446_v1  ;;  %v4052_v16 = vpop.f32.mrf.mxu0 }
 0x1cf   : > { %v2190_v63 = vpop.f32.mrf.mxu1 }
 0x1d0   : > { %v5556_v57 = vadd.f32 %v4051_v42, %v2259_v44  ;;  %v2257_v9 = vadd.f32 %v2190_v63, %v5449_v52  ;;  %v2399_v31 = vpop.f32.mrf.mxu0 }
 0x1d1   : > { %v4018_v53 = vpop.f32.mrf.mxu1 }
 0x1d2   : > { %v5559_v37 = vadd.f32 %v2396_v14, %v2257_v9  ;;  %v2260_v36 = vadd.f32 %v4018_v53, %v5452_v0  ;;  %v4055_v23 = vpop.f32.mrf.mxu0 }
 0x1d3   : > { %v2193_v49 = vpop.f32.mrf.mxu1 }
 0x1d4   : > { %v5562_v25 = vadd.f32 %v4052_v16, %v2260_v36  ;;  %v2258_v38 = vadd.f32 %v2193_v49, %v5455_v12  ;;  %v2412_v19 = vpop.f32.mrf.mxu0 }
 0x1d5   : > { %v4021_v1 = vpop.f32.mrf.mxu1 }
 0x1d6   : > { %v5565_v17 = vadd.f32 %v2399_v31, %v2258_v38  ;;  %v2263_v42 = vadd.f32 %v4021_v1, %v5458_v48  ;;  %v4056_v44 = vpop.f32.mrf.mxu0 }
 0x1d7   : > { %v2206_v52 = vpop.f32.mrf.mxu1 }
 0x1d8   : > { %v5568_v63 = vadd.f32 %v4055_v23, %v2263_v42  ;;  %v2261_v14 = vadd.f32 %v2206_v52, %v5461_v21  ;;  %v2415_v9 = vpop.f32.mrf.mxu0 }
 0x1d9   : > { %v4022_v0 = vpop.f32.mrf.mxu1 }
 0x1da   : > { %v5571_v53 = vadd.f32 %v2412_v19, %v2261_v14  ;;  %v2264_v16 = vadd.f32 %v4022_v0, %v5464_v27  ;;  %v4059_v36 = vpop.f32.mrf.mxu0  ;;  %v2239_v19 = vadd.f32 %v5483_v43, %v5386_v29  ;;  %v2240_v29 = vadd.f32 %v5493_v2, %v5392_v58 }
 0x1db   : > { %v2209_v12 = vpop.f32.mrf.mxu1 }
 0x1dc   : > { %v5574_v49 = vadd.f32 %v4056_v44, %v2264_v16  ;;  %v2262_v31 = vadd.f32 %v2209_v12, %v5467_v40  ;;  %v2428_v38 = vpop.f32.mrf.mxu0  ;;  %v2237_v40 = vadd.f32 %v5489_v24, %v5389_v15  ;;  %v2445_v12 = vadd.f32 %v5476_v56, %v2239_v19  ;;  %v5604_v56 = vld [vmem:[%s5951_s2] ss:$0 sm:$0xff] }
 0x1dd   : > { %v4025_v48 = vpop.f32.mrf.mxu1  ;;  %v2238_v15 = vadd.f32 %v5497_v26, %v5395_v4  ;;  %v2446_v2 = vadd.f32 %v5487_v50, %v2240_v29  ;;  %v5612_v4 = vld [vmem:[%s5952_s3] ss:$0 sm:$0xff]  ;;  %v2241_v50 = vadd.f32 %v5505_v30, %v5401_v5  ;;  %v2247_v5 = vadd.f32 %v5517_v34, %v5410_v11 }
 0x1de   : > { %v5577_v1 = vadd.f32 %v2415_v9, %v2262_v31  ;;  %v2267_v23 = vadd.f32 %v4025_v48, %v5470_v18  ;;  %v4060_v42 = vpop.f32.mrf.mxu0  ;;  %v2443_v48 = vadd.f32 %v5481_v51, %v2237_v40  ;;  %v2243_v51 = vadd.f32 %v5501_v47, %v5398_v41 }
 0x1df   : > { %v2222_v21 = vpop.f32.mrf.mxu1  ;;  %v2244_v40 = vadd.f32 %v5509_v46, %v5404_v45  ;;  %v2242_v41 = vadd.f32 %v5513_v10, %v5407_v8  ;;  %v2245_v45 = vadd.f32 %v5521_v3, %v5413_v60 }
 0x1e0   : > { %v5582_v52 = vadd.f32 %v4059_v36, %v2267_v23  ;;  %v2265_v27 = vadd.f32 %v2222_v21, %v5473_v6  ;;  %v2431_v14 = vpop.f32.mrf.mxu0  ;;  %v2444_v21 = vadd.f32 %v5491_v59, %v2238_v15  ;;  %v2449_v29 = vadd.f32 %v5495_v54, %v2243_v51  ;;  %v6086_v51 = vld [vmem:[#allocation9_spill] sm:$0xff] }
 0x1e1   : > { %v4026_v44 = vpop.f32.mrf.mxu1  ;;  %v2448_v11 = vadd.f32 %v5507_v55, %v2242_v41 }
 0x1e2   : > { %v5587_v0 = vadd.f32 %v2428_v38, %v2265_v27  ;;  %v2268_v9 = vadd.f32 %v4026_v44, %v5478_v13  ;;  %v4099_v16 = vpop.f32.mrf.mxu0 }
 0x1e3   : > { %v2225_v18 = vpop.f32.mrf.mxu1 }
 0x1e4   : > { %v5593_v43 = vadd.f32 %v4060_v42, %v2268_v9  ;;  %v2266_v6 = vadd.f32 %v2225_v18, %v5485_v61  ;;  %v2756_v36 = vpop.f32.mrf.mxu0 }
 0x1e5   : > { %v4065_v31 = vpop.f32.mrf.mxu1 }
 0x1e6   : > { %v5599_v24 = vadd.f32 %v2431_v14, %v2266_v6  ;;  %v2673_v13 = vadd.f32 %v4065_v31, %v2445_v12  ;;  %v4100_v38 = vpop.f32.mrf.mxu0  ;;  %v2450_v31 = vadd.f32 %v5503_v32, %v2244_v40 }
 0x1e7   : > { %v2544_v58 = vpop.f32.mrf.mxu1 }
 0x1e8   : > { %v2885_v61 = vadd.f32 %v4099_v16, %v2673_v13  ;;  %v2671_v23 = vadd.f32 %v2544_v58, %v2443_v48  ;;  %v2759_v42 = vpop.f32.mrf.mxu0  ;;  %v2453_v13 = vadd.f32 %v5511_v62, %v2247_v5 }
 0x1e9   : > { %v4066_v26 = vpop.f32.mrf.mxu1 }
 0x1ea   : > { %v2924_v19 = vmul.f32 %v5604_v56, %v2885_v61  ;;  %v2883_v27 = vadd.f32 %v2756_v36, %v2671_v23  ;;  %v2674_v14 = vadd.f32 %v4066_v26, %v2446_v2  ;;  %v4103_v44 = vpop.f32.mrf.mxu0  ;;  %v2447_v36 = vadd.f32 %v5499_v20, %v2241_v50  ;;  %v6085_v2 = vld [vmem:[#allocation15_spill] sm:$0xff]  ;;  %v6087_v26 = vld [vmem:[#allocation5_spill] sm:$0xff]  ;;  %v6089_v50 = vld [vmem:[#allocation12_spill] sm:$0xff] }
 0x1eb   : > { %v2547_v47 = vpop.f32.mrf.mxu1  ;;  %v2451_v61 = vadd.f32 %v6085_v2, %v2245_v45 }
 0x1ec   : > { %v5623_v9 = vadd.f32 %v5612_v4, %v2924_v19  ;;  %v2922_v59 = vmul.f32 %v5604_v56, %v2883_v27  ;;  %v2886_v16 = vadd.f32 %v4100_v38, %v2674_v14  ;;  %v2672_v18 = vadd.f32 %v2547_v47, %v2444_v21  ;;  %v2772_v12 = vpop.f32.mrf.mxu0 }
 0x1ed   : > { %v4069_v30 = vpop.f32.mrf.mxu1  ;;  %v2248_v21 = vadd.f32 %v6087_v26, %v6086_v51  ;;  %v6097_v51 = vld [vmem:[#allocation10_spill] sm:$0xff] }
 0x1ee   : > { %v3027_v8 = vmul.f32 0.70710677, %v5623_v9  ;;  %v5633_v46 = vadd.f32 %v5612_v4, %v2922_v59  ;;  %v2925_v10 = vmul.f32 %v5604_v56, %v2886_v16  ;;  %v4104_v6 = vpop.f32.mrf.mxu0  ;;  %v2884_v54 = vadd.f32 %v2759_v42, %v2672_v18  ;;  %v6090_v16 = vld [vmem:[#allocation11_spill] sm:$0xff]  ;;  %v6091_v18 = vld [vmem:[#allocation17_spill] sm:$0xff] }
 0x1ef   : > { %v2677_v48 = vadd.f32 %v4069_v30, %v2449_v29  ;;  %v2560_v15 = vpop.f32.mrf.mxu1  ;;  %v2251_v29 = vadd.f32 %v6091_v18, %v6090_v16 }
 0x1f0   : > { %4168 = verf.f32 %v3027_v8  ;;  %v3025_v60 = vmul.f32 0.70710677, %v5633_v46  ;;  %v5641_v34 = vadd.f32 %v5612_v4, %v2925_v10  ;;  %v2775_v3 = vpop.f32.mrf.mxu0  ;;  %v2923_v38 = vmul.f32 %v5604_v56, %v2884_v54  ;;  %v6092_v10 = vld [vmem:[#allocation13_spill] sm:$0xff] }
 0x1f1   : > { %v2889_v20 = vadd.f32 %v4103_v44, %v2677_v48  ;;  %v2675_v58 = vadd.f32 %v2560_v15, %v2447_v36  ;;  %v4070_v32 = vpop.f32.mrf.mxu1  ;;  %v6088_v44 = vld [vmem:[#allocation7_spill] sm:$0xff]  ;;  %v2457_v26 = vadd.f32 %v6097_v51, %v2251_v29  ;;  %v2993_v18 = vmul.f32 0.5, %v5633_v46 }
 0x1f2   : > { %4170 = verf.f32 %v3025_v60  ;;  %v3028_v55 = vmul.f32 0.70710677, %v5641_v34  ;;  %v2678_v23 = vadd.f32 %v4070_v32, %v2450_v31  ;;  %v4107_v42 = vpop.f32.mrf.mxu0  ;;  %v2962_v19 = vadd.f32 %v5612_v4, %v2923_v38  ;;  %v6095_v15 = vld [vmem:[#allocation19_spill] sm:$0xff] }
 0x1f3   : > { %v2928_v62 = vmul.f32 %v5604_v56, %v2889_v20  ;;  %v2887_v27 = vadd.f32 %v2772_v12, %v2675_v58  ;;  %v2563_v14 = vpop.f32.mrf.mxu1  ;;  %v2246_v40 = vadd.f32 %v6089_v50, %v6088_v44  ;;  %v6093_v12 = vld [vmem:[#allocation22_spill] sm:$0xff] }
 0x1f4   : > { %4172 = verf.f32 %v3028_v55  ;;  %v2890_v41 = vadd.f32 %v4104_v6, %v2678_v23  ;;  %v2676_v47 = vadd.f32 %v2563_v14, %v2448_v11  ;;  %v2788_v59 = vpop.f32.mrf.mxu0  ;;  %v3026_v5 = vmul.f32 0.70710677, %v2962_v19  ;;  %v6096_v55 = vld [vmem:[#allocation24_spill] sm:$0xff] }
 0x1f5   : > { %v5657_v30 = vadd.f32 %v5612_v4, %v2928_v62  ;;  %v2926_v45 = vmul.f32 %v5604_v56, %v2887_v27  ;;  %v4073_v8 = vpop.f32.mrf.mxu1  ;;  %v2249_v36 = vadd.f32 %v6093_v12, %v6092_v10  ;;  %v2454_v11 = vadd.f32 %v6095_v15, %v2248_v21  ;;  %v6098_v27 = vld [vmem:[#allocation14_spill] sm:$0xff] }
 0x1f6   : > { %v2929_v6 = vmul.f32 %v5604_v56, %v2890_v41  ;;  %v2888_v31 = vadd.f32 %v2775_v3, %v2676_v47  ;;  %v2681_v54 = vadd.f32 %v4073_v8, %v2453_v13  ;;  %v4108_v48 = vpop.f32.mrf.mxu0  ;;  %4174 = verf.f32 %v3026_v5 }
 0x1f7   : > { %v3031_v60 = vmul.f32 0.70710677, %v5657_v30  ;;  %v5672_v38 = vadd.f32 %v5612_v4, %v2926_v45  ;;  %v2576_v20 = vpop.f32.mrf.mxu1  ;;  %v2452_v23 = vadd.f32 %v6096_v55, %v2246_v40  ;;  %v2455_v14 = vadd.f32 %v6098_v27, %v2249_v36 }
 0x1f8   : > { %v5675_v58 = vadd.f32 %v5612_v4, %v2929_v6  ;;  %v2927_v32 = vmul.f32 %v5604_v56, %v2888_v31  ;;  %v2893_v2 = vadd.f32 %v4107_v42, %v2681_v54  ;;  %v2679_v3 = vadd.f32 %v2576_v20, %v2451_v61  ;;  %v2791_v13 = vpop.f32.mrf.mxu0 }
 0x1f9   : > { %4176 = verf.f32 %v3031_v60  ;;  %v3029_v21 = vmul.f32 0.70710677, %v5672_v38  ;;  %v4074_v62 = vpop.f32.mrf.mxu1  ;;  %v2995_v40 = vmul.f32 0.5, %v5623_v9  ;;  %v2996_v10 = vmul.f32 0.5, %v5641_v34 }
 0x1fa   : > { %v3032_v44 = vmul.f32 0.70710677, %v5675_v58  ;;  %v5690_v61 = vadd.f32 %v5612_v4, %v2927_v32  ;;  %v2932_v42 = vmul.f32 %v5604_v56, %v2893_v2  ;;  %v4111_v50 = vpop.f32.mrf.mxu0  ;;  %v2891_v41 = vadd.f32 %v2788_v59, %v2679_v3 }
 0x1fb   : > { %4178 = verf.f32 %v3029_v21  ;;  %v2682_v47 = vadd.f32 %v4074_v62, %v2454_v11  ;;  %v2579_v16 = vpop.f32.mrf.mxu1  ;;  %v2994_v31 = vmul.f32 0.5, %v2962_v19  ;;  %v2999_v19 = vmul.f32 0.5, %v5657_v30 }
 0x1fc   : > { %4180 = verf.f32 %v3032_v44  ;;  %v3030_v29 = vmul.f32 0.70710677, %v5690_v61  ;;  %v5697_v5 = vadd.f32 %v5612_v4, %v2932_v42  ;;  %v2804_v45 = vpop.f32.mrf.mxu0  ;;  %v2930_v12 = vmul.f32 %v5604_v56, %v2891_v41 }
 0x1fd   : > { %v4169_v8 = vpop.eup %4168  ;;  %v2894_v9 = vadd.f32 %v4108_v48, %v2682_v47  ;;  %v2680_v36 = vadd.f32 %v2579_v16, %v2452_v23  ;;  %v4077_v6 = vpop.f32.mrf.mxu1 }
 0x1fe   : > { %v3091_v59 = vadd.f32 1.0, %v4169_v8  ;;  %4182 = verf.f32 %v3030_v29  ;;  %v3035_v46 = vmul.f32 0.70710677, %v5697_v5  ;;  %v4112_v54 = vpop.f32.mrf.mxu0  ;;  %v5704_v11 = vadd.f32 %v5612_v4, %v2930_v12 }
 0x1ff   : > { %v4171_v15 = vpop.eup %4170  ;;  %v2933_v60 = vmul.f32 %v5604_v56, %v2894_v9  ;;  %v2892_v20 = vadd.f32 %v2791_v13, %v2680_v36  ;;  %v2685_v34 = vadd.f32 %v4077_v6, %v2457_v26  ;;  %v2592_v32 = vpop.f32.mrf.mxu1 }
 0x200   : > { %v3123_v2 = vmul.f32 %v3091_v59, %v2995_v40  ;;  %v3089_v48 = vadd.f32 1.0, %v4171_v15  ;;  %4184 = verf.f32 %v3035_v46  ;;  %v2683_v3 = vadd.f32 %v2592_v32, %v2455_v14  ;;  %v2807_v55 = vpop.f32.mrf.mxu0 }
 0x201   : > { %v4173_v23 = vpop.eup %4172  ;;  %v3033_v51 = vmul.f32 0.70710677, %v5704_v11  ;;  %v5715_v13 = vadd.f32 %v5612_v4, %v2933_v60  ;;  %v2931_v26 = vmul.f32 %v5604_v56, %v2892_v20  ;;  %v4078_v21 = vpop.f32.mrf.mxu1  ;;  %v2897_v44 = vadd.f32 %v4111_v50, %v2685_v34 }
 0x202   : > { %v3640_v62 = vpack.c.bf16 %v3123_v2, %v3123_v2  ;;  %v3121_v27 = vmul.f32 %v3089_v48, %v2993_v18  ;;  %v3092_v14 = vadd.f32 1.0, %v4173_v23  ;;  %v5718_v42 = vpop.f32.mrf.mxu0  ;;  %v2997_v40 = vmul.f32 0.5, %v5672_v38 }
 0x203   : > { %4186 = verf.f32 %v3033_v51  ;;  %v3036_v30 = vmul.f32 0.70710677, %v5715_v13  ;;  %v5723_v41 = vadd.f32 %v5612_v4, %v2931_v26  ;;  %v2595_v47 = vpop.f32.mrf.mxu1  ;;  %v4175_v16 = vpop.eup %4174  ;;  %v2936_v18 = vmul.f32 %v5604_v56, %v2897_v44 }
 0x204   : > { %3284 = vst.msk [vmem:[%s5710_s24 + $0x8] sm:$0xf] %vm3281_vm8, %v3640_v62  ;;  %v3638_v29 = vpack.c.bf16 %v3121_v27, %v3121_v27  ;;  %v3124_v8 = vmul.f32 %v3092_v14, %v2996_v10  ;;  %v2895_v50 = vadd.f32 %v2804_v45, %v2683_v3  ;;  %v5728_v12 = vpop.f32.mrf.mxu0  ;;  %v3090_v9 = vadd.f32 1.0, %v4175_v16 }
 0x205   : > { %v3000_v38 = vmul.f32 0.5, %v5675_v58  ;;  %4188 = verf.f32 %v3036_v30  ;;  %v3034_v36 = vmul.f32 0.70710677, %v5723_v41  ;;  %v4081_v6 = vpop.f32.mrf.mxu1  ;;  %v5735_v15 = vadd.f32 %v5612_v4, %v2936_v18 }
 0x206   : > { %v4177_v59 = vpop.eup %4176  ;;  %3282 = vst.msk [vmem:[%s5710_s24] sm:$0xf] %vm3281_vm8, %v3638_v29  ;;  %v3641_v46 = vpack.c.bf16 %v3124_v8, %v3124_v8  ;;  %v2934_v10 = vmul.f32 %v5604_v56, %v2895_v50  ;;  %v2686_v45 = vadd.f32 %v4078_v21, %v5538_v35  ;;  %v5739_v60 = vpop.f32.mrf.mxu0  ;;  %v3122_v20 = vmul.f32 %v3090_v9, %v2994_v31 }
 0x207   : > { %v3095_v58 = vadd.f32 1.0, %v4177_v59  ;;  %4190 = verf.f32 %v3034_v36  ;;  %v2684_v34 = vadd.f32 %v2595_v47, %v5541_v39  ;;  %v2608_v32 = vpop.f32.mrf.mxu1  ;;  %v2998_v48 = vmul.f32 0.5, %v5690_v61 }
 0x208   : > { %v4179_v2 = vpop.eup %4178  ;;  %3285 = vst.msk [vmem:[%s5710_s24 + $0xc] sm:$0xf] %vm3281_vm8, %v3641_v46  ;;  %v3039_v3 = vmul.f32 0.70710677, %v5735_v15  ;;  %v5747_v23 = vadd.f32 %v5612_v4, %v2934_v10  ;;  %v2898_v35 = vadd.f32 %v4112_v54, %v2686_v45  ;;  %v5749_v51 = vpop.f32.mrf.mxu0  ;;  %v3639_v26 = vpack.c.bf16 %v3122_v20, %v3122_v20 }
 0x209   : > { %v4181_v31 = vpop.eup %4180  ;;  %v3127_v21 = vmul.f32 %v3095_v58, %v2999_v19  ;;  %v3093_v62 = vadd.f32 1.0, %v4179_v2  ;;  %v2896_v39 = vadd.f32 %v2807_v55, %v2684_v34  ;;  %v4082_v27 = vpop.f32.mrf.mxu1  ;;  %v3003_v44 = vmul.f32 0.5, %v5697_v5 }
 0x20a   : > { %v3096_v14 = vadd.f32 1.0, %v4181_v31  ;;  %4192 = verf.f32 %v3039_v3  ;;  %v3037_v61 = vmul.f32 0.70710677, %v5747_v23  ;;  %v5753_v30 = vpop.f32.mrf.mxu0  ;;  %3283 = vst.msk [vmem:[%s5710_s24 + $0x4] sm:$0xf] %vm3281_vm8, %v3639_v26  ;;  %v2937_v29 = vmul.f32 %v5604_v56, %v2898_v35 }
 0x20b   : > { %v4183_v47 = vpop.eup %4182  ;;  %v3644_v54 = vpack.c.bf16 %v3127_v21, %v3127_v21  ;;  %v3125_v16 = vmul.f32 %v3093_v62, %v2997_v40  ;;  %v2935_v19 = vmul.f32 %v5604_v56, %v2896_v39  ;;  %v2611_v55 = vpop.f32.mrf.mxu1  ;;  %v2689_v5 = vadd.f32 %v4081_v6, %v5544_v33 }
 0x20c   : > { %v3128_v8 = vmul.f32 %v3096_v14, %v3000_v38  ;;  %v3094_v18 = vadd.f32 1.0, %v4183_v47  ;;  %4194 = verf.f32 %v3037_v61  ;;  %v5760_v50 = vpop.f32.mrf.mxu0  ;;  %v5765_v59 = vadd.f32 %v5612_v4, %v2937_v29 }
 0x20d   : > { %v4185_v9 = vpop.eup %4184  ;;  %3288 = vst.msk [vmem:[%s5710_s24 + $0x18] sm:$0xf] %vm3281_vm8, %v3644_v54  ;;  %v3642_v36 = vpack.c.bf16 %v3125_v16, %v3125_v16  ;;  %v5768_v40 = vadd.f32 %v5612_v4, %v2935_v19  ;;  %v2687_v38 = vadd.f32 %v2608_v32, %v5547_v7  ;;  %v4085_v46 = vpop.f32.mrf.mxu1  ;;  %v2901_v33 = vadd.f32 %v5718_v42, %v2689_v5 }
 0x20e   : > { %v3645_v10 = vpack.c.bf16 %v3128_v8, %v3128_v8  ;;  %v3126_v45 = vmul.f32 %v3094_v18, %v2998_v48  ;;  %v3099_v20 = vadd.f32 1.0, %v4185_v9  ;;  %v5772_v6 = vpop.f32.mrf.mxu0  ;;  %v3001_v58 = vmul.f32 0.5, %v5704_v11 }
 0x20f   : > { %3286 = vst.msk [vmem:[%s5710_s24 + $0x10] sm:$0xf] %vm3281_vm8, %v3642_v36  ;;  %v3004_v34 = vmul.f32 0.5, %v5715_v13  ;;  %v3040_v2 = vmul.f32 0.70710677, %v5765_v59  ;;  %v2624_v7 = vpop.f32.mrf.mxu1  ;;  %v2940_v42 = vmul.f32 %v5604_v56, %v2901_v33  ;;  %v2899_v31 = vadd.f32 %v5728_v12, %v2687_v38 }
 0x210   : > { %v3038_v3 = vmul.f32 0.70710677, %v5768_v40  ;;  %v4187_v32 = vpop.eup %4186  ;;  %3289 = vst.msk [vmem:[%s5710_s24 + $0x1c] sm:$0xf] %vm3281_vm8, %v3645_v10  ;;  %v3643_v48 = vpack.c.bf16 %v3126_v45, %v3126_v45  ;;  %v3131_v35 = vmul.f32 %v3099_v20, %v3003_v44  ;;  %v5784_v26 = vpop.f32.mrf.mxu0  ;;  %v2690_v13 = vadd.f32 %v4082_v27, %v5550_v28 }
 0x211   : > { %v3097_v11 = vadd.f32 1.0, %v4187_v32  ;;  %4196 = verf.f32 %v3040_v2  ;;  %v2688_v21 = vadd.f32 %v2611_v55, %v5553_v22  ;;  %v4086_v62 = vpop.f32.mrf.mxu1  ;;  %v5791_v44 = vadd.f32 %v5612_v4, %v2940_v42 }
 0x212   : > { %v4189_v39 = vpop.eup %4188  ;;  %3287 = vst.msk [vmem:[%s5710_s24 + $0x14] sm:$0xf] %vm3281_vm8, %v3643_v48  ;;  %v3648_v14 = vpack.c.bf16 %v3131_v35, %v3131_v35  ;;  %4198 = verf.f32 %v3038_v3  ;;  %v2938_v12 = vmul.f32 %v5604_v56, %v2899_v31  ;;  %v2902_v54 = vadd.f32 %v5739_v60, %v2690_v13  ;;  %v5796_v16 = vpop.f32.mrf.mxu0 }
 0x213   : > { %v3129_v61 = vmul.f32 %v3097_v11, %v3001_v58  ;;  %v3100_v47 = vadd.f32 1.0, %v4189_v39  ;;  %v2900_v28 = vadd.f32 %v5749_v51, %v2688_v21  ;;  %v2627_v27 = vpop.f32.mrf.mxu1  ;;  %v3002_v29 = vmul.f32 0.5, %v5723_v41 }
 0x214   : > { %v4191_v22 = vpop.eup %4190  ;;  %3292 = vst.msk [vmem:[%s5710_s24 + $0x28] sm:$0xf] %vm3281_vm8, %v3648_v14  ;;  %v3043_v19 = vmul.f32 0.70710677, %v5791_v44  ;;  %v5803_v55 = vadd.f32 %v5612_v4, %v2938_v12  ;;  %v2693_v8 = vadd.f32 %v4085_v46, %v5556_v57  ;;  %v2941_v51 = vmul.f32 %v5604_v56, %v2902_v54  ;;  %v2852_v58 = vpop.f32.mrf.mxu0 }
 0x215   : > { %v3646_v18 = vpack.c.bf16 %v3129_v61, %v3129_v61  ;;  %v3132_v60 = vmul.f32 %v3100_v47, %v3004_v34  ;;  %v3098_v5 = vadd.f32 1.0, %v4191_v22  ;;  %v4089_v9 = vpop.f32.mrf.mxu1  ;;  %v3007_v36 = vmul.f32 0.5, %v5735_v15 }
 0x216   : > { %4200 = verf.f32 %v3043_v19  ;;  %v3041_v38 = vmul.f32 0.70710677, %v5803_v55  ;;  %v2939_v41 = vmul.f32 %v5604_v56, %v2900_v28  ;;  %v5813_v57 = vadd.f32 %v5612_v4, %v2941_v51  ;;  %v5832_v39 = vpop.f32.mrf.mxu0 }
 0x217   : > { %v4193_v10 = vpop.eup %4192  ;;  %3290 = vst.msk [vmem:[%s5710_s24 + $0x20] sm:$0xf] %vm3281_vm8, %v3646_v18  ;;  %v3649_v45 = vpack.c.bf16 %v3132_v60, %v3132_v60  ;;  %v3130_v20 = vmul.f32 %v3098_v5, %v3002_v29  ;;  %v2905_v46 = vadd.f32 %v5753_v30, %v2693_v8  ;;  %v2640_v33 = vpop.f32.mrf.mxu1  ;;  %v2691_v2 = vadd.f32 %v2624_v7, %v5559_v37 }
 0x218   : > { %v3103_v15 = vadd.f32 1.0, %v4193_v10  ;;  %4202 = verf.f32 %v3041_v38  ;;  %v5817_v34 = vadd.f32 %v5612_v4, %v2939_v41  ;;  %v3005_v48 = vmul.f32 0.5, %v5747_v23 }
 0x219   : > { %v4195_v3 = vpop.eup %4194  ;;  %3293 = vst.msk [vmem:[%s5710_s24 + $0x2c] sm:$0xf] %vm3281_vm8, %v3649_v45  ;;  %v3647_v32 = vpack.c.bf16 %v3130_v20, %v3130_v20  ;;  %v3044_v35 = vmul.f32 0.70710677, %v5813_v57  ;;  %v2944_v30 = vmul.f32 %v5604_v56, %v2905_v46  ;;  %v4090_v42 = vpop.f32.mrf.mxu1  ;;  %v3008_v13 = vmul.f32 0.5, %v5765_v59 }
 0x21a   : > { %v3135_v31 = vmul.f32 %v3103_v15, %v3007_v36  ;;  %v3101_v11 = vadd.f32 1.0, %v4195_v3  ;;  %v3042_v21 = vmul.f32 0.70710677, %v5817_v34  ;;  %v2903_v7 = vadd.f32 %v5760_v50, %v2691_v2 }
 0x21b   : > { %3291 = vst.msk [vmem:[%s5710_s24 + $0x24] sm:$0xf] %vm3281_vm8, %v3647_v32  ;;  %4204 = verf.f32 %v3044_v35  ;;  %v2983_v37 = vadd.f32 %v5612_v4, %v2944_v30  ;;  %v2694_v23 = vadd.f32 %v4086_v62, %v5562_v25  ;;  %v2643_v14 = vpop.f32.mrf.mxu1  ;;  %v2692_v59 = vadd.f32 %v2627_v27, %v5565_v17 }
 0x21c   : > { %v3652_v12 = vpack.c.bf16 %v3135_v31, %v3135_v31  ;;  %v3133_v61 = vmul.f32 %v3101_v11, %v3005_v48  ;;  %4206 = verf.f32 %v3042_v21  ;;  %v3006_v47 = vmul.f32 0.5, %v5768_v40 }
 0x21d   : > { %v3047_v54 = vmul.f32 0.70710677, %v2983_v37  ;;  %v2942_v28 = vmul.f32 %v5604_v56, %v2903_v7  ;;  %v2906_v22 = vadd.f32 %v5772_v6, %v2694_v23  ;;  %v4093_v29 = vpop.f32.mrf.mxu1  ;;  %v2904_v62 = vadd.f32 %v5784_v26, %v2692_v59  ;;  %v2855_v6 = vpop.f32.mrf.mxu0 }
 0x21e   : > { %v4197_v50 = vpop.eup %4196  ;;  %3296 = vst.msk [vmem:[%s5710_s24 + $0x38] sm:$0xf] %vm3281_vm8, %v3652_v12  ;;  %v3650_v25 = vpack.c.bf16 %v3133_v61, %v3133_v61  ;;  %v2697_v19 = vadd.f32 %v4089_v9, %v5568_v63  ;;  %v2695_v8 = vadd.f32 %v2640_v33, %v5571_v53  ;;  %v3011_v53 = vmul.f32 0.5, %v5791_v44 }
 0x21f   : > { %v4199_v17 = vpop.eup %4198  ;;  %v3104_v27 = vadd.f32 1.0, %v4197_v50  ;;  %4208 = verf.f32 %v3047_v54  ;;  %v5844_v40 = vadd.f32 %v5612_v4, %v2942_v28  ;;  %v2945_v18 = vmul.f32 %v5604_v56, %v2906_v22  ;;  %v2656_v38 = vpop.f32.mrf.mxu1 }
 0x220   : > { %3294 = vst.msk [vmem:[%s5710_s24 + $0x30] sm:$0xf] %vm3281_vm8, %v3650_v25  ;;  %v3102_v60 = vadd.f32 1.0, %v4199_v17  ;;  %v2943_v5 = vmul.f32 %v5604_v56, %v2904_v62  ;;  %v2909_v26 = vadd.f32 %v5796_v16, %v2697_v19  ;;  %v2907_v51 = vadd.f32 %v2852_v58, %v2695_v8  ;;  %v4127_v58 = vpop.f32.mrf.mxu0 }
 0x221   : > { %v3136_v63 = vmul.f32 %v3104_v27, %v3008_v13  ;;  %v3045_v9 = vmul.f32 0.70710677, %v5844_v40  ;;  %v5854_v36 = vadd.f32 %v5612_v4, %v2945_v18  ;;  %v3009_v44 = vmul.f32 0.5, %v5803_v55  ;;  %v4094_v31 = vpop.f32.mrf.mxu1 }
 0x222   : > { %v3134_v41 = vmul.f32 %v3102_v60, %v3006_v47  ;;  %v5857_v10 = vadd.f32 %v5612_v4, %v2943_v5  ;;  %v2948_v45 = vmul.f32 %v5604_v56, %v2909_v26  ;;  %v2946_v20 = vmul.f32 %v5604_v56, %v2907_v51  ;;  %v2868_v61 = vpop.f32.mrf.mxu0 }
 0x223   : > { %v4201_v16 = vpop.eup %4200  ;;  %v3653_v46 = vpack.c.bf16 %v3136_v63, %v3136_v63  ;;  %4210 = verf.f32 %v3045_v9  ;;  %v3048_v33 = vmul.f32 0.70710677, %v5854_v36  ;;  %v3012_v3 = vmul.f32 0.5, %v5813_v57 }
 0x224   : > { %v3651_v15 = vpack.c.bf16 %v3134_v41, %v3134_v41  ;;  %v3107_v2 = vadd.f32 1.0, %v4201_v16  ;;  %v3046_v32 = vmul.f32 0.70710677, %v5857_v10  ;;  %v5868_v35 = vadd.f32 %v5612_v4, %v2948_v45  ;;  %v4128_v17 = vpop.f32.mrf.mxu0 }
 0x225   : > { %v4203_v48 = vpop.eup %4202  ;;  %3297 = vst.msk [vmem:[%s5710_s24 + $0x3c] sm:$0xf] %vm3281_vm8, %v3653_v46  ;;  %4212 = verf.f32 %v3048_v33  ;;  %v5871_v30 = vadd.f32 %v5612_v4, %v2946_v20  ;;  %v2698_v55 = vadd.f32 %v4090_v42, %v5574_v49  ;;  %v2696_v57 = vadd.f32 %v2643_v14, %v5577_v1 }
 0x226   : > { %3295 = vst.msk [vmem:[%s5710_s24 + $0x34] sm:$0xf] %vm3281_vm8, %v3651_v15  ;;  %v3139_v11 = vmul.f32 %v3107_v2, %v3011_v53  ;;  %v3105_v13 = vadd.f32 1.0, %v4203_v48  ;;  %4214 = verf.f32 %v3046_v32  ;;  %v3010_v21 = vmul.f32 0.5, %v5817_v34 }
 0x227   : > { %v3015_v7 = vmul.f32 0.5, %v2983_v37  ;;  %v3051_v23 = vmul.f32 0.70710677, %v5868_v35  ;;  %v3049_v12 = vmul.f32 0.70710677, %v5871_v30  ;;  %v2910_v42 = vadd.f32 %v5832_v39, %v2698_v55  ;;  %v2659_v37 = vpop.f32.mrf.mxu1 }
 0x228   : > { %v4205_v59 = vpop.eup %4204  ;;  %v3656_v47 = vpack.c.bf16 %v3139_v11, %v3139_v11  ;;  %v3137_v49 = vmul.f32 %v3105_v13, %v3009_v44  ;;  %v2908_v54 = vadd.f32 %v2855_v6, %v2696_v57  ;;  %v2701_v1 = vadd.f32 %v4093_v29, %v5582_v52 }
 0x229   : > { %v4207_v28 = vpop.eup %4206  ;;  %v3108_v22 = vadd.f32 1.0, %v4205_v59  ;;  %4216 = verf.f32 %v3051_v23  ;;  %v2699_v34 = vadd.f32 %v2656_v38, %v5587_v0  ;;  %v2949_v25 = vmul.f32 %v5604_v56, %v2910_v42 }
 0x22a   : > { %3300 = vst.msk [vmem:[%s5710_s24 + $0x48] sm:$0xf] %vm3281_vm8, %v3656_v47  ;;  %v3654_v14 = vpack.c.bf16 %v3137_v49, %v3137_v49  ;;  %v3106_v50 = vadd.f32 1.0, %v4207_v28  ;;  %4218 = verf.f32 %v3049_v12  ;;  %v2947_v39 = vmul.f32 %v5604_v56, %v2908_v54 }
 0x22b   : > { %v3140_v62 = vmul.f32 %v3108_v22, %v3012_v3  ;;  %v2913_v19 = vadd.f32 %v4127_v58, %v2701_v1  ;;  %v2911_v8 = vadd.f32 %v2868_v61, %v2699_v34  ;;  %v5890_v0 = vadd.f32 %v5612_v4, %v2949_v25 }
 0x22c   : > { %v4209_v27 = vpop.eup %4208  ;;  %3298 = vst.msk [vmem:[%s5710_s24 + $0x40] sm:$0xf] %vm3281_vm8, %v3654_v14  ;;  %v3138_v52 = vmul.f32 %v3106_v50, %v3010_v21  ;;  %v2702_v29 = vadd.f32 %v4094_v31, %v5593_v43  ;;  %v2700_v18 = vadd.f32 %v2659_v37, %v5599_v24  ;;  %v5895_v5 = vadd.f32 %v5612_v4, %v2947_v39  ;;  %v2871_v24 = vpop.f32.mrf.mxu0 }
 0x22d   : > { %v3657_v6 = vpack.c.bf16 %v3140_v62, %v3140_v62  ;;  %v3111_v60 = vadd.f32 1.0, %v4209_v27  ;;  %v2952_v26 = vmul.f32 %v5604_v56, %v2913_v19  ;;  %v3052_v63 = vmul.f32 0.70710677, %v5890_v0 }
 0x22e   : > { %v3655_v51 = vpack.c.bf16 %v3138_v52, %v3138_v52  ;;  %v2950_v53 = vmul.f32 %v5604_v56, %v2911_v8  ;;  %v3050_v38 = vmul.f32 0.70710677, %v5895_v5  ;;  %v2914_v20 = vadd.f32 %v4128_v17, %v2702_v29 }
 0x22f   : > { %3301 = vst.msk [vmem:[%s5710_s24 + $0x4c] sm:$0xf] %vm3281_vm8, %v3657_v6  ;;  %v3143_v9 = vmul.f32 %v3111_v60, %v3015_v7  ;;  %v5904_v43 = vadd.f32 %v5612_v4, %v2952_v26  ;;  %4220 = verf.f32 %v3052_v63  ;;  %v2912_v16 = vadd.f32 %v2871_v24, %v2700_v18 }
 0x230   : > { %v4211_v41 = vpop.eup %4210  ;;  %3299 = vst.msk [vmem:[%s5710_s24 + $0x44] sm:$0xf] %vm3281_vm8, %v3655_v51  ;;  %v2989_v45 = vadd.f32 %v5612_v4, %v2950_v53  ;;  %v3013_v44 = vmul.f32 0.5, %v5844_v40  ;;  %4222 = verf.f32 %v3050_v38  ;;  %v2953_v3 = vmul.f32 %v5604_v56, %v2914_v20 }
 0x231   : > { %v3660_v46 = vpack.c.bf16 %v3143_v9, %v3143_v9  ;;  %v3109_v33 = vadd.f32 1.0, %v4211_v41  ;;  %v3055_v15 = vmul.f32 0.70710677, %v5904_v43  ;;  %v3016_v55 = vmul.f32 0.5, %v5854_v36 }
 0x232   : > { %v4213_v58 = vpop.eup %4212  ;;  %v3053_v2 = vmul.f32 0.70710677, %v2989_v45  ;;  %v2951_v11 = vmul.f32 %v5604_v56, %v2912_v16  ;;  %v3014_v40 = vmul.f32 0.5, %v5857_v10  ;;  %v2992_v57 = vadd.f32 %v5612_v4, %v2953_v3 }
 0x233   : > { %v4215_v32 = vpop.eup %4214  ;;  %3304 = vst.msk [vmem:[%s5710_s24 + $0x58] sm:$0xf] %vm3281_vm8, %v3660_v46  ;;  %v3141_v48 = vmul.f32 %v3109_v33, %v3013_v44  ;;  %v3112_v31 = vadd.f32 1.0, %v4213_v58  ;;  %4224 = verf.f32 %v3055_v15  ;;  %v3019_v10 = vmul.f32 0.5, %v5868_v35 }
 0x234   : > { %v3110_v13 = vadd.f32 1.0, %v4215_v32  ;;  %4226 = verf.f32 %v3053_v2  ;;  %v2990_v23 = vadd.f32 %v5612_v4, %v2951_v11  ;;  %v3056_v59 = vmul.f32 0.70710677, %v2992_v57 }
 0x235   : > { %v3658_v21 = vpack.c.bf16 %v3141_v48, %v3141_v48  ;;  %v3144_v7 = vmul.f32 %v3112_v31, %v3016_v55  ;;  %v3017_v54 = vmul.f32 0.5, %v5871_v30  ;;  %v3020_v30 = vmul.f32 0.5, %v5890_v0 }
 0x236   : > { %v4217_v12 = vpop.eup %4216  ;;  %v3142_v61 = vmul.f32 %v3110_v13, %v3014_v40  ;;  %v3054_v49 = vmul.f32 0.70710677, %v2990_v23  ;;  %4228 = verf.f32 %v3056_v59  ;;  %v3018_v50 = vmul.f32 0.5, %v5895_v5 }
 0x237   : > { %v4219_v36 = vpop.eup %4218  ;;  %3302 = vst.msk [vmem:[%s5710_s24 + $0x50] sm:$0xf] %vm3281_vm8, %v3658_v21  ;;  %v3661_v56 = vpack.c.bf16 %v3144_v7, %v3144_v7  ;;  %v3115_v47 = vadd.f32 1.0, %v4217_v12  ;;  %v3023_v27 = vmul.f32 0.5, %v5904_v43  ;;  %v3021_v18 = vmul.f32 0.5, %v2989_v45 }
 0x238   : > { %v3659_v42 = vpack.c.bf16 %v3142_v61, %v3142_v61  ;;  %v3113_v28 = vadd.f32 1.0, %v4219_v36  ;;  %4230 = verf.f32 %v3054_v49  ;;  %v3024_v63 = vmul.f32 0.5, %v2992_v57 }
 0x239   : > { %3305 = vst.msk [vmem:[%s5710_s24 + $0x5c] sm:$0xf] %vm3281_vm8, %v3661_v56  ;;  %v3147_v4 = vmul.f32 %v3115_v47, %v3019_v10  ;;  %v3022_v38 = vmul.f32 0.5, %v2990_v23 }
 0x23a   : > { %3303 = vst.msk [vmem:[%s5710_s24 + $0x54] sm:$0xf] %vm3281_vm8, %v3659_v42  ;;  %v3145_v22 = vmul.f32 %v3113_v28, %v3017_v54 }
 0x23b   : > { %v3664_v1 = vpack.c.bf16 %v3147_v4, %v3147_v4 }
 0x23c   : > { %v3662_v34 = vpack.c.bf16 %v3145_v22, %v3145_v22  ;;  %v4221_v37 = vpop.eup %4220 }
 0x23d   : > { %3308 = vst.msk [vmem:[%s5710_s24 + $0x68] sm:$0xf] %vm3281_vm8, %v3664_v1  ;;  %v4223_v35 = vpop.eup %4222  ;;  %v3116_v14 = vadd.f32 1.0, %v4221_v37 }
 0x23e   : > { %3306 = vst.msk [vmem:[%s5710_s24 + $0x60] sm:$0xf] %vm3281_vm8, %v3662_v34  ;;  %v3114_v25 = vadd.f32 1.0, %v4223_v35 }
 0x23f   : > { %v3148_v62 = vmul.f32 %v3116_v14, %v3020_v30 }
 0x240   : > { %v4225_v39 = vpop.eup %4224  ;;  %v3146_v19 = vmul.f32 %v3114_v25, %v3018_v50 }
 0x241   : > { %v4227_v8 = vpop.eup %4226  ;;  %v3665_v17 = vpack.c.bf16 %v3148_v62, %v3148_v62  ;;  %v3119_v52 = vadd.f32 1.0, %v4225_v39 }
 0x242   : > { %v3663_v29 = vpack.c.bf16 %v3146_v19, %v3146_v19  ;;  %v3117_v6 = vadd.f32 1.0, %v4227_v8 }
 0x243   : > { %3309 = vst.msk [vmem:[%s5710_s24 + $0x6c] sm:$0xf] %vm3281_vm8, %v3665_v17  ;;  %v3151_v0 = vmul.f32 %v3119_v52, %v3023_v27  ;;  %v4229_v60 = vpop.eup %4228 }
 0x244   : > { %3307 = vst.msk [vmem:[%s5710_s24 + $0x64] sm:$0xf] %vm3281_vm8, %v3663_v29  ;;  %v3149_v5 = vmul.f32 %v3117_v6, %v3021_v18  ;;  %v3120_v53 = vadd.f32 1.0, %v4229_v60 }
 0x245   : > { %v4231_v26 = vpop.eup %4230  ;;  %v3668_v51 = vpack.c.bf16 %v3151_v0, %v3151_v0 }
 0x246   : > { %v3666_v9 = vpack.c.bf16 %v3149_v5, %v3149_v5  ;;  %v3118_v43 = vadd.f32 1.0, %v4231_v26  ;;  %v3152_v24 = vmul.f32 %v3120_v53, %v3024_v63 }
 0x247   : > { %3312 = vst.msk [vmem:[%s5710_s24 + $0x78] sm:$0xf] %vm3281_vm8, %v3668_v51 }
 0x248   : > { %3310 = vst.msk [vmem:[%s5710_s24 + $0x70] sm:$0xf] %vm3281_vm8, %v3666_v9  ;;  %v3150_v41 = vmul.f32 %v3118_v43, %v3022_v38  ;;  %v3669_v45 = vpack.c.bf16 %v3152_v24, %v3152_v24 }
 0x24a   : > { %v3667_v20 = vpack.c.bf16 %v3150_v41, %v3150_v41  ;;  %3313 = vst.msk [vmem:[%s5710_s24 + $0x7c] sm:$0xf] %vm3281_vm8, %v3669_v45 }
 0x24c   : > { %3311 = vst.msk [vmem:[%s5710_s24 + $0x74] sm:$0xf] %vm3281_vm8, %v3667_v20 }
 0x24d PF: > { %s14_s15 = sadd.s32 1, %s4238_s15  }
 0x24e   : > { %p11_p5 = scmp.ge.s32.totalorder %s14_s15, 4  }
 0x250   :  { %13 = sbr.rel (!%p11_p5) target bundleno = 1 (0x1), region = 74 }

// kernel: unet_up_forward.9
= control target key start
LH: loop header
LB: loop body
LE: loop exit
PB: predicated region body
PF: predicated region fallthrough
CT: control target
= control target key end

     0   :  { %s4072_s15 = smov 0   ;;  %s5775_s0 = inlined_call_operand.vmem [shape: bf16[2,18,18,8], index: 0, kind: input, shape index: {}]   ;;  %s5776_s1 = inlined_call_operand.vmem [shape: bf16[9,8,8], index: 1, kind: input, shape index: {}]   ;;  %s5777_s2 = inlined_call_operand.vmem [shape: f32[1,8], index: 2, kind: input, shape index: {}]   ;;  %s5778_s3 = inlined_call_operand.vmem [shape: f32[1,8], index: 3, kind: input, shape index: {}]   ;;  %s5779_s4 = inlined_call_operand.vmem [shape: f32[512,8], index: 4, kind: output, shape index: {}]  }
   0x1 LB: > { %s4078_s16 = sadd.s32 4294967295, %s4045_s15   ;;  %p3245_p0 = scmp.ge.s32.totalorder %s4045_s15, 1  ;;  %s4045_s15 = sphi %s4072_s15, %s14_s15  }
   0x2   : > { %p162_p1 = scmp.lt.s32.totalorder %s4045_s15, 3 }
   0x4   : > { %p163_p2 = pnand %p3245_p0, %p162_p1 }
   0x6   : > { %166 = sbr.rel (%p163_p2) target bundleno = 582 (0x246), region = 36 }
   0xb   : > { %v3249_v0 = vld [vmem:[%s5776_s1 + $0x4] sm:$0xf]  ;;  %vm741_vm0 = vcmask 1043456   ;;  %p188_p3 = scmp.lt.s32.totalorder %s4078_s16, 1  ;;  %v254_v2 = vld [vmem:[%s5776_s1] sm:$0xf] }
   0xc   : > { %3939 = vmatprep.subr.msk.bf16.mxu1 %vm741_vm0, %v3249_v0  ;;  %3938 = vmatprep.subr.msk.bf16.mxu0 %vm741_vm0, %v3249_v0  ;;  %v743_v1 = vsel %vm741_vm0, %v3249_v0, 0  ;;  %v3330_v3 = vld [vmem:[%s5776_s1 + $0x8] sm:$0xf]  ;;  %vm255_vm1 = vsmask.f32 3328  ;;  %v4104_v4 = vsel %vm741_vm0, %v254_v2, 0 }
   0xd   : > { %3937 = vmatpush3.bf16.msra.mxu1 %v743_v1  ;;  %3631 = vmatpush3.bf16.msra.mxu0 %v743_v1  ;;  %s189_s21 = scalar_select %p188_p3, %s4078_s16, 1  ;;  %vm256_vm2 = vsmask.f32 7440  ;;  %v4107_v5 = vsel %vm741_vm0, %v3330_v3, 0  ;;  %vm692_vm3 = vcmask 64512   ;;  %v5823_v32 = vmov 0 }
   0xe   : > { %3940 = vmatprep.subr.msk.bf16.mxu1 %vm741_vm0, %v254_v2  ;;  %3941 = vmatprep.subr.msk.bf16.mxu0 %vm741_vm0, %v3330_v3  ;;  %vm4146_vm4 = vmor %vm255_vm1, %vm256_vm2  ;;  %vm1214_vm5 = vcmask 1042432   ;;  %vm1215_vm6 = vcmask 1046532   ;;  %s3247_s20 = sshll.u32 %s4078_s16, 5 }
   0xf   : > { %s3948_s24 = smul.u32 216, %s189_s21  ;;  %v5824_v32 = vsel %vm4146_vm4, 4294967295, %v5823_v32  ;;  %vm4469_vm7 = vmor %vm1214_vm5, %vm1215_vm6  ;;  %p5499_p4 = scmp.lt.s32.totalorder %s3247_s20, 63 }
  0x10   : > { %5825 = vst [vmem:[#allocation2_spill] sm:$0xff] %v5824_v32 }
  0x11   : > { %s4101_s27 = scalar_lea.vmem %s5775_s0, %s3948_s24  ;;  %s5950_s20 = smov (!%p5499_p4, %s3247_s20), 63 }
  0x12   : > { %v4110_v6 = vld [vmem:[%s4101_s27] sm:$0xf]  ;;  %v4113_v7 = vld [vmem:[%s4101_s27 + $0x4] sm:$0xf]  ;;  %v4116_v8 = vld [vmem:[%s4101_s27 + $0x8] sm:$0x1] }
  0x13   : > { %v259_v9 = vshrl.u32 %v4110_v6, 16  ;;  %v262_v10 = vshll.u32 %v4110_v6, 16  ;;  %v268_v11 = vshll.u32 %v4113_v7, 16  ;;  %v272_v12 = vshrl.u32 %v4113_v7, 16  ;;  %v4123_v13 = vld [vmem:[%s4101_s27 + $0x60] sm:$0xf] }
  0x14   : > { %v278_v14 = vshll.u32 %v4116_v8, 16  ;;  %v4128_v16 = vld [vmem:[%s4101_s27 + $0x64] sm:$0xf]  ;;  %v4131_v17 = vld [vmem:[%s4101_s27 + $0x68] sm:$0x1]  ;;  %v451_v23 = vshrl.u32 %v4123_v13, 16 }
  0x15   : > { %v261_v18 = vrot.slane %v259_v9, 4  ;;  %v264_v19 = vrot.slane %v262_v10, 5  ;;  %v270_v20 = vrot.slane %v268_v11, 5  ;;  %v274_v21 = vrot.slane %v272_v12, 4  ;;  %v4139_v30 = vld [vmem:[%s4101_s27 + $0xc] sm:$0xf] }
  0x16   : > { %v280_v22 = vrot.slane %v278_v14, 5  ;;  %v454_v24 = vshll.u32 %v4123_v13, 16  ;;  %v460_v25 = vshll.u32 %v4128_v16, 16  ;;  %v464_v28 = vshrl.u32 %v4128_v16, 16  ;;  %v4142_v31 = vld [vmem:[%s4101_s27 + $0x10] sm:$0xf] }
  0x17   : > { %v265_v26 = vor.u32 %v264_v19, %v261_v18  ;;  %v275_v27 = vor.u32 %v274_v21, %v270_v20  ;;  %v470_v29 = vshll.u32 %v4131_v17, 16  ;;  %v453_v33 = vrot.slane %v451_v23, 4  ;;  %v4153_v42 = vld [vmem:[%s4101_s27 + $0x14] sm:$0x1]  ;;  %v4164_v54 = vld [vmem:[%s4101_s27 + $0x6c] sm:$0xf] }
  0x18   : > { %v456_v34 = vrot.slane %v454_v24, 5  ;;  %v462_v35 = vrot.slane %v460_v25, 5  ;;  %v466_v39 = vrot.slane %v464_v28, 4  ;;  %v283_v43 = vshrl.u32 %v4139_v30, 16  ;;  %5826 = vst [vmem:[#allocation3_spill] sm:$0xff] %v4164_v54  ;;  %s3248_s16 = sshll.u32 %s5950_s20, 3 }
  0x19   : > { %v266_v37 = vrot.slane %v265_v26, 4  ;;  %v276_v38 = vrot.slane %v275_v27, 4  ;;  %v472_v40 = vrot.slane %v470_v29, 5  ;;  %v286_v44 = vshll.u32 %v4139_v30, 16  ;;  %v4168_v59 = vld [vmem:[%s4101_s27 + $0x70] sm:$0xf]  ;;  %s5559_s24 = scalar_lea.vmem %s5779_s4, %s3248_s16 }
  0x1a   : > { %v457_v41 = vor.u32 %v456_v34, %v453_v33  ;;  %v292_v45 = vshll.u32 %v4142_v31, 16  ;;  %v467_v48 = vor.u32 %v466_v39, %v462_v35  ;;  %v296_v49 = vshrl.u32 %v4142_v31, 16  ;;  %v4176_v0 = vld [vmem:[%s4101_s27 + $0x74] sm:$0x1]  ;;  %v4182_v10 = vld [vmem:[%s4101_s27 + $0x18] sm:$0xf] }
  0x1b   : > { %v271_v46 = vsel %vm4146_vm4, %v266_v37, %v270_v20  ;;  %v281_v47 = vsel %vm4146_vm4, %v276_v38, %v280_v22  ;;  %v285_v52 = vrot.slane %v283_v43, 4  ;;  %v288_v53 = vrot.slane %v286_v44, 5  ;;  %5827 = vst [vmem:[#allocation4_spill] sm:$0xff] %v4176_v0  ;;  %v4191_v23 = vld [vmem:[%s4101_s27 + $0x1c] sm:$0xf] }
  0x1c   : > { %v3250_v50 = vcombine.low %v271_v46, %v281_v47  ;;  %v458_v51 = vrot.slane %v457_v41, 4  ;;  %v468_v55 = vrot.slane %v467_v48, 4  ;;  %v294_v56 = vrot.slane %v292_v45, 5  ;;  %v4198_v27 = vld [vmem:[%s4101_s27 + $0x20] sm:$0x1] }
  0x1d   : > { %v298_v57 = vrot.slane %v296_v49, 4  ;;  %v302_v58 = vshll.u32 %v4153_v42, 16  ;;  %v289_v61 = vor.u32 %v288_v53, %v285_v52  ;;  %v475_v9 = vshrl.u32 %v4164_v54, 16  ;;  %v4205_v37 = vld [vmem:[%s4101_s27 + $0x78] sm:$0xf] }
  0x1e   : > { %3632 = vmatprep.mubr.msk.bf16.mxu0 %vm692_vm3, %v3250_v50  ;;  %v463_v60 = vsel %vm4146_vm4, %v458_v51, %v462_v35  ;;  %v473_v1 = vsel %vm4146_vm4, %v468_v55, %v472_v40  ;;  %v478_v14 = vshll.u32 %v4164_v54, 16  ;;  %v484_v18 = vshll.u32 %v4168_v59, 16  ;;  %5829 = vst [vmem:[#allocation6_spill] sm:$0xff] %v4205_v37  ;;  %v4213_v43 = vld [vmem:[%s5776_s1 + $0x10] sm:$0xf] }
  0x1f   : > { %v299_v2 = vor.u32 %v298_v57, %v294_v56  ;;  %v304_v3 = vrot.slane %v302_v58, 5  ;;  %v4184_v11 = vcombine.low %v463_v60, %v473_v1  ;;  %v290_v12 = vrot.slane %v289_v61, 4  ;;  %v4218_v48 = vld [vmem:[%s4101_s27 + $0x7c] sm:$0xf]  ;;  %v4226_v58 = vld [vmem:[%s4101_s27 + $0x80] sm:$0x1] }
  0x20   : > { %v477_v20 = vrot.slane %v475_v9, 4  ;;  %v488_v21 = vshrl.u32 %v4168_v59, 16  ;;  %v494_v22 = vshll.u32 %v4176_v0, 16  ;;  %v480_v25 = vrot.slane %v478_v14, 5  ;;  %5831 = vst [vmem:[#allocation8_spill] sm:$0xff] %v4218_v48  ;;  %5832 = vst [vmem:[#allocation9_spill] sm:$0xff] %v4226_v58 }
  0x21   : > { %5828 = vst [vmem:[#allocation5_spill] sm:$0xff] %v4184_v11  ;;  %v300_v19 = vrot.slane %v299_v2, 4  ;;  %3648 = vmatprep.mubr.msk.bf16.mxu1 %vm692_vm3, %v4184_v11  ;;  %v295_v24 = vsel %vm4146_vm4, %v290_v12, %v294_v56  ;;  %v486_v26 = vrot.slane %v484_v18, 5  ;;  %v307_v28 = vshrl.u32 %v4182_v10, 16  ;;  %v4240_v18 = vld [vmem:[%s4101_s27 + $0x28] sm:$0xf] }
  0x22   : > { %v490_v33 = vrot.slane %v488_v21, 4  ;;  %v496_v34 = vrot.slane %v494_v22, 5  ;;  %v310_v35 = vshll.u32 %v4182_v10, 16  ;;  %v481_v39 = vor.u32 %v480_v25, %v477_v20 }
  0x23   : > { %v305_v29 = vsel %vm4146_vm4, %v300_v19, %v304_v3  ;;  %v309_v40 = vrot.slane %v307_v28, 4  ;;  %v316_v41 = vshll.u32 %v4191_v23, 16  ;;  %v320_v46 = vshrl.u32 %v4191_v23, 16  ;;  %v4232_v3 = vld [vmem:[%s4101_s27 + $0x24] sm:$0xf] }
  0x24   : > { %v4207_v38 = vcombine.low %v295_v24, %v305_v29  ;;  %v491_v44 = vor.u32 %v490_v33, %v486_v26  ;;  %v312_v45 = vrot.slane %v310_v35, 5  ;;  %v326_v47 = vshll.u32 %v4198_v27, 16  ;;  %v4248_v24 = vld [vmem:[%s5776_s1 + $0xc] sm:$0xf] }
  0x25   : > { %v482_v49 = vrot.slane %v481_v39, 4  ;;  %v318_v50 = vrot.slane %v316_v41, 5  ;;  %v499_v51 = vshrl.u32 %v4205_v37, 16  ;;  %v502_v52 = vshll.u32 %v4205_v37, 16  ;;  %v4253_v29 = vld [vmem:[%s4101_s27 + $0x2c] sm:$0x1] }
  0x26   : > { %5830 = vst [vmem:[#allocation7_spill] sm:$0xff] %v4207_v38  ;;  %3633 = vmatmul.mubr.msk.bf16.vlgmr.msra.gmra.mxu0 %vm692_vm3, %v4207_v38  ;;  %v492_v53 = vrot.slane %v491_v44, 4  ;;  %v313_v55 = vor.u32 %v312_v45, %v309_v40  ;;  %v322_v56 = vrot.slane %v320_v46, 4  ;;  %v328_v57 = vrot.slane %v326_v47, 5  ;;  %v4261_v41 = vld [vmem:[%s4101_s27 + $0x84] sm:$0xf] }
  0x27   : > { %3699 = vmatpush3.bf16.msra.mxu0 %v4107_v5  ;;  %v487_v60 = vsel %vm4146_vm4, %v482_v49, %v486_v26  ;;  %v501_v61 = vrot.slane %v499_v51, 4  ;;  %v504_v1 = vrot.slane %v502_v52, 5  ;;  %v508_v2 = vshll.u32 %v4218_v48, 16  ;;  %v4268_v49 = vld [vmem:[%s4101_s27 + $0x88] sm:$0xf] }
  0x28   : > { %3943 = vmatprep.subr.msk.bf16.mxu0 %vm741_vm0, %v4213_v43  ;;  %v497_v5 = vsel %vm4146_vm4, %v492_v53, %v496_v34  ;;  %v314_v9 = vrot.slane %v313_v55, 4  ;;  %v323_v12 = vor.u32 %v322_v56, %v318_v50  ;;  %v512_v14 = vshrl.u32 %v4218_v48, 16  ;;  %v4408_v38 = vld [vmem:[%s4101_s27 + $0xb0] sm:$0x1]  ;;  %v4430_v48 = vld [vmem:[%s4101_s27 + $0x5c] sm:$0x1] }
  0x29   : > { %v4242_v19 = vcombine.low %v487_v60, %v497_v5  ;;  %v505_v20 = vor.u32 %v504_v1, %v501_v61  ;;  %v510_v21 = vrot.slane %v508_v2, 5  ;;  %v518_v22 = vshll.u32 %v4226_v58, 16  ;;  %5844 = vst [vmem:[#allocation21_spill] sm:$0xff] %v4408_v38 }
  0x2a   : > { %v319_v25 = vsel %vm4146_vm4, %v314_v9, %v318_v50  ;;  %v324_v26 = vrot.slane %v323_v12, 4  ;;  %v514_v28 = vrot.slane %v512_v14, 4  ;;  %v331_v33 = vshrl.u32 %v4232_v3, 16  ;;  %v4287_v9 = vld [vmem:[%s4101_s27 + $0x30] sm:$0xf] }
  0x2b   : > { %5833 = vst [vmem:[#allocation10_spill] sm:$0xff] %v4242_v19  ;;  %3649 = vmatmul.mubr.msk.bf16.vlgmr.msra.gmra.mxu1 %vm692_vm3, %v4242_v19  ;;  %v506_v34 = vrot.slane %v505_v20, 4  ;;  %v520_v35 = vrot.slane %v518_v22, 5  ;;  %v334_v39 = vshll.u32 %v4232_v3, 16  ;;  %v340_v40 = vshll.u32 %v4240_v18, 16 }
  0x2c   : > { %3665 = vmatpush3.bf16.msra.mxu1 %v4104_v4  ;;  %v329_v44 = vsel %vm4146_vm4, %v324_v26, %v328_v57  ;;  %v515_v45 = vor.u32 %v514_v28, %v510_v21  ;;  %v333_v46 = vrot.slane %v331_v33, 4  ;;  %v344_v47 = vshrl.u32 %v4240_v18, 16  ;;  %v4278_v57 = vld [vmem:[%s4101_s27 + $0x8c] sm:$0x1]  ;;  %v4292_v22 = vld [vmem:[%s4101_s27 + $0x34] sm:$0xf] }
  0x2d   : > { %v4270_v50 = vcombine.low %v319_v25, %v329_v44  ;;  %v511_v51 = vsel %vm4146_vm4, %v506_v34, %v510_v21  ;;  %v336_v52 = vrot.slane %v334_v39, 5  ;;  %v342_v53 = vrot.slane %v340_v40, 5  ;;  %3942 = vmatprep.subr.msk.bf16.mxu1 %vm741_vm0, %v4248_v24 }
  0x2e   : > { %v516_v4 = vrot.slane %v515_v45, 4  ;;  %v346_v55 = vrot.slane %v344_v47, 4  ;;  %v350_v56 = vshll.u32 %v4253_v29, 16  ;;  %v523_v60 = vshrl.u32 %v4261_v41, 16 }
  0x2f   : > { %5834 = vst [vmem:[#allocation11_spill] sm:$0xff] %v4270_v50  ;;  %3636 = vmatprep.mubr.msk.bf16.mxu0 %vm692_vm3, %v4270_v50  ;;  %v337_v61 = vor.u32 %v336_v52, %v333_v46  ;;  %v526_v1 = vshll.u32 %v4261_v41, 16  ;;  %v532_v2 = vshll.u32 %v4268_v49, 16  ;;  %v536_v5 = vshrl.u32 %v4268_v49, 16  ;;  %v4303_v46 = vld [vmem:[%s4101_s27 + $0x38] sm:$0x1] }
  0x30   : > { %v521_v12 = vsel %vm4146_vm4, %v516_v4, %v520_v35  ;;  %v347_v14 = vor.u32 %v346_v55, %v342_v53  ;;  %v352_v20 = vrot.slane %v350_v56, 5  ;;  %v525_v21 = vrot.slane %v523_v60, 4  ;;  %v4308_v52 = vld [vmem:[%s4101_s27 + $0x90] sm:$0xf] }
  0x31   : > { %v4294_v25 = vcombine.low %v511_v51, %v521_v12  ;;  %v338_v26 = vrot.slane %v337_v61, 4  ;;  %v528_v28 = vrot.slane %v526_v1, 5  ;;  %v534_v33 = vrot.slane %v532_v2, 5  ;;  %v4313_v61 = vld [vmem:[%s4101_s27 + $0x94] sm:$0xf] }
  0x32   : > { %v348_v34 = vrot.slane %v347_v14, 4  ;;  %v538_v39 = vrot.slane %v536_v5, 4  ;;  %v542_v40 = vshll.u32 %v4278_v57, 16  ;;  %v355_v44 = vshrl.u32 %v4287_v9, 16 }
  0x33   : > { %5835 = vst [vmem:[#allocation12_spill] sm:$0xff] %v4294_v25  ;;  %3652 = vmatprep.mubr.msk.bf16.mxu1 %vm692_vm3, %v4294_v25  ;;  %v343_v35 = vsel %vm4146_vm4, %v338_v26, %v342_v53  ;;  %v529_v45 = vor.u32 %v528_v28, %v525_v21  ;;  %v358_v47 = vshll.u32 %v4287_v9, 16  ;;  %v364_v51 = vshll.u32 %v4292_v22, 16  ;;  %v4359_v25 = vld [vmem:[%s4101_s27 + $0xa0] sm:$0xf] }
  0x34   : > { %v353_v4 = vsel %vm4146_vm4, %v348_v34, %v352_v20  ;;  %v539_v55 = vor.u32 %v538_v39, %v534_v33  ;;  %v544_v56 = vrot.slane %v542_v40, 5  ;;  %v357_v60 = vrot.slane %v355_v44, 4  ;;  %v4325_v34 = vld [vmem:[%s4101_s27 + $0x98] sm:$0x1]  ;;  %v4330_v44 = vld [vmem:[%s4101_s27 + $0x3c] sm:$0xf] }
  0x35   : > { %v4315_v53 = vcombine.low %v343_v35, %v353_v4  ;;  %v530_v1 = vrot.slane %v529_v45, 4  ;;  %v360_v2 = vrot.slane %v358_v47, 5  ;;  %v366_v5 = vrot.slane %v364_v51, 5  ;;  %v4335_v4 = vld [vmem:[%s4101_s27 + $0x40] sm:$0xf] }
  0x36   : > { %v540_v12 = vrot.slane %v539_v55, 4  ;;  %v368_v14 = vshrl.u32 %v4292_v22, 16  ;;  %v374_v21 = vshll.u32 %v4303_v46, 16  ;;  %v547_v20 = vshrl.u32 %v4308_v52, 16 }
  0x37   : > { %5836 = vst [vmem:[#allocation13_spill] sm:$0xff] %v4315_v53  ;;  %3637 = vmatmul.mubr.msk.bf16.gmra.mxu0 %vm692_vm3, %v4315_v53  ;;  %v535_v26 = vsel %vm4146_vm4, %v530_v1, %v534_v33  ;;  %v361_v28 = vor.u32 %v360_v2, %v357_v60  ;;  %v550_v39 = vshll.u32 %v4308_v52, 16  ;;  %v556_v40 = vshll.u32 %v4313_v61, 16 }
  0x38   : > { %v545_v35 = vsel %vm4146_vm4, %v540_v12, %v544_v56  ;;  %v370_v45 = vrot.slane %v368_v14, 4  ;;  %v376_v47 = vrot.slane %v374_v21, 5  ;;  %v549_v51 = vrot.slane %v547_v20, 4  ;;  %v4347_v14 = vld [vmem:[%s4101_s27 + $0x44] sm:$0x1] }
  0x39   : > { %v4337_v33 = vcombine.low %v535_v26, %v545_v35  ;;  %v362_v55 = vrot.slane %v361_v28, 4  ;;  %v552_v60 = vrot.slane %v550_v39, 5  ;;  %v558_v1 = vrot.slane %v556_v40, 5  ;;  %v4352_v26 = vld [vmem:[%s4101_s27 + $0x9c] sm:$0xf] }
  0x3a   : > { %v371_v2 = vor.u32 %v370_v45, %v366_v5  ;;  %v560_v36 = vshrl.u32 %v4313_v61, 16  ;;  %v566_v63 = vshll.u32 %v4325_v34, 16  ;;  %v379_v15 = vshrl.u32 %v4330_v44, 16 }
  0x3b   : > { %5837 = vst [vmem:[#allocation14_spill] sm:$0xff] %v4337_v33  ;;  %3653 = vmatmul.mubr.msk.bf16.gmra.mxu1 %vm692_vm3, %v4337_v33  ;;  %v367_v56 = vsel %vm4146_vm4, %v362_v55, %v366_v5  ;;  %v553_v12 = vor.u32 %v552_v60, %v549_v51  ;;  %v382_v21 = vshll.u32 %v4330_v44, 16  ;;  %v388_v20 = vshll.u32 %v4335_v4, 16 }
  0x3c   : > { %v372_v28 = vrot.slane %v371_v2, 4  ;;  %v562_v39 = vrot.slane %v560_v36, 4  ;;  %v568_v40 = vrot.slane %v566_v63, 5  ;;  %v381_v35 = vrot.slane %v379_v15, 4 }
  0x3d   : > { %v554_v45 = vrot.slane %v553_v12, 4  ;;  %v384_v62 = vrot.slane %v382_v21, 5  ;;  %v390_v33 = vrot.slane %v388_v20, 5  ;;  %v392_v5 = vshrl.u32 %v4335_v4, 16  ;;  %v4367_v21 = vld [vmem:[%s4101_s27 + $0xa4] sm:$0x1] }
  0x3e   : > { %v377_v51 = vsel %vm4146_vm4, %v372_v28, %v376_v47  ;;  %v563_v55 = vor.u32 %v562_v39, %v558_v1  ;;  %v398_v60 = vshll.u32 %v4347_v14, 16  ;;  %v571_v2 = vshrl.u32 %v4352_v26, 16  ;;  %5839 = vst [vmem:[#allocation16_spill] sm:$0xff] %v4367_v21  ;;  %v4370_v20 = vld [vmem:[%s4101_s27 + $0x48] sm:$0xf] }
  0x3f   : > { %v4362_v36 = vcombine.low %v367_v56, %v377_v51  ;;  %v559_v15 = vsel %vm4146_vm4, %v554_v45, %v558_v1  ;;  %v385_v63 = vor.u32 %v384_v62, %v381_v35  ;;  %v394_v12 = vrot.slane %v392_v5, 4 }
  0x40   : > { %v564_v47 = vrot.slane %v563_v55, 4  ;;  %v400_v28 = vrot.slane %v398_v60, 5  ;;  %v573_v39 = vrot.slane %v571_v2, 4  ;;  %v574_v19 = vshll.u32 %v4352_v26, 16  ;;  %v4381_v55 = vld [vmem:[%s4101_s27 + $0x4c] sm:$0xf] }
  0x41   : > { %5838 = vst [vmem:[#allocation15_spill] sm:$0xff] %v4362_v36  ;;  %3640 = vmatprep.mubr.msk.bf16.mxu0 %vm692_vm3, %v4362_v36  ;;  %v386_v56 = vrot.slane %v385_v63, 4  ;;  %v395_v51 = vor.u32 %v394_v12, %v390_v33  ;;  %v580_v1 = vshll.u32 %v4359_v25, 16  ;;  %v584_v62 = vshrl.u32 %v4359_v25, 16  ;;  %v4389_v36 = vld [vmem:[%s4101_s27 + $0x50] sm:$0x1] }
  0x42   : > { %v569_v35 = vsel %vm4146_vm4, %v564_v47, %v568_v40  ;;  %v576_v45 = vrot.slane %v574_v19, 5  ;;  %v590_v5 = vshll.u32 %v4367_v21, 16  ;;  %v403_v60 = vshrl.u32 %v4370_v20, 16  ;;  %v4392_v47 = vld [vmem:[%s4101_s27 + $0xa8] sm:$0xf] }
  0x43   : > { %v4384_v2 = vcombine.low %v559_v15, %v569_v35  ;;  %v391_v63 = vsel %vm4146_vm4, %v386_v56, %v390_v33  ;;  %v396_v12 = vrot.slane %v395_v51, 4  ;;  %v582_v11 = vrot.slane %v580_v1, 5  ;;  %5841 = vst [vmem:[#allocation18_spill] sm:$0xff] %v4392_v47 }
  0x44   : > { %v577_v53 = vor.u32 %v576_v45, %v573_v39  ;;  %v586_v50 = vrot.slane %v584_v62, 4  ;;  %v592_v40 = vrot.slane %v590_v5, 5  ;;  %v405_v19 = vrot.slane %v403_v60, 4  ;;  %v4405_v45 = vld [vmem:[%s4101_s27 + $0xac] sm:$0xf] }
  0x45   : > { %5840 = vst [vmem:[#allocation17_spill] sm:$0xff] %v4384_v2  ;;  %3656 = vmatprep.mubr.msk.bf16.mxu1 %vm692_vm3, %v4384_v2  ;;  %v401_v15 = vsel %vm4146_vm4, %v396_v12, %v400_v28  ;;  %v406_v33 = vshll.u32 %v4370_v20, 16  ;;  %v412_v56 = vshll.u32 %v4381_v55, 16  ;;  %v416_v51 = vshrl.u32 %v4381_v55, 16  ;;  %5843 = vst [vmem:[#allocation20_spill] sm:$0xff] %v4405_v45 }
  0x46   : > { %v4401_v1 = vcombine.low %v391_v63, %v401_v15  ;;  %v578_v39 = vrot.slane %v577_v53, 4  ;;  %v587_v62 = vor.u32 %v586_v50, %v582_v11  ;;  %v422_v35 = vshll.u32 %v4389_v36, 16 }
  0x47   : > { %v408_v5 = vrot.slane %v406_v33, 5  ;;  %v414_v60 = vrot.slane %v412_v56, 5  ;;  %v418_v2 = vrot.slane %v416_v51, 4  ;;  %v595_v28 = vshrl.u32 %v4392_v47, 16  ;;  %v4418_v51 = vld [vmem:[%s4101_s27 + $0x54] sm:$0xf] }
  0x48   : > { %5842 = vst [vmem:[#allocation19_spill] sm:$0xff] %v4401_v1  ;;  %3641 = vmatmul.mubr.msk.bf16.gmra.mxu0 %vm692_vm3, %v4401_v1  ;;  %v583_v53 = vsel %vm4146_vm4, %v578_v39, %v582_v11  ;;  %v588_v50 = vrot.slane %v587_v62, 4  ;;  %v424_v63 = vrot.slane %v422_v35, 5  ;;  %v598_v12 = vshll.u32 %v4392_v47, 16  ;;  %v4425_v62 = vld [vmem:[%s4101_s27 + $0x58] sm:$0xf] }
  0x49   : > { %v409_v15 = vor.u32 %v408_v5, %v405_v19  ;;  %v419_v58 = vor.u32 %v418_v2, %v414_v60  ;;  %v597_v33 = vrot.slane %v595_v28, 4  ;;  %v604_v56 = vshll.u32 %v4405_v45, 16 }
  0x4a   : > { %v593_v1 = vsel %vm4146_vm4, %v588_v50, %v592_v40  ;;  %v600_v37 = vrot.slane %v598_v12, 5  ;;  %v608_v11 = vshrl.u32 %v4405_v45, 16  ;;  %v614_v39 = vshll.u32 %v4408_v38, 16 }
  0x4b   : > { %v4427_v2 = vcombine.low %v583_v53, %v593_v1  ;;  %v410_v19 = vrot.slane %v409_v15, 4  ;;  %v420_v35 = vrot.slane %v419_v58, 4  ;;  %v606_v5 = vrot.slane %v604_v56, 5 }
  0x4c   : > { %v601_v28 = vor.u32 %v600_v37, %v597_v33  ;;  %v610_v0 = vrot.slane %v608_v11, 4  ;;  %v616_v54 = vrot.slane %v614_v39, 5  ;;  %v427_v40 = vshrl.u32 %v4418_v51, 16  ;;  %v4442_v37 = vld [vmem:[%s4101_s27 + $0xb4] sm:$0xf] }
  0x4d   : > { %5845 = vst [vmem:[#allocation22_spill] sm:$0xff] %v4427_v2  ;;  %3657 = vmatmul.mubr.msk.bf16.gmra.mxu1 %vm692_vm3, %v4427_v2  ;;  %v415_v50 = vsel %vm4146_vm4, %v410_v19, %v414_v60  ;;  %v425_v1 = vsel %vm4146_vm4, %v420_v35, %v424_v63  ;;  %v430_v58 = vshll.u32 %v4418_v51, 16  ;;  %v436_v53 = vshll.u32 %v4425_v62, 16  ;;  %5846 = vst [vmem:[#allocation23_spill] sm:$0xff] %v4442_v37  ;;  %v4447_v11 = vld [vmem:[%s4101_s27 + $0xb8] sm:$0xf] }
  0x4e   : > { %v4444_v12 = vcombine.low %v415_v50, %v425_v1  ;;  %v602_v15 = vrot.slane %v601_v28, 4  ;;  %v611_v33 = vor.u32 %v610_v0, %v606_v5  ;;  %v429_v56 = vrot.slane %v427_v40, 4 }
  0x4f   : > { %v432_v39 = vrot.slane %v430_v58, 5  ;;  %v438_v2 = vrot.slane %v436_v53, 5  ;;  %v440_v60 = vshrl.u32 %v4425_v62, 16  ;;  %v446_v63 = vshll.u32 %v4430_v48, 16  ;;  %v4458_v58 = vld [vmem:[%s4101_s27 + $0xbc] sm:$0x1] }
  0x50   : > { %5847 = vst [vmem:[#allocation24_spill] sm:$0xff] %v4444_v12  ;;  %3644 = vmatprep.mubr.msk.bf16.mxu0 %vm692_vm3, %v4444_v12  ;;  %v607_v19 = vsel %vm4146_vm4, %v602_v15, %v606_v5  ;;  %v612_v35 = vrot.slane %v611_v33, 4  ;;  %v619_v28 = vshrl.u32 %v4442_v37, 16  ;;  %v622_v0 = vshll.u32 %v4442_v37, 16 }
  0x51   : > { %v433_v40 = vor.u32 %v432_v39, %v429_v56  ;;  %v442_v50 = vrot.slane %v440_v60, 4  ;;  %v448_v1 = vrot.slane %v446_v63, 5  ;;  %v628_v53 = vshll.u32 %v4447_v11, 16 }
  0x52   : > { %v617_v38 = vsel %vm4146_vm4, %v612_v35, %v616_v54  ;;  %v621_v47 = vrot.slane %v619_v28, 4  ;;  %v624_v12 = vrot.slane %v622_v0, 5  ;;  %v632_v45 = vshrl.u32 %v4447_v11, 16 }
  0x53   : > { %v4464_v5 = vcombine.low %v607_v19, %v617_v38  ;;  %v434_v15 = vrot.slane %v433_v40, 4  ;;  %v443_v33 = vor.u32 %v442_v50, %v438_v2  ;;  %v630_v21 = vrot.slane %v628_v53, 5 }
  0x54   : > { %v625_v37 = vor.u32 %v624_v12, %v621_v47  ;;  %v634_v56 = vrot.slane %v632_v45, 4  ;;  %v638_v39 = vshll.u32 %v4458_v58, 16  ;;  %v3314_v54 = vrot.slane %v4110_v6, 9 }
  0x55   : > { %3660 = vmatprep.mubr.msk.bf16.mxu1 %vm692_vm3, %v4464_v5  ;;  %v439_v38 = vsel %vm4146_vm4, %v434_v15, %v438_v2  ;;  %v444_v63 = vrot.slane %v443_v33, 4  ;;  %v1219_v47 = vrot.slane %v4113_v7, 5  ;;  %v4481_v45 = vcombine.low %v4139_v30, %v4142_v31 }
  0x56   : > { %v626_v12 = vrot.slane %v625_v37, 4  ;;  %v635_v19 = vor.u32 %v634_v56, %v630_v21  ;;  %v640_v35 = vrot.slane %v638_v39, 5  ;;  %v3315_v28 = vrot.slane %v4139_v30, 9 }
  0x57   : > { %v449_v0 = vsel %vm4146_vm4, %v444_v63, %v448_v1  ;;  %v1220_v40 = vsel %vm4469_vm7, %v3314_v54, %v1219_v47  ;;  %v1221_v50 = vrot.slane %v1219_v47, 4  ;;  %v5850_v2 = vrot.slane %v4142_v31, 5 }
  0x58   : > { %v4490_v15 = vcombine.low %v439_v38, %v449_v0  ;;  %v631_v33 = vsel %vm4146_vm4, %v626_v12, %v630_v21  ;;  %v636_v37 = vrot.slane %v635_v19, 4  ;;  %v5852_v1 = vrot.slane %v4116_v8, 5 }
  0x59   : > { %v1228_v53 = vrot.slane %v5850_v2, 4  ;;  %v5851_v56 = vmov %v5850_v2  ;;  %v5853_v54 = vrot.slane %v4153_v42, 5  ;;  %v4508_v63 = vcombine.low %v4182_v10, %v4191_v23 }
  0x5a   : > { %v1227_v30 = vsel %vm4469_vm7, %v3315_v28, %v5851_v56  ;;  %v1223_v39 = vsel %vm4469_vm7, %v1221_v50, %v5852_v1  ;;  %v3316_v21 = vrot.slane %v4182_v10, 9  ;;  %3645 = vmatmul.mubr.msk.bf16.gmra.mxu0 %vm692_vm3, %v4490_v15  ;;  %v641_v8 = vsel %vm4146_vm4, %v636_v37, %v640_v35 }
  0x5b   : > { %v1230_v38 = vsel %vm4469_vm7, %v1228_v53, %v5853_v54  ;;  %v3331_v31 = vcombine.low %v1220_v40, %v1223_v39  ;;  %v1233_v42 = vrot.slane %v4191_v23, 5  ;;  %v4518_v12 = vcombine.low %v631_v33, %v641_v8 }
  0x5c   : > { %v4515_v47 = vcombine.low %v1227_v30, %v1230_v38  ;;  %v1236_v19 = vrot.slane %v4198_v27, 5  ;;  %v1240_v0 = vrot.slane %v4240_v18, 5  ;;  %v3317_v35 = vrot.slane %v4232_v3, 9 }
  0x5d   : > { %5854 = vst [vmem:[#allocation25_spill] sm:$0xff] %v4518_v12  ;;  %3700 = vmatprep.mubr.msk.bf16.mxu0 %vm692_vm3, %v3331_v31  ;;  %v1234_v10 = vsel %vm4469_vm7, %v3316_v21, %v1233_v42  ;;  %v1235_v28 = vrot.slane %v1233_v42, 4  ;;  %3661 = vmatmul.mubr.msk.bf16.gmra.mxu1 %vm692_vm3, %v4518_v12  ;;  %v3318_v40 = vrot.slane %v4287_v9, 9  ;;  %v1247_v23 = vrot.slane %v4292_v22, 5 }
  0x5e   : > { %v5855_v27 = vcombine.low %v4110_v6, %v4113_v7  ;;  %v1242_v2 = vrot.slane %v1240_v0, 4  ;;  %v1243_v53 = vrot.slane %v4253_v29, 5  ;;  %v1250_v33 = vrot.slane %v4303_v46, 5  ;;  %v4553_v46 = vld [vmem:[%s5776_s1 + $0x18] sm:$0xf] }
  0x5f   : > { %v1237_v50 = vsel %vm4469_vm7, %v1235_v28, %v1236_v19  ;;  %v1249_v56 = vrot.slane %v1247_v23, 4  ;;  %v1862_v30 = vsel %vm741_vm0, %v4213_v43, 0  ;;  %v1254_v1 = vrot.slane %v4335_v4, 5  ;;  %v4570_v19 = vld [vmem:[%s5776_s1 + $0x14] sm:$0xf] }
  0x60   : > { %3666 = vmatprep.mubr.msk.bf16.mxu1 %vm692_vm3, %v5855_v27  ;;  %v4538_v37 = vcombine.low %v1234_v10, %v1237_v50  ;;  %v1634_v6 = vsel %vm741_vm0, %v4248_v24, 0  ;;  %v1241_v7 = vsel %vm4469_vm7, %v3317_v35, %v1240_v0  ;;  %v1248_v39 = vsel %vm4469_vm7, %v3318_v40, %v1247_v23 }
  0x61   : > { %v1261_v29 = vrot.slane %v4381_v55, 5  ;;  %v1244_v43 = vsel %vm4469_vm7, %v1242_v2, %v1243_v53  ;;  %v1251_v24 = vsel %vm4469_vm7, %v1249_v56, %v1250_v33  ;;  %v3319_v54 = vrot.slane %v4330_v44, 9 }
  0x62   : > { %3701 = vmatmul.mubr.msk.bf16.vlgmr.msra.gmra.mxu0 %vm692_vm3, %v4515_v47  ;;  %v1257_v38 = vrot.slane %v4347_v14, 5  ;;  %v1256_v21 = vrot.slane %v1254_v1, 4  ;;  %v3320_v8 = vrot.slane %v4370_v20, 9  ;;  %v1264_v42 = vrot.slane %v4389_v36, 5 }
  0x63   : > { %3767 = vmatpush3.bf16.msra.mxu0 %v1862_v30  ;;  %3704 = vmatprep.mubr.msk.bf16.mxu0 %vm692_vm3, %v4538_v37  ;;  %v1263_v31 = vrot.slane %v1261_v29, 4  ;;  %v4578_v14 = vcombine.low %v1241_v7, %v1244_v43  ;;  %v4580_v10 = vcombine.low %v1248_v39, %v1251_v24  ;;  %v1255_v36 = vsel %vm4469_vm7, %v3319_v54, %v1254_v1 }
  0x64   : > { %3945 = vmatprep.subr.msk.bf16.mxu0 %vm741_vm0, %v4553_v46  ;;  %v1258_v28 = vsel %vm4469_vm7, %v1256_v21, %v1257_v38  ;;  %v1262_v0 = vsel %vm4469_vm7, %v3320_v8, %v1261_v29  ;;  %v1268_v40 = vrot.slane %v4425_v62, 5  ;;  %v1278_v23 = vrot.slane %v4131_v17, 5  ;;  %v5856_v8 = vld [vmem:[#allocation16_spill] sm:$0xff] }
  0x65   : > { %3667 = vmatmul.mubr.msk.bf16.vlgmr.msra.gmra.mxu1 %vm692_vm3, %v4481_v45  ;;  %v1265_v35 = vsel %vm4469_vm7, %v1263_v31, %v1264_v42  ;;  %v3321_v27 = vrot.slane %v4418_v51, 9  ;;  %v3322_v50 = vrot.slane %v4123_v13, 9  ;;  %v1275_v2 = vrot.slane %v4128_v16, 5  ;;  %v5857_v42 = vld [vmem:[#allocation20_spill] sm:$0xff] }
  0x66   : > { %3733 = vmatpush3.bf16.msra.mxu1 %v1634_v6  ;;  %3670 = vmatprep.mubr.msk.bf16.mxu1 %vm692_vm3, %v4508_v63  ;;  %v4599_v53 = vcombine.low %v4232_v3, %v4240_v18  ;;  %v4603_v33 = vcombine.low %v4287_v9, %v4292_v22  ;;  %v4607_v56 = vcombine.low %v4330_v44, %v4335_v4  ;;  %v1271_v3 = vrot.slane %v4430_v48, 5 }
  0x67   : > { %3944 = vmatprep.subr.msk.bf16.mxu1 %vm741_vm0, %v4570_v19  ;;  %v4611_v17 = vcombine.low %v4370_v20, %v4381_v55  ;;  %v4615_v30 = vcombine.low %v1255_v36, %v1258_v28  ;;  %v4617_v1 = vcombine.low %v1262_v0, %v1265_v35  ;;  %v4622_v18 = vcombine.low %v4261_v41, %v4268_v49  ;;  %v5858_v36 = vld [vmem:[#allocation18_spill] sm:$0xff] }
  0x68   : > { %v1270_v9 = vrot.slane %v1268_v40, 4  ;;  %v3325_v22 = vrot.slane %v4261_v41, 9  ;;  %v1296_v44 = vrot.slane %v4268_v49, 5  ;;  %v1299_v4 = vrot.slane %v4278_v57, 5 }
  0x69   : > { %v1269_v20 = vsel %vm4469_vm7, %v3321_v27, %v1268_v40  ;;  %v1276_v48 = vsel %vm4469_vm7, %v3322_v50, %v1275_v2  ;;  %v1277_v55 = vrot.slane %v1275_v2, 4  ;;  %v4635_v6 = vcombine.low %v4308_v52, %v4313_v61  ;;  %v5859_v40 = vld [vmem:[#allocation21_spill] sm:$0xff] }
  0x6a   : > { %3705 = vmatmul.mubr.msk.bf16.gmra.mxu0 %vm692_vm3, %v4578_v14  ;;  %v1297_v41 = vsel %vm4469_vm7, %v3325_v22, %v1296_v44  ;;  %v1298_v49 = vrot.slane %v1296_v44, 4  ;;  %v3326_v57 = vrot.slane %v4308_v52, 9  ;;  %v1303_v7 = vrot.slane %v4313_v61, 5 }
  0x6b   : > { %3708 = vmatprep.mubr.msk.bf16.mxu0 %vm692_vm3, %v4580_v10  ;;  %v1282_v39 = vrot.slane %v4168_v59, 5  ;;  %v1306_v29 = vrot.slane %v4325_v34, 5  ;;  %v4649_v43 = vcombine.low %v4352_v26, %v4359_v25  ;;  %v3327_v24 = vrot.slane %v4352_v26, 9 }
  0x6c   : > { %v1272_v54 = vsel %vm4469_vm7, %v1270_v9, %v1271_v3  ;;  %v1300_v52 = vsel %vm4469_vm7, %v1298_v49, %v1299_v4  ;;  %v1304_v61 = vsel %vm4469_vm7, %v3326_v57, %v1303_v7  ;;  %v1305_v38 = vrot.slane %v1303_v7, 4  ;;  %v5860_v3 = vld [vmem:[#allocation23_spill] sm:$0xff]  ;;  %v5861_v57 = vld [vmem:[#allocation8_spill] sm:$0xff] }
  0x6d   : > { %3671 = vmatmul.mubr.msk.bf16.gmra.mxu1 %vm692_vm3, %v4599_v53  ;;  %v4658_v21 = vcombine.low %v1297_v41, %v1300_v52  ;;  %v1310_v34 = vrot.slane %v4359_v25, 5  ;;  %v1313_v31 = vrot.slane %v5856_v8, 5  ;;  %v4664_v28 = vcombine.low %v5858_v36, %v5857_v42 }
  0x6e   : > { %3674 = vmatprep.mubr.msk.bf16.mxu1 %vm692_vm3, %v4603_v33  ;;  %v1307_v26 = vsel %vm4469_vm7, %v1305_v38, %v1306_v29  ;;  %v3328_v0 = vrot.slane %v5858_v36, 9  ;;  %v1317_v35 = vrot.slane %v5857_v42, 5  ;;  %v1320_v27 = vrot.slane %v5859_v40, 5  ;;  %v5863_v42 = vld [vmem:[#allocation4_spill] sm:$0xff] }
  0x6f   : > { %v4673_v50 = vcombine.low %v1304_v61, %v1307_v26  ;;  %v1311_v25 = vsel %vm4469_vm7, %v3327_v24, %v1310_v34  ;;  %v1312_v2 = vrot.slane %v1310_v34, 4  ;;  %v4679_v9 = vcombine.low %v5860_v3, %v4447_v11 }
  0x70   : > { %v1318_v22 = vsel %vm4469_vm7, %v3328_v0, %v1317_v35  ;;  %v1319_v44 = vrot.slane %v1317_v35, 4  ;;  %v3329_v4 = vrot.slane %v5860_v3, 9  ;;  %v1324_v41 = vrot.slane %v4447_v11, 5  ;;  %v5864_v0 = vld [vmem:[#allocation6_spill] sm:$0xff] }
  0x71   : > { %v1279_v49 = vsel %vm4469_vm7, %v1277_v55, %v1278_v23  ;;  %v1289_v7 = vrot.slane %v5861_v57, 5  ;;  %v1314_v29 = vsel %vm4469_vm7, %v1312_v2, %v1313_v31  ;;  %v1327_v24 = vrot.slane %v4458_v58, 5  ;;  %v5862_v55 = vld [vmem:[#allocation3_spill] sm:$0xff] }
  0x72   : > { %3709 = vmatmul.mubr.msk.bf16.gmra.mxu0 %vm692_vm3, %v4615_v30  ;;  %v4695_v52 = vcombine.low %v1311_v25, %v1314_v29  ;;  %v1321_v61 = vsel %vm4469_vm7, %v1319_v44, %v1320_v27  ;;  %v1325_v11 = vsel %vm4469_vm7, %v3329_v4, %v1324_v41  ;;  %v1326_v38 = vrot.slane %v1324_v41, 4  ;;  %v5865_v27 = vld [vmem:[#allocation9_spill] sm:$0xff]  ;;  %v4782_v4 = vld [vmem:[%s4101_s27 + $0xc0] sm:$0xf]  ;;  %v250_v41 = vld [vmem:[%s4101_s27 + $0xc8] sm:$0x1] }
  0x73   : > { %3712 = vmatprep.mubr.msk.bf16.mxu0 %vm692_vm3, %v4617_v1  ;;  %v4703_v23 = vcombine.low %v1269_v20, %v1272_v54  ;;  %v3323_v34 = vrot.slane %v5862_v55, 9  ;;  %v4706_v58 = vcombine.low %v1318_v22, %v1321_v61  ;;  %v4708_v8 = vcombine.low %v1276_v48, %v1279_v49  ;;  %v5866_v61 = vld [vmem:[#allocation7_spill] sm:$0xff] }
  0x74   : > { %v1284_v31 = vrot.slane %v1282_v39, 4  ;;  %v1285_v36 = vrot.slane %v5863_v42, 5  ;;  %v1328_v26 = vsel %vm4469_vm7, %v1326_v38, %v1327_v24  ;;  %v3324_v35 = vrot.slane %v5864_v0, 9  ;;  %v5868_v42 = vld [vmem:[#allocation13_spill] sm:$0xff] }
  0x75   : > { %3675 = vmatmul.mubr.msk.bf16.gmra.mxu1 %vm692_vm3, %v4607_v56  ;;  %v1291_v40 = vrot.slane %v1289_v7, 4  ;;  %v1292_v25 = vrot.slane %v5865_v27, 5  ;;  %v4715_v2 = vcombine.low %v1325_v11, %v1328_v26  ;;  %v4719_v20 = vcombine.low %v4418_v51, %v4425_v62  ;;  %v5872_v26 = vld [vmem:[#allocation5_spill] sm:$0xff] }
  0x76   : > { %3678 = vmatprep.mubr.msk.bf16.mxu1 %vm692_vm3, %v4611_v17  ;;  %v4725_v48 = vcombine.low %v4123_v13, %v4128_v16  ;;  %v1283_v54 = vsel %vm4469_vm7, %v3323_v34, %v1282_v39  ;;  %v1286_v3 = vsel %vm4469_vm7, %v1284_v31, %v1285_v36  ;;  %v1290_v51 = vsel %vm4469_vm7, %v3324_v35, %v1289_v7  ;;  %v5867_v34 = vld [vmem:[#allocation11_spill] sm:$0xff]  ;;  %v5871_v36 = vld [vmem:[#allocation24_spill] sm:$0xff] }
  0x77   : > { %v1293_v62 = vsel %vm4469_vm7, %v1291_v40, %v1292_v25  ;;  %v4741_v13 = vcombine.low %v1283_v54, %v1286_v3  ;;  %v4747_v39 = vcombine.low %v5862_v55, %v4168_v59  ;;  %v4753_v22 = vcombine.low %v5864_v0, %v5861_v57  ;;  %v4776_v59 = vld [vmem:[%s4101_s27 + $0xc4] sm:$0xf]  ;;  %v3455_v55 = vld [vmem:[%s5776_s1 + $0x20] sm:$0xf]  ;;  %v5874_v35 = vld [vmem:[#allocation12_spill] sm:$0xff] }
  0x78   : > { %v4743_v16 = vcombine.low %v1290_v51, %v1293_v62  ;;  %v2060_v44 = vrot.slane %v4776_v59, 5  ;;  %v3399_v49 = vrot.slane %v4782_v4, 9  ;;  %v2063_v7 = vrot.slane %v250_v41, 5  ;;  %v5873_v0 = vld [vmem:[#allocation10_spill] sm:$0xff] }
  0x79   : > { %v2280_v38 = vsel %vm741_vm0, %v4553_v46, 0  ;;  %v2074_v31 = vsel %vm741_vm0, %v4570_v19, 0  ;;  %v5869_v46 = vld [vmem:[#allocation15_spill] sm:$0xff]  ;;  %v5875_v40 = vld [vmem:[#allocation14_spill] sm:$0xff]  ;;  %v1830_v27 = vshrl.u32 %v4782_v4, 16  ;;  %v1833_v25 = vshll.u32 %v4782_v4, 16 }
  0x7a   : > { %3713 = vmatmul.mubr.msk.bf16.gmra.mxu0 %vm692_vm3, %v4703_v23  ;;  %v2062_v57 = vrot.slane %v2060_v44, 4  ;;  %v2061_v29 = vsel %vm4469_vm7, %v3399_v49, %v2060_v44  ;;  %v5870_v19 = vld [vmem:[#allocation19_spill] sm:$0xff]  ;;  %v1843_v54 = vshrl.u32 %v4776_v59, 16  ;;  %v1839_v3 = vshll.u32 %v4776_v59, 16 }
  0x7b   : > { %3716 = vmatprep.mubr.msk.bf16.mxu0 %vm692_vm3, %v4708_v8  ;;  %v1832_v51 = vrot.slane %v1830_v27, 4  ;;  %v1835_v62 = vrot.slane %v1833_v25, 5 }
  0x7c   : > { %v2064_v24 = vsel %vm4469_vm7, %v2062_v57, %v2063_v7  ;;  %v1841_v44 = vrot.slane %v1839_v3, 5  ;;  %v1845_v49 = vrot.slane %v1843_v54, 4  ;;  %v5876_v57 = vld [vmem:[#allocation17_spill] sm:$0xff]  ;;  %v5877_v7 = vld [vmem:[#allocation22_spill] sm:$0xff]  ;;  %v3364_v3 = vcombine.low %v4782_v4, %v4776_v59 }
  0x7d   : > { %3679 = vmatmul.mubr.msk.bf16.gmra.mxu1 %vm692_vm3, %v4719_v20  ;;  %v4794_v11 = vcombine.low %v2061_v29, %v2064_v24  ;;  %v1836_v29 = vor.u32 %v1835_v62, %v1832_v51  ;;  %v2720_v51 = vsel %vm741_vm0, %v3455_v55, 0 }
  0x7e   : > { %3682 = vmatprep.mubr.msk.bf16.mxu1 %vm692_vm3, %v4725_v48  ;;  %v1846_v24 = vor.u32 %v1845_v49, %v1841_v44 }
  0x82   : > { %3717 = vmatmul.mubr.msk.bf16.gmra.mxu0 %vm692_vm3, %v4741_v13 }
  0x83   : > { %3720 = vmatprep.mubr.msk.bf16.mxu0 %vm692_vm3, %v4743_v16 }
  0x85   : > { %3683 = vmatmul.mubr.msk.bf16.gmra.mxu1 %vm692_vm3, %v4747_v39 }
  0x86   : > { %3686 = vmatprep.mubr.msk.bf16.mxu1 %vm692_vm3, %v4753_v22 }
  0x8a   : > { %3721 = vmatmul.mubr.msk.bf16.gmra.mxu0 %vm692_vm3, %v4658_v21 }
  0x8b   : > { %3724 = vmatprep.mubr.msk.bf16.mxu0 %vm692_vm3, %v4673_v50 }
  0x8d   : > { %3687 = vmatmul.mubr.msk.bf16.gmra.mxu1 %vm692_vm3, %v4622_v18 }
  0x8e   : > { %3690 = vmatprep.mubr.msk.bf16.mxu1 %vm692_vm3, %v4635_v6 }
  0x92   : > { %3725 = vmatmul.mubr.msk.bf16.gmra.mxu0 %vm692_vm3, %v4695_v52 }
  0x93   : > { %3728 = vmatprep.mubr.msk.bf16.mxu0 %vm692_vm3, %v4706_v58 }
  0x95   : > { %3691 = vmatmul.mubr.msk.bf16.gmra.mxu1 %vm692_vm3, %v4649_v43 }
  0x96   : > { %3694 = vmatprep.mubr.msk.bf16.mxu1 %vm692_vm3, %v4664_v28 }
  0x9a   : > { %3729 = vmatmul.mubr.msk.bf16.gmra.mxu0 %vm692_vm3, %v4715_v2 }
  0x9b   : > { %3768 = vmatprep.mubr.msk.bf16.mxu0 %vm692_vm3, %v5866_v61  ;;  %v1849_v61 = vshll.u32 %v250_v41, 16 }
  0x9d   : > { %3695 = vmatmul.mubr.msk.bf16.gmra.mxu1 %vm692_vm3, %v4679_v9  ;;  %v1851_v27 = vrot.slane %v1849_v61, 5  ;;  %v4986_v61 = vld [vmem:[%s4101_s27 + $0xd0] sm:$0xf] }
  0x9e   : > { %3734 = vmatprep.mubr.msk.bf16.mxu1 %vm692_vm3, %v4481_v45  ;;  %v3436_v45 = vld [vmem:[%s5776_s1 + $0x1c] sm:$0xf] }
  0x9f   : > { %v2508_v62 = vsel %vm741_vm0, %v3436_v45, 0 }
  0xa2   : > { %3769 = vmatmul.mubr.msk.bf16.vlgmr.msra.gmra.mxu0 %vm692_vm3, %v5867_v34 }
  0xa3   : > { %3835 = vmatpush3.bf16.msra.mxu0 %v2280_v38  ;;  %3772 = vmatprep.mubr.msk.bf16.mxu0 %vm692_vm3, %v5868_v42  ;;  %v1837_v38 = vrot.slane %v1836_v29, 4 }
  0xa4   : > { %3947 = vmatprep.subr.msk.bf16.mxu0 %vm741_vm0, %v3455_v55 }
  0xa5   : > { %3735 = vmatmul.mubr.msk.bf16.vlgmr.msra.gmra.mxu1 %vm692_vm3, %v4508_v63  ;;  %v1842_v25 = vsel %vm4146_vm4, %v1837_v38, %v1841_v44 }
  0xa6   : > { %3801 = vmatpush3.bf16.msra.mxu1 %v2074_v31  ;;  %3738 = vmatprep.mubr.msk.bf16.mxu1 %vm692_vm3, %v4599_v53  ;;  %v1847_v31 = vrot.slane %v1846_v24, 4 }
  0xa7   : > { %3946 = vmatprep.subr.msk.bf16.mxu1 %vm741_vm0, %v3436_v45 }
  0xa8   : > { %v1852_v41 = vsel %vm4146_vm4, %v1847_v31, %v1851_v27 }
  0xa9   : > { %v4876_v54 = vcombine.low %v1842_v25, %v1852_v41 }
  0xaa   : > { %3773 = vmatmul.mubr.msk.bf16.gmra.mxu0 %vm692_vm3, %v5869_v46 }
  0xab   : > { %3776 = vmatprep.mubr.msk.bf16.mxu0 %vm692_vm3, %v5870_v19  ;;  %5878 = vst [vmem:[#allocation16_spill] sm:$0xff] %v4876_v54 }
  0xad   : > { %3739 = vmatmul.mubr.msk.bf16.gmra.mxu1 %vm692_vm3, %v4603_v33 }
  0xae   : > { %3742 = vmatprep.mubr.msk.bf16.mxu1 %vm692_vm3, %v4607_v56 }
  0xb2   : > { %3777 = vmatmul.mubr.msk.bf16.gmra.mxu0 %vm692_vm3, %v5871_v36 }
  0xb3   : > { %3780 = vmatprep.mubr.msk.bf16.mxu0 %vm692_vm3, %v4490_v15 }
  0xb5   : > { %3743 = vmatmul.mubr.msk.bf16.gmra.mxu1 %vm692_vm3, %v4611_v17 }
  0xb6   : > { %3746 = vmatprep.mubr.msk.bf16.mxu1 %vm692_vm3, %v4719_v20 }
  0xba   : > { %3781 = vmatmul.mubr.msk.bf16.gmra.mxu0 %vm692_vm3, %v5872_v26 }
  0xbb   : > { %3784 = vmatprep.mubr.msk.bf16.mxu0 %vm692_vm3, %v5873_v0 }
  0xbd   : > { %3747 = vmatmul.mubr.msk.bf16.gmra.mxu1 %vm692_vm3, %v4725_v48 }
  0xbe   : > { %3750 = vmatprep.mubr.msk.bf16.mxu1 %vm692_vm3, %v4747_v39 }
  0xc2   : > { %3785 = vmatmul.mubr.msk.bf16.gmra.mxu0 %vm692_vm3, %v5874_v35 }
  0xc3   : > { %3788 = vmatprep.mubr.msk.bf16.mxu0 %vm692_vm3, %v5875_v40 }
  0xc5   : > { %3751 = vmatmul.mubr.msk.bf16.gmra.mxu1 %vm692_vm3, %v4753_v22 }
  0xc6   : > { %3754 = vmatprep.mubr.msk.bf16.mxu1 %vm692_vm3, %v4622_v18 }
  0xca   : > { %3789 = vmatmul.mubr.msk.bf16.gmra.mxu0 %vm692_vm3, %v5876_v57 }
  0xcb   : > { %3792 = vmatprep.mubr.msk.bf16.mxu0 %vm692_vm3, %v5877_v7 }
  0xcd   : > { %3755 = vmatmul.mubr.msk.bf16.gmra.mxu1 %vm692_vm3, %v4635_v6 }
  0xce   : > { %3758 = vmatprep.mubr.msk.bf16.mxu1 %vm692_vm3, %v4649_v43 }
  0xd2   : > { %3793 = vmatmul.mubr.msk.bf16.gmra.mxu0 %vm692_vm3, %v4464_v5 }
  0xd3   : > { %3796 = vmatprep.mubr.msk.bf16.mxu0 %vm692_vm3, %v4518_v12 }
  0xd5   : > { %3759 = vmatmul.mubr.msk.bf16.gmra.mxu1 %vm692_vm3, %v4664_v28 }
  0xd6   : > { %3762 = vmatprep.mubr.msk.bf16.mxu1 %vm692_vm3, %v4679_v9 }
  0xda   : > { %3797 = vmatmul.mubr.msk.bf16.gmra.mxu0 %vm692_vm3, %v4876_v54 }
  0xdb   : > { %3836 = vmatprep.mubr.msk.bf16.mxu0 %vm692_vm3, %v4508_v63 }
  0xdd   : > { %3763 = vmatmul.mubr.msk.bf16.gmra.mxu1 %vm692_vm3, %v3364_v3 }
  0xde   : > { %3802 = vmatprep.mubr.msk.bf16.mxu1 %vm692_vm3, %v4515_v47 }
  0xe2   : > { %3837 = vmatmul.mubr.msk.bf16.vlgmr.msra.gmra.mxu0 %vm692_vm3, %v4599_v53 }
  0xe3   : > { %3903 = vmatpush3.bf16.msra.mxu0 %v2720_v51  ;;  %3840 = vmatprep.mubr.msk.bf16.mxu0 %vm692_vm3, %v4603_v33 }
  0xe5   : > { %3803 = vmatmul.mubr.msk.bf16.vlgmr.msra.gmra.mxu1 %vm692_vm3, %v4538_v37 }
  0xe6   : > { %3869 = vmatpush3.bf16.msra.mxu1 %v2508_v62  ;;  %3806 = vmatprep.mubr.msk.bf16.mxu1 %vm692_vm3, %v4578_v14  ;;  %v4899_v63 = vpop.f32.mrf.mxu0 }
  0xe8   : > { %v4909_v53 = vpop.f32.mrf.mxu0 }
  0xea   : > { %3841 = vmatmul.mubr.msk.bf16.gmra.mxu0 %vm692_vm3, %v4607_v56  ;;  %v4915_v56 = vpop.f32.mrf.mxu0 }
  0xeb   : > { %3844 = vmatprep.mubr.msk.bf16.mxu0 %vm692_vm3, %v4611_v17  ;;  %v4905_v47 = vpop.f32.mrf.mxu1 }
  0xec   : > { %v4925_v59 = vpop.f32.mrf.mxu0 }
  0xed   : > { %3807 = vmatmul.mubr.msk.bf16.gmra.mxu1 %vm692_vm3, %v4580_v10  ;;  %v4911_v33 = vpop.f32.mrf.mxu1 }
  0xee   : > { %3810 = vmatprep.mubr.msk.bf16.mxu1 %vm692_vm3, %v4615_v30 }
  0xef   : > { %v4921_v17 = vpop.f32.mrf.mxu1 }
  0xf1   : > { %v4927_v4 = vpop.f32.mrf.mxu1 }
  0xf2   : > { %3845 = vmatmul.mubr.msk.bf16.gmra.mxu0 %vm692_vm3, %v4719_v20 }
  0xf3   : > { %3848 = vmatprep.mubr.msk.bf16.mxu0 %vm692_vm3, %v4725_v48 }
  0xf5   : > { %3811 = vmatmul.mubr.msk.bf16.gmra.mxu1 %vm692_vm3, %v4617_v1 }
  0xf6   : > { %3814 = vmatprep.mubr.msk.bf16.mxu1 %vm692_vm3, %v4703_v23 }
  0xf7   : > { %v4931_v20 = vpop.f32.mrf.mxu0 }
  0xf9   : > { %v4941_v55 = vpop.f32.mrf.mxu0 }
  0xfa   : > { %3849 = vmatmul.mubr.msk.bf16.gmra.mxu0 %vm692_vm3, %v4747_v39 }
  0xfb   : > { %3852 = vmatprep.mubr.msk.bf16.mxu0 %vm692_vm3, %v4753_v22  ;;  %v4937_v48 = vpop.f32.mrf.mxu1  ;;  %v4947_v39 = vpop.f32.mrf.mxu0 }
  0xfd   : > { %3815 = vmatmul.mubr.msk.bf16.gmra.mxu1 %vm692_vm3, %v4708_v8  ;;  %v4943_v45 = vpop.f32.mrf.mxu1  ;;  %v4957_v44 = vpop.f32.mrf.mxu0 }
  0xfe   : > { %3818 = vmatprep.mubr.msk.bf16.mxu1 %vm692_vm3, %v4741_v13 }
  0xff   : > { %v4953_v22 = vpop.f32.mrf.mxu1 }
 0x101   : > { %v4959_v49 = vpop.f32.mrf.mxu1 }
 0x102   : > { %3853 = vmatmul.mubr.msk.bf16.gmra.mxu0 %vm692_vm3, %v4622_v18 }
 0x103   : > { %3856 = vmatprep.mubr.msk.bf16.mxu0 %vm692_vm3, %v4635_v6 }
 0x105   : > { %3819 = vmatmul.mubr.msk.bf16.gmra.mxu1 %vm692_vm3, %v4743_v16 }
 0x106   : > { %3822 = vmatprep.mubr.msk.bf16.mxu1 %vm692_vm3, %v4658_v21 }
 0x108   : > { %v4963_v18 = vpop.f32.mrf.mxu0 }
 0x10a   : > { %3857 = vmatmul.mubr.msk.bf16.gmra.mxu0 %vm692_vm3, %v4649_v43  ;;  %v4973_v29 = vpop.f32.mrf.mxu0 }
 0x10b   : > { %3860 = vmatprep.mubr.msk.bf16.mxu0 %vm692_vm3, %v4664_v28  ;;  %v4983_v28 = vld [vmem:[%s4101_s27 + $0xcc] sm:$0xf] }
 0x10c   : > { %v4979_v43 = vpop.f32.mrf.mxu0 }
 0x10d   : > { %3823 = vmatmul.mubr.msk.bf16.gmra.mxu1 %vm692_vm3, %v4673_v50  ;;  %v4969_v6 = vpop.f32.mrf.mxu1 }
 0x10e   : > { %5879 = vst [vmem:[#allocation20_spill] sm:$0xff] %v4969_v6  ;;  %3826 = vmatprep.mubr.msk.bf16.mxu1 %vm692_vm3, %v4695_v52  ;;  %v4992_v31 = vpop.f32.mrf.mxu0 }
 0x10f   : > { %v4975_v24 = vpop.f32.mrf.mxu1 }
 0x110   : > { %5880 = vst [vmem:[#allocation18_spill] sm:$0xff] %v4975_v24 }
 0x111   : > { %v4990_v38 = vpop.f32.mrf.mxu1 }
 0x112   : > { %3861 = vmatmul.mubr.msk.bf16.gmra.mxu0 %vm692_vm3, %v4679_v9  ;;  %5881 = vst [vmem:[#allocation21_spill] sm:$0xff] %v4990_v38  ;;  %v3419_v9 = vcombine.low %v4983_v28, %v4986_v61 }
 0x113   : > { %3864 = vmatprep.mubr.msk.bf16.mxu0 %vm692_vm3, %v3364_v3  ;;  %v4998_v27 = vpop.f32.mrf.mxu1 }
 0x114   : > { %5882 = vst [vmem:[#allocation23_spill] sm:$0xff] %v4998_v27 }
 0x115   : > { %3827 = vmatmul.mubr.msk.bf16.gmra.mxu1 %vm692_vm3, %v4706_v58 }
 0x116   : > { %3830 = vmatprep.mubr.msk.bf16.mxu1 %vm692_vm3, %v4715_v2 }
 0x11a   : > { %v5000_v25 = vpop.f32.mrf.mxu0  ;;  %3865 = vmatmul.mubr.msk.bf16.gmra.mxu0 %vm692_vm3, %v3419_v9 }
 0x11b   : > { %3904 = vmatprep.mubr.msk.bf16.mxu0 %vm692_vm3, %v4538_v37 }
 0x11c   : > { %v5005_v41 = vpop.f32.mrf.mxu0 }
 0x11d   : > { %v5007_v3 = vpop.f32.mrf.mxu1  ;;  %3831 = vmatmul.mubr.msk.bf16.gmra.mxu1 %vm692_vm3, %v4794_v11 }
 0x11e   : > { %5883 = vst [vmem:[#allocation8_spill] sm:$0xff] %v5007_v3  ;;  %v5011_v51 = vpop.f32.mrf.mxu0  ;;  %3870 = vmatprep.mubr.msk.bf16.mxu1 %vm692_vm3, %v5867_v34 }
 0x11f   : > { %v5015_v62 = vpop.f32.mrf.mxu1 }
 0x120   : > { %5884 = vst [vmem:[#allocation3_spill] sm:$0xff] %v5015_v62  ;;  %v5017_v27 = vpop.f32.mrf.mxu0 }
 0x121   : > { %v5019_v9 = vpop.f32.mrf.mxu1 }
 0x122   : > { %5885 = vst [vmem:[#allocation4_spill] sm:$0xff] %v5019_v9  ;;  %v3702_v38 = vpop.f32.mrf.mxu0  ;;  %3905 = vmatmul.mubr.msk.bf16.vlgmr.msra.gmra.mxu0 %vm692_vm3, %v4578_v14 }
 0x123   : > { %v5023_v37 = vpop.f32.mrf.mxu1  ;;  %3908 = vmatprep.mubr.msk.bf16.mxu0 %vm692_vm3, %v4580_v10 }
 0x124   : > { %5886 = vst [vmem:[#allocation6_spill] sm:$0xff] %v5023_v37  ;;  %v1464_v3 = vpop.f32.mrf.mxu0 }
 0x125   : > { %v3668_v24 = vpop.f32.mrf.mxu1  ;;  %3871 = vmatmul.mubr.msk.bf16.vlgmr.msra.gmra.mxu1 %vm692_vm3, %v5868_v42 }
 0x126   : > { %v1080_v34 = vadd.f32 %v3668_v24, %v4899_v63  ;;  %v3703_v62 = vpop.f32.mrf.mxu0  ;;  %3874 = vmatprep.mubr.msk.bf16.mxu1 %vm692_vm3, %v5869_v46 }
 0x127   : > { %v1071_v9 = vpop.f32.mrf.mxu1 }
 0x128   : > { %v5032_v54 = vadd.f32 %v3702_v38, %v1080_v34  ;;  %v1072_v14 = vadd.f32 %v1071_v9, %v4909_v53  ;;  %v1467_v37 = vpop.f32.mrf.mxu0 }
 0x129   : > { %v3669_v6 = vpop.f32.mrf.mxu1 }
 0x12a   : > { %v5035_v32 = vadd.f32 %v1464_v3, %v1072_v14  ;;  %v1083_v10 = vadd.f32 %v3669_v6, %v4915_v56  ;;  %v3706_v12 = vpop.f32.mrf.mxu0  ;;  %3909 = vmatmul.mubr.msk.bf16.gmra.mxu0 %vm692_vm3, %v4615_v30 }
 0x12b   : > { %v1074_v42 = vpop.f32.mrf.mxu1  ;;  %3912 = vmatprep.mubr.msk.bf16.mxu0 %vm692_vm3, %v4617_v1 }
 0x12c   : > { %v5042_v46 = vadd.f32 %v3703_v62, %v1083_v10  ;;  %v1075_v63 = vadd.f32 %v1074_v42, %v4925_v59  ;;  %v1480_v24 = vpop.f32.mrf.mxu0 }
 0x12d   : > { %v3672_v53 = vpop.f32.mrf.mxu1  ;;  %3875 = vmatmul.mubr.msk.bf16.gmra.mxu1 %vm692_vm3, %v5870_v19 }
 0x12e   : > { %v5047_v38 = vadd.f32 %v1467_v37, %v1075_v63  ;;  %v1096_v56 = vadd.f32 %v3672_v53, %v4931_v20  ;;  %v3707_v6 = vpop.f32.mrf.mxu0  ;;  %3878 = vmatprep.mubr.msk.bf16.mxu1 %vm692_vm3, %v5871_v36 }
 0x12f   : > { %v1087_v30 = vpop.f32.mrf.mxu1 }
 0x130   : > { %v5052_v3 = vadd.f32 %v3706_v12, %v1096_v56  ;;  %v1088_v1 = vadd.f32 %v1087_v30, %v4941_v55  ;;  %v1483_v62 = vpop.f32.mrf.mxu0 }
 0x131   : > { %v3673_v59 = vpop.f32.mrf.mxu1 }
 0x132   : > { %v5055_v9 = vadd.f32 %v1480_v24, %v1088_v1  ;;  %v1099_v34 = vadd.f32 %v3673_v59, %v4947_v39  ;;  %v3710_v19 = vpop.f32.mrf.mxu0  ;;  %3913 = vmatmul.mubr.msk.bf16.gmra.mxu0 %vm692_vm3, %v4703_v23 }
 0x133   : > { %v1090_v20 = vpop.f32.mrf.mxu1  ;;  %3916 = vmatprep.mubr.msk.bf16.mxu0 %vm692_vm3, %v4708_v8 }
 0x134   : > { %v5062_v36 = vadd.f32 %v3707_v6, %v1099_v34  ;;  %v1091_v12 = vadd.f32 %v1090_v20, %v4957_v44  ;;  %v1496_v37 = vpop.f32.mrf.mxu0 }
 0x135   : > { %v3676_v55 = vpop.f32.mrf.mxu1  ;;  %3879 = vmatmul.mubr.msk.bf16.gmra.mxu1 %vm692_vm3, %v4490_v15 }
 0x136   : > { %v5067_v14 = vadd.f32 %v1483_v62, %v1091_v12  ;;  %v1112_v39 = vadd.f32 %v3676_v55, %v4963_v18  ;;  %v3711_v10 = vpop.f32.mrf.mxu0  ;;  %3882 = vmatprep.mubr.msk.bf16.mxu1 %vm692_vm3, %v5872_v26 }
 0x137   : > { %v1103_v23 = vpop.f32.mrf.mxu1 }
 0x138   : > { %v5072_v42 = vadd.f32 %v3710_v19, %v1112_v39  ;;  %v1104_v8 = vadd.f32 %v1103_v23, %v4973_v29  ;;  %v1499_v63 = vpop.f32.mrf.mxu0 }
 0x139   : > { %v3677_v44 = vpop.f32.mrf.mxu1 }
 0x13a   : > { %v5075_v24 = vadd.f32 %v1496_v37, %v1104_v8  ;;  %v1115_v53 = vadd.f32 %v3677_v44, %v4979_v43  ;;  %v3714_v15 = vpop.f32.mrf.mxu0  ;;  %3917 = vmatmul.mubr.msk.bf16.gmra.mxu0 %vm692_vm3, %v4741_v13  ;;  %v2479_v37 = vshll.u32 %v4983_v28, 16 }
 0x13b   : > { %v1106_v18 = vpop.f32.mrf.mxu1  ;;  %3920 = vmatprep.mubr.msk.bf16.mxu0 %vm692_vm3, %v4743_v16 }
 0x13c   : > { %v5082_v26 = vadd.f32 %v3711_v10, %v1115_v53  ;;  %v1107_v56 = vadd.f32 %v1106_v18, %v4992_v31  ;;  %v1512_v6 = vpop.f32.mrf.mxu0  ;;  %v2481_v44 = vrot.slane %v2479_v37, 5 }
 0x13d   : > { %v3680_v29 = vpop.f32.mrf.mxu1  ;;  %3883 = vmatmul.mubr.msk.bf16.gmra.mxu1 %vm692_vm3, %v5873_v0 }
 0x13e   : > { %v5087_v30 = vadd.f32 %v1499_v63, %v1107_v56  ;;  %v1128_v43 = vadd.f32 %v3680_v29, %v5000_v25  ;;  %v3715_v1 = vpop.f32.mrf.mxu0  ;;  %3886 = vmatprep.mubr.msk.bf16.mxu1 %vm692_vm3, %v5874_v35 }
 0x13f   : > { %v1119_v13 = vpop.f32.mrf.mxu1 }
 0x140   : > { %v5092_v62 = vadd.f32 %v3714_v15, %v1128_v43  ;;  %v1120_v16 = vadd.f32 %v1119_v13, %v5005_v41  ;;  %v1515_v59 = vpop.f32.mrf.mxu0  ;;  %v2476_v41 = vshrl.u32 %v4983_v28, 16 }
 0x141   : > { %v3681_v31 = vpop.f32.mrf.mxu1 }
 0x142   : > { %v5095_v34 = vadd.f32 %v1512_v6, %v1120_v16  ;;  %v1131_v19 = vadd.f32 %v3681_v31, %v5011_v51  ;;  %v3718_v0 = vpop.f32.mrf.mxu0  ;;  %3921 = vmatmul.mubr.msk.bf16.gmra.mxu0 %vm692_vm3, %v4658_v21  ;;  %v2485_v51 = vshll.u32 %v4986_v61, 16  ;;  %v2489_v21 = vshrl.u32 %v4986_v61, 16 }
 0x143   : > { %v1122_v25 = vpop.f32.mrf.mxu1  ;;  %3924 = vmatprep.mubr.msk.bf16.mxu0 %vm692_vm3, %v4673_v50 }
 0x144   : > { %v5102_v35 = vadd.f32 %v3715_v1, %v1131_v19  ;;  %v1123_v20 = vadd.f32 %v1122_v25, %v5017_v27  ;;  %v1528_v12 = vpop.f32.mrf.mxu0  ;;  %v2487_v15 = vrot.slane %v2485_v51, 5  ;;  %v2491_v18 = vrot.slane %v2489_v21, 4 }
 0x145   : > { %v3684_v55 = vpop.f32.mrf.mxu1  ;;  %3887 = vmatmul.mubr.msk.bf16.gmra.mxu1 %vm692_vm3, %v5875_v40  ;;  %v2478_v40 = vrot.slane %v2476_v41, 4  ;;  %v3454_v19 = vrot.slane %v4983_v28, 9 }
 0x146   : > { %v5111_v39 = vadd.f32 %v1515_v59, %v1123_v20  ;;  %v1144_v50 = vadd.f32 %v3684_v55, %v4905_v47  ;;  %v3719_v10 = vpop.f32.mrf.mxu0  ;;  %3890 = vmatprep.mubr.msk.bf16.mxu1 %vm692_vm3, %v5876_v57  ;;  %v2706_v57 = vrot.slane %v4986_v61, 5 }
 0x147   : > { %v1135_v27 = vpop.f32.mrf.mxu1 }
 0x148   : > { %v5116_v23 = vadd.f32 %v3718_v0, %v1144_v50  ;;  %v1136_v8 = vadd.f32 %v1135_v27, %v4911_v33  ;;  %v1531_v63 = vpop.f32.mrf.mxu0  ;;  %v253_v33 = vld [vmem:[%s4101_s27 + $0xd4] sm:$0x1] }
 0x149   : > { %v3685_v53 = vpop.f32.mrf.mxu1  ;;  %v2495_v31 = vshll.u32 %v253_v33, 16  ;;  %v2709_v25 = vrot.slane %v253_v33, 5 }
 0x14a   : > { %v5119_v56 = vadd.f32 %v1528_v12, %v1136_v8  ;;  %v1147_v47 = vadd.f32 %v3685_v53, %v4921_v17  ;;  %v3722_v6 = vpop.f32.mrf.mxu0  ;;  %3925 = vmatmul.mubr.msk.bf16.gmra.mxu0 %vm692_vm3, %v4695_v52  ;;  %v2482_v17 = vor.u32 %v2481_v44, %v2478_v40 }
 0x14b   : > { %v1138_v29 = vpop.f32.mrf.mxu1  ;;  %3928 = vmatprep.mubr.msk.bf16.mxu0 %vm692_vm3, %v4706_v58  ;;  %v2492_v58 = vor.u32 %v2491_v18, %v2487_v15  ;;  %v2497_v28 = vrot.slane %v2495_v31, 5 }
 0x14c   : > { %v5128_v43 = vadd.f32 %v3719_v10, %v1147_v47  ;;  %v1139_v1 = vadd.f32 %v1138_v29, %v4927_v4  ;;  %v1544_v13 = vpop.f32.mrf.mxu0  ;;  %v2708_v4 = vrot.slane %v2706_v57, 4  ;;  %v2483_v37 = vrot.slane %v2482_v17, 4  ;;  %v5890_v47 = vld [vmem:[#allocation16_spill] sm:$0xff]  ;;  %v5891_v29 = vld [vmem:[#allocation18_spill] sm:$0xff]  ;;  %v5892_v17 = vld [vmem:[#allocation21_spill] sm:$0xff] }
 0x14d   : > { %v3688_v16 = vpop.f32.mrf.mxu1  ;;  %3891 = vmatmul.mubr.msk.bf16.gmra.mxu1 %vm692_vm3, %v5877_v7 }
 0x14e   : > { %v5133_v59 = vadd.f32 %v1531_v63, %v1139_v1  ;;  %v1160_v52 = vadd.f32 %v3688_v16, %v4937_v48  ;;  %v3723_v61 = vpop.f32.mrf.mxu0  ;;  %3894 = vmatprep.mubr.msk.bf16.mxu1 %vm692_vm3, %v4464_v5  ;;  %v2493_v5 = vrot.slane %v2492_v58, 4  ;;  %v2710_v50 = vsel %vm4469_vm7, %v2708_v4, %v2709_v25  ;;  %v5887_v63 = vld [vmem:[#allocation25_spill] sm:$0xff] }
 0x14f   : > { %v1151_v0 = vpop.f32.mrf.mxu1  ;;  %v2488_v40 = vsel %vm4146_vm4, %v2483_v37, %v2487_v15 }
 0x150   : > { %v5139_v20 = vadd.f32 %v3722_v6, %v1160_v52  ;;  %v1152_v7 = vadd.f32 %v1151_v0, %v4943_v45  ;;  %v1547_v12 = vpop.f32.mrf.mxu0  ;;  %v2707_v45 = vsel %vm4469_vm7, %v3454_v19, %v2706_v57  ;;  %v2498_v60 = vsel %vm4146_vm4, %v2493_v5, %v2497_v28  ;;  %v5893_v19 = vld [vmem:[#allocation23_spill] sm:$0xff] }
 0x151   : > { %v3689_v41 = vpop.f32.mrf.mxu1  ;;  %v3437_v15 = vcombine.low %v2488_v40, %v2498_v60  ;;  %v5895_v5 = vld [vmem:[#allocation3_spill] sm:$0xff]  ;;  %v5897_v40 = vld [vmem:[#allocation6_spill] sm:$0xff] }
 0x152   : > { %v5142_v55 = vadd.f32 %v1544_v13, %v1152_v7  ;;  %v1163_v48 = vadd.f32 %v3689_v41, %v4953_v22  ;;  %v3726_v51 = vpop.f32.mrf.mxu0  ;;  %3929 = vmatmul.mubr.msk.bf16.gmra.mxu0 %vm692_vm3, %v4715_v2 }
 0x153   : > { %v1154_v21 = vpop.f32.mrf.mxu1  ;;  %3932 = vmatprep.mubr.msk.bf16.mxu0 %vm692_vm3, %v4794_v11  ;;  %v5889_v11 = vld [vmem:[#allocation20_spill] sm:$0xff] }
 0x154   : > { %v5153_v10 = vadd.f32 %v3723_v61, %v1163_v48  ;;  %v1155_v22 = vadd.f32 %v1154_v21, %v4959_v49  ;;  %v1560_v27 = vpop.f32.mrf.mxu0  ;;  %v3456_v49 = vcombine.low %v2707_v45, %v2710_v50 }
 0x155   : > { %v3692_v8 = vpop.f32.mrf.mxu1  ;;  %3895 = vmatmul.mubr.msk.bf16.gmra.mxu1 %vm692_vm3, %v5887_v63 }
 0x156   : > { %v5160_v44 = vadd.f32 %v1547_v12, %v1155_v22  ;;  %v1176_v53 = vadd.f32 %v3692_v8, %v5889_v11  ;;  %v3727_v18 = vpop.f32.mrf.mxu0  ;;  %3898 = vmatprep.mubr.msk.bf16.mxu1 %vm692_vm3, %v5890_v47  ;;  %v5894_v12 = vld [vmem:[#allocation8_spill] sm:$0xff] }
 0x157   : > { %v1167_v6 = vpop.f32.mrf.mxu1  ;;  %v5896_v22 = vld [vmem:[#allocation4_spill] sm:$0xff] }
 0x158   : > { %v5167_v57 = vadd.f32 %v3726_v51, %v1176_v53  ;;  %v1168_v33 = vadd.f32 %v1167_v6, %v5891_v29  ;;  %v1563_v1 = vpop.f32.mrf.mxu0 }
 0x159   : > { %v3693_v13 = vpop.f32.mrf.mxu1 }
 0x15a   : > { %v5170_v16 = vadd.f32 %v1560_v27, %v1168_v33  ;;  %v1179_v52 = vadd.f32 %v3693_v13, %v5892_v17  ;;  %v3730_v61 = vpop.f32.mrf.mxu0  ;;  %3933 = vmatmul.mubr.msk.bf16.gmra.mxu0 %vm692_vm3, %v3456_v49 }
 0x15b   : > { %v1170_v58 = vpop.f32.mrf.mxu1 }
 0x15c   : > { %v5174_v31 = vadd.f32 %v3727_v18, %v1179_v52  ;;  %v1171_v0 = vadd.f32 %v1170_v58, %v5893_v19  ;;  %v1576_v4 = vpop.f32.mrf.mxu0 }
 0x15d   : > { %v3696_v25 = vpop.f32.mrf.mxu1  ;;  %3899 = vmatmul.mubr.msk.bf16.gmra.mxu1 %vm692_vm3, %v3437_v15 }
 0x15e   : > { %v5178_v7 = vadd.f32 %v1563_v1, %v1171_v0  ;;  %v1192_v41 = vadd.f32 %v3696_v25, %v5894_v12  ;;  %v3731_v37 = vpop.f32.mrf.mxu0 }
 0x15f   : > { %v1183_v48 = vpop.f32.mrf.mxu1 }
 0x160   : > { %v5181_v51 = vadd.f32 %v3730_v61, %v1192_v41  ;;  %v1184_v28 = vadd.f32 %v1183_v48, %v5895_v5  ;;  %v1579_v21 = vpop.f32.mrf.mxu0 }
 0x161   : > { %v3697_v45 = vpop.f32.mrf.mxu1 }
 0x162   : > { %v5184_v50 = vadd.f32 %v1576_v4, %v1184_v28  ;;  %v1195_v27 = vadd.f32 %v3697_v45, %v5896_v22  ;;  %v3770_v8 = vpop.f32.mrf.mxu0 }
 0x163   : > { %v1186_v63 = vpop.f32.mrf.mxu1 }
 0x164   : > { %v5187_v2 = vadd.f32 %v3731_v37, %v1195_v27  ;;  %v1187_v11 = vadd.f32 %v1186_v63, %v5897_v40  ;;  %v1898_v53 = vpop.f32.mrf.mxu0 }
 0x165   : > { %v3736_v18 = vpop.f32.mrf.mxu1 }
 0x166   : > { %v5190_v47 = vadd.f32 %v1579_v21, %v1187_v11  ;;  %v1799_v60 = vadd.f32 %v3736_v18, %v5032_v54  ;;  %v3771_v49 = vpop.f32.mrf.mxu0 }
 0x167   : > { %v1670_v6 = vpop.f32.mrf.mxu1 }
 0x168   : > { %v5193_v29 = vadd.f32 %v3770_v8, %v1799_v60  ;;  %v1797_v33 = vadd.f32 %v1670_v6, %v5035_v32  ;;  %v1901_v1 = vpop.f32.mrf.mxu0 }
 0x169   : > { %v3737_v13 = vpop.f32.mrf.mxu1 }
 0x16a   : > { %v5196_v15 = vadd.f32 %v1898_v53, %v1797_v33  ;;  %v1800_v17 = vadd.f32 %v3737_v13, %v5042_v46  ;;  %v3774_v52 = vpop.f32.mrf.mxu0 }
 0x16b   : > { %v1673_v61 = vpop.f32.mrf.mxu1 }
 0x16c   : > { %v5199_v58 = vadd.f32 %v3771_v49, %v1800_v17  ;;  %v1798_v19 = vadd.f32 %v1673_v61, %v5047_v38  ;;  %v1914_v0 = vpop.f32.mrf.mxu0 }
 0x16d   : > { %v3740_v54 = vpop.f32.mrf.mxu1 }
 0x16e   : > { %v5202_v4 = vadd.f32 %v1901_v1, %v1798_v19  ;;  %v1803_v25 = vadd.f32 %v3740_v54, %v5052_v3  ;;  %v3775_v12 = vpop.f32.mrf.mxu0 }
 0x16f   : > { %v1686_v32 = vpop.f32.mrf.mxu1 }
 0x170   : > { %v5205_v41 = vadd.f32 %v3774_v52, %v1803_v25  ;;  %v1801_v37 = vadd.f32 %v1686_v32, %v5055_v9  ;;  %v1917_v48 = vpop.f32.mrf.mxu0 }
 0x171   : > { %v3741_v46 = vpop.f32.mrf.mxu1 }
 0x172   : > { %v5208_v5 = vadd.f32 %v1914_v0, %v1801_v37  ;;  %v1804_v28 = vadd.f32 %v3741_v46, %v5062_v36  ;;  %v3778_v21 = vpop.f32.mrf.mxu0 }
 0x173   : > { %v1689_v38 = vpop.f32.mrf.mxu1 }
 0x174   : > { %v5211_v45 = vadd.f32 %v3775_v12, %v1804_v28  ;;  %v1802_v22 = vadd.f32 %v1689_v38, %v5067_v14  ;;  %v1930_v27 = vpop.f32.mrf.mxu0 }
 0x175   : > { %v3744_v3 = vpop.f32.mrf.mxu1 }
 0x176   : > { %v5214_v8 = vadd.f32 %v1917_v48, %v1802_v22  ;;  %v1807_v63 = vadd.f32 %v3744_v3, %v5072_v42  ;;  %v3779_v40 = vpop.f32.mrf.mxu0 }
 0x177   : > { %v1702_v9 = vpop.f32.mrf.mxu1 }
 0x178   : > { %v5217_v11 = vadd.f32 %v3778_v21, %v1807_v63  ;;  %v1805_v53 = vadd.f32 %v1702_v9, %v5075_v24  ;;  %v1933_v18 = vpop.f32.mrf.mxu0 }
 0x179   : > { %v3745_v36 = vpop.f32.mrf.mxu1 }
 0x17a   : > { %v5220_v60 = vadd.f32 %v1930_v27, %v1805_v53  ;;  %v1808_v49 = vadd.f32 %v3745_v36, %v5082_v26  ;;  %v3782_v6 = vpop.f32.mrf.mxu0 }
 0x17b   : > { %v1705_v14 = vpop.f32.mrf.mxu1 }
 0x17c   : > { %v5223_v33 = vadd.f32 %v3779_v40, %v1808_v49  ;;  %v1806_v1 = vadd.f32 %v1705_v14, %v5087_v30  ;;  %v1946_v13 = vpop.f32.mrf.mxu0 }
 0x17d   : > { %v3748_v42 = vpop.f32.mrf.mxu1 }
 0x17e   : > { %v5226_v17 = vadd.f32 %v1933_v18, %v1806_v1  ;;  %v1811_v52 = vadd.f32 %v3748_v42, %v5092_v62  ;;  %v3783_v61 = vpop.f32.mrf.mxu0 }
 0x17f   : > { %v1718_v24 = vpop.f32.mrf.mxu1 }
 0x180   : > { %v5229_v19 = vadd.f32 %v3782_v6, %v1811_v52  ;;  %v1809_v0 = vadd.f32 %v1718_v24, %v5095_v34  ;;  %v1949_v54 = vpop.f32.mrf.mxu0 }
 0x181   : > { %v3749_v26 = vpop.f32.mrf.mxu1 }
 0x182   : > { %v5232_v25 = vadd.f32 %v1946_v13, %v1809_v0  ;;  %v1812_v12 = vadd.f32 %v3749_v26, %v5102_v35  ;;  %v3786_v32 = vpop.f32.mrf.mxu0 }
 0x183   : > { %v1721_v30 = vpop.f32.mrf.mxu1 }
 0x184   : > { %v5235_v37 = vadd.f32 %v3783_v61, %v1812_v12  ;;  %v1810_v48 = vadd.f32 %v1721_v30, %v5111_v39  ;;  %v1962_v46 = vpop.f32.mrf.mxu0 }
 0x185   : > { %v3752_v62 = vpop.f32.mrf.mxu1 }
 0x186   : > { %5898 = vst [vmem:[#allocation9_spill] sm:$0xff] %v5235_v37  ;;  %v5238_v28 = vadd.f32 %v1949_v54, %v1810_v48  ;;  %v1815_v21 = vadd.f32 %v3752_v62, %v5116_v23  ;;  %v3787_v38 = vpop.f32.mrf.mxu0 }
 0x187   : > { %v1734_v34 = vpop.f32.mrf.mxu1 }
 0x188   : > { %5899 = vst [vmem:[#allocation7_spill] sm:$0xff] %v5238_v28  ;;  %v5241_v22 = vadd.f32 %v3786_v32, %v1815_v21  ;;  %v1813_v27 = vadd.f32 %v1734_v34, %v5119_v56  ;;  %v1965_v3 = vpop.f32.mrf.mxu0 }
 0x189   : > { %v3753_v35 = vpop.f32.mrf.mxu1 }
 0x18a   : > { %5900 = vst [vmem:[#allocation11_spill] sm:$0xff] %v5241_v22  ;;  %v5244_v63 = vadd.f32 %v1962_v46, %v1813_v27  ;;  %v1816_v40 = vadd.f32 %v3753_v35, %v5128_v43  ;;  %v3790_v9 = vpop.f32.mrf.mxu0 }
 0x18b   : > { %v1737_v39 = vpop.f32.mrf.mxu1 }
 0x18c   : > { %5901 = vst [vmem:[#allocation13_spill] sm:$0xff] %v5244_v63  ;;  %v5247_v53 = vadd.f32 %v3787_v38, %v1816_v40  ;;  %v1814_v18 = vadd.f32 %v1737_v39, %v5133_v59  ;;  %v1978_v36 = vpop.f32.mrf.mxu0 }
 0x18d   : > { %v3756_v23 = vpop.f32.mrf.mxu1 }
 0x18e   : > { %5902 = vst [vmem:[#allocation15_spill] sm:$0xff] %v5247_v53  ;;  %v5250_v49 = vadd.f32 %v1965_v3, %v1814_v18  ;;  %v1819_v6 = vadd.f32 %v3756_v23, %v5139_v20  ;;  %v3791_v14 = vpop.f32.mrf.mxu0 }
 0x18f   : > { %v1750_v56 = vpop.f32.mrf.mxu1 }
 0x190   : > { %v5253_v1 = vadd.f32 %v3790_v9, %v1819_v6  ;;  %v1817_v13 = vadd.f32 %v1750_v56, %v5142_v55  ;;  %v1981_v42 = vpop.f32.mrf.mxu0 }
 0x191   : > { %v3757_v43 = vpop.f32.mrf.mxu1 }
 0x192   : > { %v5256_v52 = vadd.f32 %v1978_v36, %v1817_v13  ;;  %v1820_v61 = vadd.f32 %v3757_v43, %v5153_v10  ;;  %v3794_v24 = vpop.f32.mrf.mxu0 }
 0x193   : > { %v1753_v59 = vpop.f32.mrf.mxu1 }
 0x194   : > { %v5259_v0 = vadd.f32 %v3791_v14, %v1820_v61  ;;  %v1818_v54 = vadd.f32 %v1753_v59, %v5160_v44  ;;  %v1994_v26 = vpop.f32.mrf.mxu0 }
 0x195   : > { %v3760_v20 = vpop.f32.mrf.mxu1 }
 0x196   : > { %v5262_v12 = vadd.f32 %v1981_v42, %v1818_v54  ;;  %v1823_v32 = vadd.f32 %v3760_v20, %v5167_v57  ;;  %v3795_v30 = vpop.f32.mrf.mxu0 }
 0x197   : > { %v1766_v55 = vpop.f32.mrf.mxu1 }
 0x198   : > { %v5265_v48 = vadd.f32 %v3794_v24, %v1823_v32  ;;  %v1821_v46 = vadd.f32 %v1766_v55, %v5170_v16  ;;  %v1997_v62 = vpop.f32.mrf.mxu0 }
 0x199   : > { %v3761_v10 = vpop.f32.mrf.mxu1 }
 0x19a   : > { %5903 = vst [vmem:[#allocation19_spill] sm:$0xff] %v5265_v48  ;;  %v5268_v21 = vadd.f32 %v1994_v26, %v1821_v46  ;;  %v1824_v38 = vadd.f32 %v3761_v10, %v5174_v31  ;;  %v3798_v34 = vpop.f32.mrf.mxu0 }
 0x19b   : > { %v1769_v44 = vpop.f32.mrf.mxu1 }
 0x19c   : > { %v5271_v27 = vadd.f32 %v3795_v30, %v1824_v38  ;;  %v1822_v3 = vadd.f32 %v1769_v44, %v5178_v7  ;;  %v2010_v35 = vpop.f32.mrf.mxu0 }
 0x19d   : > { %v3764_v57 = vpop.f32.mrf.mxu1 }
 0x19e   : > { %v5274_v40 = vadd.f32 %v1997_v62, %v1822_v3  ;;  %v1827_v9 = vadd.f32 %v3764_v57, %v5181_v51  ;;  %v3799_v39 = vpop.f32.mrf.mxu0 }
 0x19f   : > { %v1782_v16 = vpop.f32.mrf.mxu1 }
 0x1a0   : > { %v5277_v18 = vadd.f32 %v3798_v34, %v1827_v9  ;;  %v1825_v36 = vadd.f32 %v1782_v16, %v5184_v50  ;;  %v2013_v23 = vpop.f32.mrf.mxu0 }
 0x1a1   : > { %v3765_v31 = vpop.f32.mrf.mxu1 }
 0x1a2   : > { %v5280_v6 = vadd.f32 %v2010_v35, %v1825_v36  ;;  %v1828_v14 = vadd.f32 %v3765_v31, %v5187_v2  ;;  %v5283_v56 = vpop.f32.mrf.mxu0 }
 0x1a3   : > { %v1785_v7 = vpop.f32.mrf.mxu1 }
 0x1a4   : > { %v5285_v13 = vadd.f32 %v3799_v39, %v1828_v14  ;;  %v1826_v42 = vadd.f32 %v1785_v7, %v5190_v47  ;;  %v5288_v51 = vpop.f32.mrf.mxu0 }
 0x1a5   : > { %v5290_v43 = vpop.f32.mrf.mxu1 }
 0x1a6   : > { %v5292_v61 = vadd.f32 %v2013_v23, %v1826_v42  ;;  %v5294_v50 = vpop.f32.mrf.mxu0 }
 0x1a7   : > { %v5296_v24 = vpop.f32.mrf.mxu1 }
 0x1a8   : > { %v5298_v59 = vpop.f32.mrf.mxu0 }
 0x1a9   : > { %v5300_v2 = vpop.f32.mrf.mxu1 }
 0x1aa   : > { %v5302_v54 = vpop.f32.mrf.mxu0 }
 0x1ab   : > { %v5304_v26 = vpop.f32.mrf.mxu1 }
 0x1ac   : > { %v5306_v20 = vpop.f32.mrf.mxu0 }
 0x1ad   : > { %v5308_v47 = vpop.f32.mrf.mxu1 }
 0x1ae   : > { %v5310_v32 = vpop.f32.mrf.mxu0 }
 0x1af   : > { %v5312_v30 = vpop.f32.mrf.mxu1 }
 0x1b0   : > { %v5314_v55 = vpop.f32.mrf.mxu0 }
 0x1b1   : > { %v5316_v46 = vpop.f32.mrf.mxu1 }
 0x1b2   : > { %v5318_v62 = vpop.f32.mrf.mxu0 }
 0x1b3   : > { %5904 = vst [vmem:[#allocation24_spill] sm:$0xff] %v5318_v62  ;;  %v5320_v10 = vpop.f32.mrf.mxu1 }
 0x1b4   : > { %v5322_v38 = vpop.f32.mrf.mxu0 }
 0x1b5   : > { %5905 = vst [vmem:[#allocation5_spill] sm:$0xff] %v5322_v38  ;;  %v5324_v34 = vpop.f32.mrf.mxu1 }
 0x1b6   : > { %v5326_v44 = vpop.f32.mrf.mxu0 }
 0x1b7   : > { %5906 = vst [vmem:[#allocation10_spill] sm:$0xff] %v5326_v44  ;;  %v5328_v3 = vpop.f32.mrf.mxu1 }
 0x1b8   : > { %v5330_v35 = vpop.f32.mrf.mxu0 }
 0x1b9   : > { %5907 = vst [vmem:[#allocation12_spill] sm:$0xff] %v5330_v35  ;;  %v5332_v57 = vpop.f32.mrf.mxu1 }
 0x1ba   : > { %v5334_v9 = vpop.f32.mrf.mxu0 }
 0x1bb   : > { %5908 = vst [vmem:[#allocation14_spill] sm:$0xff] %v5334_v9  ;;  %v5336_v39 = vpop.f32.mrf.mxu1 }
 0x1bc   : > { %v5338_v16 = vpop.f32.mrf.mxu0 }
 0x1bd   : > { %5909 = vst [vmem:[#allocation17_spill] sm:$0xff] %v5338_v16  ;;  %v5340_v36 = vpop.f32.mrf.mxu1 }
 0x1be   : > { %v5342_v23 = vpop.f32.mrf.mxu0 }
 0x1bf   : > { %5910 = vst [vmem:[#allocation22_spill] sm:$0xff] %v5342_v23  ;;  %v5344_v31 = vpop.f32.mrf.mxu1 }
 0x1c0   : > { %5911 = vst [vmem:[#allocation25_spill] sm:$0xff] %v5344_v31  ;;  %v5346_v14 = vpop.f32.mrf.mxu0 }
 0x1c1   : > { %5912 = vst [vmem:[#allocation2_spill] sm:$0xff] %v5346_v14  ;;  %v5348_v7 = vpop.f32.mrf.mxu1 }
 0x1c2   : > { %5913 = vst [vmem:[#allocation20_spill] sm:$0xff] %v5348_v7  ;;  %v5350_v42 = vpop.f32.mrf.mxu0 }
 0x1c3   : > { %5914 = vst [vmem:[#allocation16_spill] sm:$0xff] %v5350_v42  ;;  %v5352_v48 = vpop.f32.mrf.mxu1 }
 0x1c4   : > { %5915 = vst [vmem:[#allocation18_spill] sm:$0xff] %v5352_v48  ;;  %v5354_v53 = vpop.f32.mrf.mxu0 }
 0x1c5   : > { %5916 = vst [vmem:[#allocation21_spill] sm:$0xff] %v5354_v53  ;;  %v5356_v63 = vpop.f32.mrf.mxu1 }
 0x1c6   : > { %5917 = vst [vmem:[#allocation23_spill] sm:$0xff] %v5356_v63  ;;  %v5358_v22 = vpop.f32.mrf.mxu0 }
 0x1c7   : > { %5918 = vst [vmem:[#allocation8_spill] sm:$0xff] %v5358_v22  ;;  %v5360_v16 = vpop.f32.mrf.mxu1 }
 0x1c8   : > { %5919 = vst [vmem:[#allocation3_spill] sm:$0xff] %v5360_v16  ;;  %v2383_v9 = vpop.f32.mrf.mxu0 }
 0x1c9   : > { %v5362_v23 = vpop.f32.mrf.mxu1 }
 0x1ca   : > { %5920 = vst [vmem:[#allocation4_spill] sm:$0xff] %v5362_v23  ;;  %v3858_v35 = vpop.f32.mrf.mxu0 }
 0x1cb   : > { %v2177_v28 = vpop.f32.mrf.mxu1 }
 0x1cc   : > { %v2254_v14 = vadd.f32 %v2177_v28, %v5250_v49  ;;  %v2396_v7 = vpop.f32.mrf.mxu0 }
 0x1cd   : > { %v3824_v37 = vpop.f32.mrf.mxu1 }
 0x1ce   : > { %v5365_v42 = vadd.f32 %v2383_v9, %v2254_v14  ;;  %v2259_v48 = vadd.f32 %v3824_v37, %v5253_v1  ;;  %v3859_v53 = vpop.f32.mrf.mxu0 }
 0x1cf   : > { %v2190_v44 = vpop.f32.mrf.mxu1 }
 0x1d0   : > { %v5368_v63 = vadd.f32 %v3858_v35, %v2259_v48  ;;  %v2257_v22 = vadd.f32 %v2190_v44, %v5256_v52  ;;  %v2399_v16 = vpop.f32.mrf.mxu0 }
 0x1d1   : > { %v3825_v38 = vpop.f32.mrf.mxu1 }
 0x1d2   : > { %v5371_v62 = vadd.f32 %v2396_v7, %v2257_v22  ;;  %v2260_v23 = vadd.f32 %v3825_v38, %v5259_v0  ;;  %v5374_v31 = vpop.f32.mrf.mxu0 }
 0x1d3   : > { %v2193_v28 = vpop.f32.mrf.mxu1 }
 0x1d4   : > { %v5376_v49 = vadd.f32 %v3859_v53, %v2260_v23  ;;  %v2258_v9 = vadd.f32 %v2193_v28, %v5262_v12  ;;  %v2412_v37 = vpop.f32.mrf.mxu0 }
 0x1d5   : > { %v5379_v1 = vpop.f32.mrf.mxu1 }
 0x1d6   : > { %5921 = vst [vmem:[#allocation6_spill] sm:$0xff] %v5376_v49  ;;  %v5381_v48 = vadd.f32 %v2399_v16, %v2258_v9  ;;  %v3863_v35 = vpop.f32.mrf.mxu0 }
 0x1d7   : > { %v2206_v52 = vpop.f32.mrf.mxu1 }
 0x1d8   : > { %5922 = vst [vmem:[#allocation26_spill] sm:$0xff] %v5381_v48  ;;  %v2261_v44 = vadd.f32 %v2206_v52, %v5268_v21  ;;  %v2415_v22 = vpop.f32.mrf.mxu0  ;;  %v2239_v21 = vadd.f32 %v5290_v43, %v5193_v29  ;;  %v2240_v29 = vadd.f32 %v5300_v2, %v5199_v58  ;;  %v2244_v58 = vadd.f32 %v5316_v46, %v5211_v45 }
 0x1d9   : > { %v3829_v14 = vpop.f32.mrf.mxu1 }
 0x1da   : > { %v5384_v7 = vadd.f32 %v2412_v37, %v2261_v44  ;;  %v2264_v0 = vadd.f32 %v3829_v14, %v5271_v27  ;;  %v3866_v38 = vpop.f32.mrf.mxu0 }
 0x1db   : > { %v2209_v53 = vpop.f32.mrf.mxu1 }
 0x1dc   : > { %v5387_v23 = vadd.f32 %v3863_v35, %v2264_v0  ;;  %v2262_v12 = vadd.f32 %v2209_v53, %v5274_v40  ;;  %v2428_v28 = vpop.f32.mrf.mxu0  ;;  %v2237_v40 = vadd.f32 %v5296_v24, %v5196_v15 }
 0x1dd   : > { %v3832_v49 = vpop.f32.mrf.mxu1 }
 0x1de   : > { %v5390_v16 = vadd.f32 %v2415_v22, %v2262_v12  ;;  %v2267_v9 = vadd.f32 %v3832_v49, %v5277_v18  ;;  %v3867_v48 = vpop.f32.mrf.mxu0  ;;  %v2445_v18 = vadd.f32 %v5283_v56, %v2239_v21  ;;  %v2238_v49 = vadd.f32 %v5304_v26, %v5202_v4 }
 0x1df   : > { %v2222_v37 = vpop.f32.mrf.mxu1  ;;  %v2443_v56 = vadd.f32 %v5288_v51, %v2237_v40 }
 0x1e0   : > { %v5395_v52 = vadd.f32 %v3866_v38, %v2267_v9  ;;  %v2265_v27 = vadd.f32 %v2222_v37, %v5280_v6  ;;  %v2431_v44 = vpop.f32.mrf.mxu0  ;;  %v2243_v6 = vadd.f32 %v5308_v47, %v5205_v41  ;;  %v2446_v41 = vadd.f32 %v5294_v50, %v2240_v29 }
 0x1e1   : > { %v3833_v35 = vpop.f32.mrf.mxu1  ;;  %v2242_v47 = vadd.f32 %v5320_v10, %v5214_v8  ;;  %v2444_v51 = vadd.f32 %v5298_v59, %v2238_v49  ;;  %v2247_v50 = vadd.f32 %v5324_v34, %v5217_v11  ;;  %v2245_v8 = vadd.f32 %v5328_v3, %v5220_v60  ;;  %v5440_v59 = vld [vmem:[%s5778_s3] ss:$0 sm:$0xff]  ;;  %v5923_v34 = vld [vmem:[#allocation25_spill] sm:$0xff] }
 0x1e2   : > { %v5400_v14 = vadd.f32 %v2428_v28, %v2265_v27  ;;  %v2268_v22 = vadd.f32 %v3833_v35, %v5285_v13  ;;  %v3906_v0 = vpop.f32.mrf.mxu0  ;;  %v2241_v13 = vadd.f32 %v5312_v30, %v5208_v5  ;;  %v2449_v30 = vadd.f32 %v5302_v54, %v2243_v6  ;;  %v5930_v49 = vld [vmem:[#allocation18_spill] sm:$0xff] }
 0x1e3   : > { %v2225_v43 = vpop.f32.mrf.mxu1  ;;  %v2248_v10 = vadd.f32 %v5332_v57, %v5223_v33  ;;  %v2450_v28 = vadd.f32 %v5310_v32, %v2244_v58  ;;  %v2448_v11 = vadd.f32 %v5314_v55, %v2242_v47  ;;  %v2246_v60 = vadd.f32 %v5336_v39, %v5226_v17  ;;  %v5926_v17 = vld [vmem:[#allocation10_spill] sm:$0xff] }
 0x1e4   : > { %v5410_v38 = vadd.f32 %v3867_v48, %v2268_v22  ;;  %v2266_v15 = vadd.f32 %v2225_v43, %v5292_v61  ;;  %v2756_v24 = vpop.f32.mrf.mxu0  ;;  %v5426_v61 = vld [vmem:[%s5777_s2] ss:$0 sm:$0xff]  ;;  %v2447_v12 = vadd.f32 %v5306_v20, %v2241_v13  ;;  %v2251_v33 = vadd.f32 %v5340_v36, %v5229_v19  ;;  %v5924_v22 = vld [vmem:[#allocation24_spill] sm:$0xff]  ;;  %v5927_v19 = vld [vmem:[#allocation9_spill] sm:$0xff] }
 0x1e5   : > { %v3872_v53 = vpop.f32.mrf.mxu1  ;;  %v2249_v3 = vadd.f32 %v5923_v34, %v5232_v25  ;;  %v2453_v55 = vadd.f32 %v5924_v22, %v2247_v50  ;;  %v5458_v39 = vadd.f32 %v5926_v17, %v2248_v10  ;;  %v5928_v36 = vld [vmem:[#allocation20_spill] sm:$0xff]  ;;  %v5929_v43 = vld [vmem:[#allocation7_spill] sm:$0xff]  ;;  %v5934_v10 = vld [vmem:[#allocation22_spill] sm:$0xff] }
 0x1e6   : > { %v5418_v2 = vadd.f32 %v2431_v44, %v2266_v15  ;;  %v2673_v4 = vadd.f32 %v3872_v53, %v2445_v18  ;;  %v3907_v26 = vpop.f32.mrf.mxu0  ;;  %v2252_v29 = vadd.f32 %v5928_v36, %v5927_v19  ;;  %v2250_v6 = vadd.f32 %v5930_v49, %v5929_v43  ;;  %v5942_v43 = vld [vmem:[#allocation4_spill] sm:$0xff] }
 0x1e7   : > { %v2544_v5 = vpop.f32.mrf.mxu1 }
 0x1e8   : > { %v2885_v45 = vadd.f32 %v3906_v0, %v2673_v4  ;;  %v2671_v46 = vadd.f32 %v2544_v5, %v2443_v56  ;;  %v2759_v48 = vpop.f32.mrf.mxu0  ;;  %v5925_v0 = vld [vmem:[#allocation5_spill] sm:$0xff]  ;;  %v5931_v56 = vld [vmem:[#allocation12_spill] sm:$0xff]  ;;  %v5932_v4 = vld [vmem:[#allocation14_spill] sm:$0xff] }
 0x1e9   : > { %v3873_v54 = vpop.f32.mrf.mxu1  ;;  %v2451_v18 = vadd.f32 %v5925_v0, %v2245_v8  ;;  %v5470_v58 = vadd.f32 %v5931_v56, %v2246_v60  ;;  %v5943_v56 = vld [vmem:[#allocation19_spill] sm:$0xff] }
 0x1ea   : > { %v2924_v9 = vmul.f32 %v5426_v61, %v2885_v45  ;;  %v2883_v20 = vadd.f32 %v2756_v24, %v2671_v46  ;;  %v2674_v21 = vadd.f32 %v3873_v54, %v2446_v41  ;;  %v3910_v37 = vpop.f32.mrf.mxu0  ;;  %v5483_v54 = vadd.f32 %v5934_v10, %v2252_v29 }
 0x1eb   : > { %v2547_v57 = vpop.f32.mrf.mxu1 }
 0x1ec   : > { %v5452_v27 = vadd.f32 %v5440_v59, %v2924_v9  ;;  %v2922_v32 = vmul.f32 %v5426_v61, %v2883_v20  ;;  %v2886_v44 = vadd.f32 %v3907_v26, %v2674_v21  ;;  %v2672_v35 = vadd.f32 %v2547_v57, %v2444_v51  ;;  %v2772_v40 = vpop.f32.mrf.mxu0  ;;  %v5933_v51 = vld [vmem:[#allocation17_spill] sm:$0xff]  ;;  %v5935_v21 = vld [vmem:[#allocation2_spill] sm:$0xff]  ;;  %v5936_v57 = vld [vmem:[#allocation11_spill] sm:$0xff] }
 0x1ed   : > { %v3876_v25 = vpop.f32.mrf.mxu1  ;;  %v5473_v26 = vadd.f32 %v5932_v4, %v2251_v33  ;;  %v5476_v45 = vadd.f32 %v5933_v51, %v2249_v3  ;;  %v5488_v60 = vadd.f32 %v5935_v21, %v2250_v6  ;;  %v2263_v4 = vadd.f32 %v5379_v1, %v5943_v56 }
 0x1ee   : > { %v3027_v15 = vmul.f32 0.70710677, %v5452_v27  ;;  %v5466_v24 = vadd.f32 %v5440_v59, %v2922_v32  ;;  %v2925_v13 = vmul.f32 %v5426_v61, %v2886_v44  ;;  %v3911_v53 = vpop.f32.mrf.mxu0  ;;  %v2884_v41 = vadd.f32 %v2759_v48, %v2672_v35  ;;  %v5937_v32 = vld [vmem:[#allocation23_spill] sm:$0xff] }
 0x1ef   : > { %v2677_v47 = vadd.f32 %v3876_v25, %v2449_v30  ;;  %v2560_v5 = vpop.f32.mrf.mxu1  ;;  %v2255_v44 = vadd.f32 %v5937_v32, %v5936_v57  ;;  %v5941_v25 = vld [vmem:[#allocation15_spill] sm:$0xff] }
 0x1f0   : > { %3975 = verf.f32 %v3027_v15  ;;  %v3025_v46 = vmul.f32 0.70710677, %v5466_v24  ;;  %v5480_v50 = vadd.f32 %v5440_v59, %v2925_v13  ;;  %v2775_v8 = vpop.f32.mrf.mxu0  ;;  %v2923_v9 = vmul.f32 %v5426_v61, %v2884_v41 }
 0x1f1   : > { %v2889_v48 = vadd.f32 %v3910_v37, %v2677_v47  ;;  %v2675_v30 = vadd.f32 %v2560_v5, %v2447_v12  ;;  %v3877_v20 = vpop.f32.mrf.mxu1  ;;  %v5938_v37 = vld [vmem:[#allocation13_spill] sm:$0xff]  ;;  %v5939_v12 = vld [vmem:[#allocation3_spill] sm:$0xff]  ;;  %v2256_v49 = vadd.f32 %v5942_v43, %v5941_v25  ;;  %v5944_v5 = vld [vmem:[#allocation16_spill] sm:$0xff] }
 0x1f2   : > { %3977 = verf.f32 %v3025_v46  ;;  %v3028_v33 = vmul.f32 0.70710677, %v5480_v50  ;;  %v2678_v34 = vadd.f32 %v3877_v20, %v2450_v28  ;;  %v3914_v3 = vpop.f32.mrf.mxu0  ;;  %v2962_v35 = vadd.f32 %v5440_v59, %v2923_v9  ;;  %v5945_v20 = vld [vmem:[#allocation21_spill] sm:$0xff] }
 0x1f3   : > { %v2928_v22 = vmul.f32 %v5426_v61, %v2889_v48  ;;  %v2887_v0 = vadd.f32 %v2772_v40, %v2675_v30  ;;  %v2563_v17 = vpop.f32.mrf.mxu1  ;;  %v2253_v19 = vadd.f32 %v5939_v12, %v5938_v37  ;;  %v5513_v51 = vadd.f32 %v5944_v5, %v2255_v44 }
 0x1f4   : > { %3979 = verf.f32 %v3028_v33  ;;  %v2890_v28 = vadd.f32 %v3911_v53, %v2678_v34  ;;  %v2676_v36 = vadd.f32 %v2563_v17, %v2448_v11  ;;  %v2788_v29 = vpop.f32.mrf.mxu0  ;;  %v3026_v6 = vmul.f32 0.70710677, %v2962_v35  ;;  %v5946_v33 = vld [vmem:[#allocation8_spill] sm:$0xff] }
 0x1f5   : > { %v5506_v40 = vadd.f32 %v5440_v59, %v2928_v22  ;;  %v2926_v15 = vmul.f32 %v5426_v61, %v2887_v0  ;;  %v3880_v13 = vpop.f32.mrf.mxu1  ;;  %v5530_v21 = vadd.f32 %v5945_v20, %v2253_v19  ;;  %v5533_v34 = vadd.f32 %v5946_v33, %v2256_v49 }
 0x1f6   : > { %v2929_v41 = vmul.f32 %v5426_v61, %v2890_v28  ;;  %v2888_v53 = vadd.f32 %v2775_v8, %v2676_v36  ;;  %v2681_v11 = vadd.f32 %v3880_v13, %v2453_v55  ;;  %v3915_v47 = vpop.f32.mrf.mxu0  ;;  %3981 = verf.f32 %v3026_v6 }
 0x1f7   : > { %v3031_v46 = vmul.f32 0.70710677, %v5506_v40  ;;  %v5517_v10 = vadd.f32 %v5440_v59, %v2926_v15  ;;  %v2576_v9 = vpop.f32.mrf.mxu1  ;;  %v5537_v44 = vadd.f32 %v5374_v31, %v2263_v4  ;;  %v2995_v17 = vmul.f32 0.5, %v5452_v27 }
 0x1f8   : > { %v5526_v1 = vadd.f32 %v5440_v59, %v2929_v41  ;;  %v2927_v55 = vmul.f32 %v5426_v61, %v2888_v53  ;;  %v2893_v8 = vadd.f32 %v3914_v3, %v2681_v11  ;;  %v2679_v48 = vadd.f32 %v2576_v9, %v2451_v18  ;;  %v2791_v30 = vpop.f32.mrf.mxu0 }
 0x1f9   : > { %3983 = verf.f32 %v3031_v46  ;;  %v3029_v57 = vmul.f32 0.70710677, %v5517_v10  ;;  %v3881_v32 = vpop.f32.mrf.mxu1  ;;  %v2993_v28 = vmul.f32 0.5, %v5466_v24  ;;  %v2996_v49 = vmul.f32 0.5, %v5480_v50 }
 0x1fa   : > { %v3032_v22 = vmul.f32 0.70710677, %v5526_v1  ;;  %v5541_v3 = vadd.f32 %v5440_v59, %v2927_v55  ;;  %v2932_v18 = vmul.f32 %v5426_v61, %v2893_v8  ;;  %v3918_v0 = vpop.f32.mrf.mxu0  ;;  %v2891_v37 = vadd.f32 %v2788_v29, %v2679_v48 }
 0x1fb   : > { %3985 = verf.f32 %v3029_v57  ;;  %v2682_v12 = vadd.f32 %v3881_v32, %v5458_v39  ;;  %v2579_v19 = vpop.f32.mrf.mxu1  ;;  %v2994_v13 = vmul.f32 0.5, %v2962_v35  ;;  %v2999_v55 = vmul.f32 0.5, %v5506_v40 }
 0x1fc   : > { %3987 = verf.f32 %v3032_v22  ;;  %v3030_v31 = vmul.f32 0.70710677, %v5541_v3  ;;  %v5550_v36 = vadd.f32 %v5440_v59, %v2932_v18  ;;  %v2804_v25 = vpop.f32.mrf.mxu0  ;;  %v2930_v27 = vmul.f32 %v5426_v61, %v2891_v37 }
 0x1fd   : > { %v3976_v43 = vpop.eup %3975  ;;  %v2894_v6 = vadd.f32 %v3915_v47, %v2682_v12  ;;  %v2680_v29 = vadd.f32 %v2579_v19, %v5470_v58  ;;  %v3884_v39 = vpop.f32.mrf.mxu1  ;;  %v2997_v22 = vmul.f32 0.5, %v5517_v10 }
 0x1fe   : > { %v3091_v15 = vadd.f32 1.0, %v3976_v43  ;;  %3989 = verf.f32 %v3030_v31  ;;  %v3035_v24 = vmul.f32 0.70710677, %v5550_v36  ;;  %v3919_v56 = vpop.f32.mrf.mxu0  ;;  %v5562_v50 = vadd.f32 %v5440_v59, %v2930_v27 }
 0x1ff   : > { %v3978_v4 = vpop.eup %3977  ;;  %v2933_v41 = vmul.f32 %v5426_v61, %v2894_v6  ;;  %v2892_v58 = vadd.f32 %v2791_v30, %v2680_v29  ;;  %v2685_v53 = vadd.f32 %v3884_v39, %v5473_v26  ;;  %v2592_v35 = vpop.f32.mrf.mxu1 }
 0x200   : > { %v3123_v11 = vmul.f32 %v3091_v15, %v2995_v17  ;;  %v3089_v47 = vadd.f32 1.0, %v3978_v4  ;;  %3991 = verf.f32 %v3035_v24  ;;  %v2683_v5 = vadd.f32 %v2592_v35, %v5476_v45  ;;  %v2807_v46 = vpop.f32.mrf.mxu0 }
 0x201   : > { %v3980_v9 = vpop.eup %3979  ;;  %v3033_v8 = vmul.f32 0.70710677, %v5562_v50  ;;  %v5570_v48 = vadd.f32 %v5440_v59, %v2933_v41  ;;  %v2931_v30 = vmul.f32 %v5426_v61, %v2892_v58  ;;  %v3885_v20 = vpop.f32.mrf.mxu1  ;;  %v2897_v57 = vadd.f32 %v3918_v0, %v2685_v53 }
 0x202   : > { %3155 = vst.msk [vmem:[%s5559_s24 + $0x10] sm:$0xff] %vm692_vm3, %v3123_v11  ;;  %v3121_v26 = vmul.f32 %v3089_v47, %v2993_v28  ;;  %v3092_v33 = vadd.f32 1.0, %v3980_v9  ;;  %v2895_v32 = vadd.f32 %v2804_v25, %v2683_v5  ;;  %v3922_v45 = vpop.f32.mrf.mxu0  ;;  %v2686_v28 = vadd.f32 %v3885_v20, %v5483_v54 }
 0x203   : > { %3993 = verf.f32 %v3033_v8  ;;  %v3036_v40 = vmul.f32 0.70710677, %v5570_v48  ;;  %v5578_v18 = vadd.f32 %v5440_v59, %v2931_v30  ;;  %v2595_v17 = vpop.f32.mrf.mxu1  ;;  %v3982_v37 = vpop.eup %3981  ;;  %v2936_v19 = vmul.f32 %v5426_v61, %v2897_v57 }
 0x204   : > { %3153 = vst.msk [vmem:[%s5559_s24] sm:$0xff] %vm692_vm3, %v3121_v26  ;;  %v3124_v12 = vmul.f32 %v3092_v33, %v2996_v49  ;;  %v2934_v0 = vmul.f32 %v5426_v61, %v2895_v32  ;;  %v2820_v31 = vpop.f32.mrf.mxu0  ;;  %v3090_v10 = vadd.f32 1.0, %v3982_v37  ;;  %v3000_v25 = vmul.f32 0.5, %v5526_v1 }
 0x205   : > { %3995 = verf.f32 %v3036_v40  ;;  %v3034_v43 = vmul.f32 0.70710677, %v5578_v18  ;;  %v3888_v27 = vpop.f32.mrf.mxu1  ;;  %v5590_v29 = vadd.f32 %v5440_v59, %v2936_v19  ;;  %v2898_v39 = vadd.f32 %v3919_v56, %v2686_v28 }
 0x206   : > { %v3984_v6 = vpop.eup %3983  ;;  %3156 = vst.msk [vmem:[%s5559_s24 + $0x18] sm:$0xff] %vm692_vm3, %v3124_v12  ;;  %v5593_v49 = vadd.f32 %v5440_v59, %v2934_v0  ;;  %v2684_v54 = vadd.f32 %v2595_v17, %v5488_v60  ;;  %v3923_v15 = vpop.f32.mrf.mxu0  ;;  %v3122_v24 = vmul.f32 %v3090_v10, %v2994_v13  ;;  %v2689_v4 = vadd.f32 %v3888_v27, %v5513_v51 }
 0x207   : > { %v3095_v1 = vadd.f32 1.0, %v3984_v6  ;;  %3997 = verf.f32 %v3034_v43  ;;  %v2608_v41 = vpop.f32.mrf.mxu1  ;;  %v2998_v53 = vmul.f32 0.5, %v5541_v3  ;;  %v3003_v35 = vmul.f32 0.5, %v5550_v36 }
 0x208   : > { %v3986_v58 = vpop.eup %3985  ;;  %v3039_v11 = vmul.f32 0.70710677, %v5590_v29  ;;  %v3037_v47 = vmul.f32 0.70710677, %v5593_v49  ;;  %v5601_v56 = vpop.f32.mrf.mxu0  ;;  %3154 = vst.msk [vmem:[%s5559_s24 + $0x8] sm:$0xff] %vm692_vm3, %v3122_v24  ;;  %v2937_v51 = vmul.f32 %v5426_v61, %v2898_v39  ;;  %v2896_v9 = vadd.f32 %v2807_v46, %v2684_v54 }
 0x209   : > { %v3988_v60 = vpop.eup %3987  ;;  %v3127_v13 = vmul.f32 %v3095_v1, %v2999_v55  ;;  %v3093_v5 = vadd.f32 1.0, %v3986_v58  ;;  %v3889_v8 = vpop.f32.mrf.mxu1  ;;  %v2901_v3 = vadd.f32 %v3922_v45, %v2689_v4  ;;  %v2687_v36 = vadd.f32 %v2608_v41, %v5530_v21 }
 0x20a   : > { %v3096_v30 = vadd.f32 1.0, %v3988_v60  ;;  %3999 = verf.f32 %v3039_v11  ;;  %v3926_v20 = vpop.f32.mrf.mxu0  ;;  %v5610_v55 = vadd.f32 %v5440_v59, %v2937_v51  ;;  %v2935_v57 = vmul.f32 %v5426_v61, %v2896_v9 }
 0x20b   : > { %v3990_v26 = vpop.eup %3989  ;;  %3159 = vst.msk [vmem:[%s5559_s24 + $0x30] sm:$0xff] %vm692_vm3, %v3127_v13  ;;  %v3125_v33 = vmul.f32 %v3093_v5, %v2997_v22  ;;  %4001 = verf.f32 %v3037_v47  ;;  %v2611_v46 = vpop.f32.mrf.mxu1  ;;  %v2940_v45 = vmul.f32 %v5426_v61, %v2901_v3  ;;  %v2899_v17 = vadd.f32 %v2820_v31, %v2687_v36  ;;  %v5947_v36 = vld [vmem:[#allocation6_spill] sm:$0xff] }
 0x20c   : > { %v3128_v32 = vmul.f32 %v3096_v30, %v3000_v25  ;;  %v3094_v40 = vadd.f32 1.0, %v3990_v26  ;;  %v2836_v37 = vpop.f32.mrf.mxu0  ;;  %v3001_v12 = vmul.f32 0.5, %v5562_v50  ;;  %v3040_v22 = vmul.f32 0.70710677, %v5610_v55 }
 0x20d   : > { %v3992_v21 = vpop.eup %3991  ;;  %3157 = vst.msk [vmem:[%s5559_s24 + $0x20] sm:$0xff] %vm692_vm3, %v3125_v33  ;;  %v5619_v19 = vadd.f32 %v5440_v59, %v2935_v57  ;;  %v2690_v0 = vadd.f32 %v3889_v8, %v5533_v34  ;;  %v3892_v28 = vpop.f32.mrf.mxu1  ;;  %v5625_v31 = vadd.f32 %v5440_v59, %v2940_v45  ;;  %v2938_v43 = vmul.f32 %v5426_v61, %v2899_v17 }
 0x20e   : > { %3160 = vst.msk [vmem:[%s5559_s24 + $0x38] sm:$0xff] %vm692_vm3, %v3128_v32  ;;  %v3126_v10 = vmul.f32 %v3094_v40, %v2998_v53  ;;  %v3099_v25 = vadd.f32 1.0, %v3992_v21  ;;  %v3927_v27 = vpop.f32.mrf.mxu0  ;;  %v3004_v50 = vmul.f32 0.5, %v5570_v48  ;;  %4003 = verf.f32 %v3040_v22  ;;  %v5948_v22 = vld [vmem:[#allocation26_spill] sm:$0xff] }
 0x20f   : > { %v3038_v6 = vmul.f32 0.70710677, %v5619_v19  ;;  %v2902_v39 = vadd.f32 %v3923_v15, %v2690_v0  ;;  %v2624_v54 = vpop.f32.mrf.mxu1  ;;  %v3002_v1 = vmul.f32 0.5, %v5578_v18  ;;  %v3043_v4 = vmul.f32 0.70710677, %v5625_v31 }
 0x210   : > { %v3994_v34 = vpop.eup %3993  ;;  %3158 = vst.msk [vmem:[%s5559_s24 + $0x28] sm:$0xff] %vm692_vm3, %v3126_v10  ;;  %v3131_v24 = vmul.f32 %v3099_v25, %v3003_v35  ;;  %v5635_v41 = vadd.f32 %v5440_v59, %v2938_v43  ;;  %v2839_v58 = vpop.f32.mrf.mxu0  ;;  %v2688_v11 = vadd.f32 %v2611_v46, %v5365_v42  ;;  %v3007_v35 = vmul.f32 0.5, %v5590_v29 }
 0x211   : > { %v3097_v53 = vadd.f32 1.0, %v3994_v34  ;;  %4005 = verf.f32 %v3038_v6  ;;  %v2941_v48 = vmul.f32 %v5426_v61, %v2902_v39  ;;  %v3893_v15 = vpop.f32.mrf.mxu1  ;;  %v2693_v60 = vadd.f32 %v3892_v28, %v5368_v63 }
 0x212   : > { %v3996_v47 = vpop.eup %3995  ;;  %3163 = vst.msk [vmem:[%s5559_s24 + $0x50] sm:$0xff] %vm692_vm3, %v3131_v24  ;;  %4007 = verf.f32 %v3043_v4  ;;  %v3041_v18 = vmul.f32 0.70710677, %v5635_v41  ;;  %v3930_v13 = vpop.f32.mrf.mxu0  ;;  %v2900_v42 = vadd.f32 %v5601_v56, %v2688_v11  ;;  %v2691_v29 = vadd.f32 %v2624_v54, %v5371_v62 }
 0x213   : > { %v3129_v5 = vmul.f32 %v3097_v53, %v3001_v12  ;;  %v3100_v51 = vadd.f32 1.0, %v3996_v47  ;;  %v5645_v9 = vadd.f32 %v5440_v59, %v2941_v48  ;;  %v2627_v8 = vpop.f32.mrf.mxu1  ;;  %v2905_v3 = vadd.f32 %v3926_v20, %v2693_v60 }
 0x214   : > { %v3998_v30 = vpop.eup %3997  ;;  %4009 = verf.f32 %v3041_v18  ;;  %v2694_v26 = vadd.f32 %v3893_v15, %v5947_v36  ;;  %v2852_v33 = vpop.f32.mrf.mxu0  ;;  %v3005_v46 = vmul.f32 0.5, %v5593_v49  ;;  %v2939_v56 = vmul.f32 %v5426_v61, %v2900_v42 }
 0x215   : > { %3161 = vst.msk [vmem:[%s5559_s24 + $0x40] sm:$0xff] %vm692_vm3, %v3129_v5  ;;  %v3132_v63 = vmul.f32 %v3100_v51, %v3004_v50  ;;  %v3098_v57 = vadd.f32 1.0, %v3998_v30  ;;  %v3044_v32 = vmul.f32 0.70710677, %v5645_v9  ;;  %v3896_v40 = vpop.f32.mrf.mxu1  ;;  %v2944_v45 = vmul.f32 %v5426_v61, %v2905_v3 }
 0x216   : > { %v2903_v20 = vadd.f32 %v2836_v37, %v2691_v29  ;;  %v2906_v17 = vadd.f32 %v3927_v27, %v2694_v26  ;;  %v5656_v62 = vpop.f32.mrf.mxu0  ;;  %v2692_v0 = vadd.f32 %v2627_v8, %v5948_v22  ;;  %v2697_v49 = vadd.f32 %v3896_v40, %v5537_v44 }
 0x217   : > { %v4000_v21 = vpop.eup %3999  ;;  %3164 = vst.msk [vmem:[%s5559_s24 + $0x58] sm:$0xff] %vm692_vm3, %v3132_v63  ;;  %v3130_v12 = vmul.f32 %v3098_v57, %v3002_v1  ;;  %4011 = verf.f32 %v3044_v32  ;;  %v2640_v28 = vpop.f32.mrf.mxu1  ;;  %v5663_v43 = vadd.f32 %v5440_v59, %v2939_v56  ;;  %v5666_v37 = vadd.f32 %v5440_v59, %v2944_v45 }
 0x218   : > { %v4002_v10 = vpop.eup %4001  ;;  %v3103_v25 = vadd.f32 1.0, %v4000_v21  ;;  %v2942_v27 = vmul.f32 %v5426_v61, %v2903_v20  ;;  %v2945_v6 = vmul.f32 %v5426_v61, %v2906_v17  ;;  %v2904_v39 = vadd.f32 %v2839_v58, %v2692_v0  ;;  %v5672_v34 = vpop.f32.mrf.mxu0 }
 0x219   : > { %3162 = vst.msk [vmem:[%s5559_s24 + $0x48] sm:$0xff] %vm692_vm3, %v3130_v12  ;;  %v3101_v50 = vadd.f32 1.0, %v4002_v10  ;;  %v2909_v54 = vadd.f32 %v3930_v13, %v2697_v49  ;;  %v3897_v44 = vpop.f32.mrf.mxu1  ;;  %v3042_v1 = vmul.f32 0.70710677, %v5663_v43  ;;  %v3047_v53 = vmul.f32 0.70710677, %v5666_v37 }
 0x21a   : > { %v3135_v24 = vmul.f32 %v3103_v25, %v3007_v35  ;;  %v5677_v48 = vadd.f32 %v5440_v59, %v2942_v27  ;;  %v5680_v11 = vadd.f32 %v5440_v59, %v2945_v6  ;;  %v2943_v58 = vmul.f32 %v5426_v61, %v2904_v39  ;;  %v3934_v42 = vpop.f32.mrf.mxu0 }
 0x21b   : > { %v3133_v4 = vmul.f32 %v3101_v50, %v3005_v46  ;;  %v2643_v15 = vpop.f32.mrf.mxu1  ;;  %v4004_v47 = vpop.eup %4003  ;;  %4013 = verf.f32 %v3042_v1  ;;  %v2948_v35 = vmul.f32 %v5426_v61, %v2909_v54  ;;  %v2695_v18 = vadd.f32 %v2640_v28, %v5384_v7 }
 0x21c   : > { %3167 = vst.msk [vmem:[%s5559_s24 + $0x70] sm:$0xff] %vm692_vm3, %v3135_v24  ;;  %v3008_v60 = vmul.f32 0.5, %v5610_v55  ;;  %v3104_v13 = vadd.f32 1.0, %v4004_v47  ;;  %4015 = verf.f32 %v3047_v53  ;;  %v3045_v5 = vmul.f32 0.70710677, %v5677_v48 }
 0x21d   : > { %3165 = vst.msk [vmem:[%s5559_s24 + $0x60] sm:$0xff] %vm692_vm3, %v3133_v4  ;;  %v3900_v51 = vpop.f32.mrf.mxu1  ;;  %v3006_v30 = vmul.f32 0.5, %v5619_v19  ;;  %v3048_v3 = vmul.f32 0.70710677, %v5680_v11  ;;  %v5694_v29 = vadd.f32 %v5440_v59, %v2943_v58  ;;  %v5697_v7 = vadd.f32 %v5440_v59, %v2948_v35 }
 0x21e   : > { %v4006_v8 = vpop.eup %4005  ;;  %v3136_v55 = vmul.f32 %v3104_v13, %v3008_v60  ;;  %4017 = verf.f32 %v3045_v5  ;;  %v2907_v63 = vadd.f32 %v2852_v33, %v2695_v18  ;;  %v3011_v46 = vmul.f32 0.5, %v5625_v31  ;;  %v2868_v33 = vpop.f32.mrf.mxu0 }
 0x21f   : > { %v4008_v36 = vpop.eup %4007  ;;  %v3102_v26 = vadd.f32 1.0, %v4006_v8  ;;  %v2656_v57 = vpop.f32.mrf.mxu1  ;;  %4019 = verf.f32 %v3048_v3  ;;  %v3046_v19 = vmul.f32 0.70710677, %v5694_v29  ;;  %v3009_v45 = vmul.f32 0.5, %v5635_v41 }
 0x220   : > { %v3107_v32 = vadd.f32 1.0, %v4008_v36  ;;  %3168 = vst.msk [vmem:[%s5559_s24 + $0x78] sm:$0xff] %vm692_vm3, %v3136_v55  ;;  %v3051_v20 = vmul.f32 0.70710677, %v5697_v7  ;;  %v2946_v17 = vmul.f32 %v5426_v61, %v2907_v63  ;;  %v2698_v22 = vadd.f32 %v3897_v44, %v5387_v23 }
 0x221   : > { %v4010_v40 = vpop.eup %4009  ;;  %v3134_v56 = vmul.f32 %v3102_v26, %v3006_v30  ;;  %v3901_v21 = vpop.f32.mrf.mxu1  ;;  %4021 = verf.f32 %v3046_v19  ;;  %v2696_v41 = vadd.f32 %v2643_v15, %v5390_v16  ;;  %v2701_v49 = vadd.f32 %v3900_v51, %v5395_v52 }
 0x222   : > { %v3139_v12 = vmul.f32 %v3107_v32, %v3011_v46  ;;  %v3105_v31 = vadd.f32 1.0, %v4010_v40  ;;  %4023 = verf.f32 %v3051_v20  ;;  %v5710_v0 = vadd.f32 %v5440_v59, %v2946_v17  ;;  %v3935_v52 = vpop.f32.mrf.mxu0 }
 0x223   : > { %3166 = vst.msk [vmem:[%s5559_s24 + $0x68] sm:$0xff] %vm692_vm3, %v3134_v56  ;;  %v2910_v25 = vadd.f32 %v5656_v62, %v2698_v22  ;;  %v2699_v27 = vadd.f32 %v2656_v57, %v5400_v14  ;;  %v2702_v23 = vadd.f32 %v3901_v21, %v5410_v38  ;;  %v2659_v50 = vpop.f32.mrf.mxu1  ;;  %v3012_v6 = vmul.f32 0.5, %v5645_v9 }
 0x224   : > { %v4012_v28 = vpop.eup %4011  ;;  %3171 = vst.msk [vmem:[%s5559_s24 + $0x90] sm:$0xff] %vm692_vm3, %v3139_v12  ;;  %v3137_v10 = vmul.f32 %v3105_v31, %v3009_v45  ;;  %v3049_v54 = vmul.f32 0.70710677, %v5710_v0  ;;  %v2908_v16 = vadd.f32 %v5672_v34, %v2696_v41  ;;  %v2913_v24 = vadd.f32 %v3934_v42, %v2701_v49  ;;  %v2871_v51 = vpop.f32.mrf.mxu0 }
 0x225   : > { %v3108_v39 = vadd.f32 1.0, %v4012_v28  ;;  %v2949_v44 = vmul.f32 %v5426_v61, %v2910_v25  ;;  %v2911_v62 = vadd.f32 %v2868_v33, %v2699_v27  ;;  %v2914_v1 = vadd.f32 %v3935_v52, %v2702_v23 }
 0x226   : > { %3169 = vst.msk [vmem:[%s5559_s24 + $0x80] sm:$0xff] %vm692_vm3, %v3137_v10  ;;  %4025 = verf.f32 %v3049_v54  ;;  %v2947_v38 = vmul.f32 %v5426_v61, %v2908_v16  ;;  %v2700_v9 = vadd.f32 %v2659_v50, %v5418_v2  ;;  %v2952_v53 = vmul.f32 %v5426_v61, %v2913_v24 }
 0x227   : > { %v3140_v14 = vmul.f32 %v3108_v39, %v3012_v6  ;;  %v2988_v4 = vadd.f32 %v5440_v59, %v2949_v44  ;;  %v2950_v34 = vmul.f32 %v5426_v61, %v2911_v62  ;;  %v3010_v47 = vmul.f32 0.5, %v5663_v43 }
 0x228   : > { %v4014_v15 = vpop.eup %4013  ;;  %v3015_v58 = vmul.f32 0.5, %v5666_v37  ;;  %v2986_v35 = vadd.f32 %v5440_v59, %v2947_v38  ;;  %v2991_v2 = vadd.f32 %v5440_v59, %v2952_v53  ;;  %v2953_v5 = vmul.f32 %v5426_v61, %v2914_v1 }
 0x229   : > { %3172 = vst.msk [vmem:[%s5559_s24 + $0x98] sm:$0xff] %vm692_vm3, %v3140_v14  ;;  %v4016_v18 = vpop.eup %4015  ;;  %v3106_v60 = vadd.f32 1.0, %v4014_v15  ;;  %v3052_v13 = vmul.f32 0.70710677, %v2988_v4  ;;  %v2989_v30 = vadd.f32 %v5440_v59, %v2950_v34  ;;  %v2912_v3 = vadd.f32 %v2871_v51, %v2700_v9 }
 0x22a   : > { %v3111_v42 = vadd.f32 1.0, %v4016_v18  ;;  %v3050_v8 = vmul.f32 0.70710677, %v2986_v35  ;;  %v3013_v37 = vmul.f32 0.5, %v5677_v48  ;;  %v3055_v55 = vmul.f32 0.70710677, %v2991_v2 }
 0x22b   : > { %v4018_v36 = vpop.eup %4017  ;;  %v3138_v43 = vmul.f32 %v3106_v60, %v3010_v47  ;;  %4027 = verf.f32 %v3052_v13  ;;  %v3016_v46 = vmul.f32 0.5, %v5680_v11  ;;  %v3053_v19 = vmul.f32 0.70710677, %v2989_v30 }
 0x22c   : > { %v4020_v26 = vpop.eup %4019  ;;  %v3143_v63 = vmul.f32 %v3111_v42, %v3015_v58  ;;  %v3109_v57 = vadd.f32 1.0, %v4018_v36  ;;  %4029 = verf.f32 %v3050_v8  ;;  %v2992_v40 = vadd.f32 %v5440_v59, %v2953_v5 }
 0x22d   : > { %3170 = vst.msk [vmem:[%s5559_s24 + $0x88] sm:$0xff] %vm692_vm3, %v3138_v43  ;;  %v3112_v32 = vadd.f32 1.0, %v4020_v26  ;;  %4031 = verf.f32 %v3055_v55  ;;  %v2951_v45 = vmul.f32 %v5426_v61, %v2912_v3  ;;  %v3014_v11 = vmul.f32 0.5, %v5694_v29 }
 0x22e   : > { %v4022_v56 = vpop.eup %4021  ;;  %3175 = vst.msk [vmem:[%s5559_s24 + $0xb0] sm:$0xff] %vm692_vm3, %v3143_v63  ;;  %v3141_v48 = vmul.f32 %v3109_v57, %v3013_v37  ;;  %4033 = verf.f32 %v3053_v19  ;;  %v3019_v21 = vmul.f32 0.5, %v5697_v7  ;;  %v3056_v31 = vmul.f32 0.70710677, %v2992_v40 }
 0x22f   : > { %v4024_v20 = vpop.eup %4023  ;;  %v3144_v17 = vmul.f32 %v3112_v32, %v3016_v46  ;;  %v3110_v33 = vadd.f32 1.0, %v4022_v56  ;;  %v2990_v22 = vadd.f32 %v5440_v59, %v2951_v45  ;;  %v3017_v29 = vmul.f32 0.5, %v5710_v0 }
 0x230   : > { %3173 = vst.msk [vmem:[%s5559_s24 + $0xa0] sm:$0xff] %vm692_vm3, %v3141_v48  ;;  %v3115_v12 = vadd.f32 1.0, %v4024_v20  ;;  %4035 = verf.f32 %v3056_v31  ;;  %v3020_v27 = vmul.f32 0.5, %v2988_v4  ;;  %v3018_v6 = vmul.f32 0.5, %v2986_v35 }
 0x231   : > { %3176 = vst.msk [vmem:[%s5559_s24 + $0xb8] sm:$0xff] %vm692_vm3, %v3144_v17  ;;  %v3142_v61 = vmul.f32 %v3110_v33, %v3014_v11  ;;  %v3054_v49 = vmul.f32 0.70710677, %v2990_v22  ;;  %v3023_v16 = vmul.f32 0.5, %v2991_v2  ;;  %v3021_v62 = vmul.f32 0.5, %v2989_v30 }
 0x232   : > { %v3147_v41 = vmul.f32 %v3115_v12, %v3019_v21  ;;  %v3024_v9 = vmul.f32 0.5, %v2992_v40  ;;  %v3022_v15 = vmul.f32 0.5, %v2990_v22 }
 0x233   : > { %v4026_v28 = vpop.eup %4025  ;;  %3174 = vst.msk [vmem:[%s5559_s24 + $0xa8] sm:$0xff] %vm692_vm3, %v3142_v61  ;;  %4037 = verf.f32 %v3054_v49 }
 0x234   : > { %3179 = vst.msk [vmem:[%s5559_s24 + $0xd0] sm:$0xff] %vm692_vm3, %v3147_v41  ;;  %v3113_v10 = vadd.f32 1.0, %v4026_v28 }
 0x236   : > { %v3145_v7 = vmul.f32 %v3113_v10, %v3017_v29 }
 0x238   : > { %v4028_v25 = vpop.eup %4027  ;;  %3177 = vst.msk [vmem:[%s5559_s24 + $0xc0] sm:$0xff] %vm692_vm3, %v3145_v7 }
 0x239   : > { %v4030_v59 = vpop.eup %4029  ;;  %v3116_v23 = vadd.f32 1.0, %v4028_v25 }
 0x23a   : > { %v4032_v50 = vpop.eup %4031  ;;  %v3114_v39 = vadd.f32 1.0, %v4030_v59 }
 0x23b   : > { %v3148_v54 = vmul.f32 %v3116_v23, %v3020_v27  ;;  %v3119_v52 = vadd.f32 1.0, %v4032_v50  ;;  %v4034_v0 = vpop.eup %4033 }
 0x23c   : > { %v3146_v44 = vmul.f32 %v3114_v39, %v3018_v6  ;;  %v3117_v1 = vadd.f32 1.0, %v4034_v0 }
 0x23d   : > { %3180 = vst.msk [vmem:[%s5559_s24 + $0xd8] sm:$0xff] %vm692_vm3, %v3148_v54  ;;  %v3151_v24 = vmul.f32 %v3119_v52, %v3023_v16  ;;  %v4036_v14 = vpop.eup %4035 }
 0x23e   : > { %3178 = vst.msk [vmem:[%s5559_s24 + $0xc8] sm:$0xff] %vm692_vm3, %v3146_v44  ;;  %v3149_v38 = vmul.f32 %v3117_v1, %v3021_v62  ;;  %v3120_v4 = vadd.f32 1.0, %v4036_v14 }
 0x23f   : > { %3183 = vst.msk [vmem:[%s5559_s24 + $0xf0] sm:$0xff] %vm692_vm3, %v3151_v24 }
 0x240   : > { %v4038_v53 = vpop.eup %4037  ;;  %3181 = vst.msk [vmem:[%s5559_s24 + $0xe0] sm:$0xff] %vm692_vm3, %v3149_v38  ;;  %v3152_v34 = vmul.f32 %v3120_v4, %v3024_v9 }
 0x241   : > { %v3118_v47 = vadd.f32 1.0, %v4038_v53 }
 0x242   : > { %3184 = vst.msk [vmem:[%s5559_s24 + $0xf8] sm:$0xff] %vm692_vm3, %v3152_v34 }
 0x243   : > { %v3150_v58 = vmul.f32 %v3118_v47, %v3022_v15 }
 0x245   : > { %3182 = vst.msk [vmem:[%s5559_s24 + $0xe8] sm:$0xff] %vm692_vm3, %v3150_v58 }
 0x246 PF: > { %s14_s15 = sadd.s32 1, %s4045_s15  }
 0x247   : > { %p11_p5 = scmp.ge.s32.totalorder %s14_s15, 4  }
 0x249   :  { %13 = sbr.rel (!%p11_p5) target bundleno = 1 (0x1), region = 74 }

</bundles_post_ra>
